<compile_context>
chip_gen: v7x
topology: tpu7x:2x2x1
jax: 0.10.0
libtpu: 0.0.40
codegen_flags: <defaults>
</compile_context>

<pallas_src>
import functools

import jax
import jax.numpy as jnp
import numpy as np
from jax.experimental import pallas as pl
from jax.experimental.pallas import tpu as pltpu


def gnn_kernel(x_ref, adj_ref, sea_ref, deg_ref, expand_ref, pool_ref,
               wn0_ref, bn0_ref, wn_ref, bn_ref, weall_ref, beall_ref,
               wm1_ref, bm1_ref, wm2_ref, bm2_ref,
               wv1_ref, bv1_ref, wv2_ref, bv2_ref,
               wfc_ref, bfc_ref, out_ref, *, num_layers):
    f32 = jnp.float32

    x = x_ref[...]              # [Np, F_in] f32
    adj = adj_ref[...]          # [Np, Np]   MXU dtype (bf16 default; 0/1/small counts exact)
    mxu = adj.dtype
    sea = sea_ref[...]          # [Np, D_e]  f32   scatter_tgt @ edge_attr
    deg = deg_ref[...]          # [Np, 1]    f32   in-degree
    expand = expand_ref[...]    # [Np, B]    f32   one_hot(batch)
    pool = pool_ref[...]        # [B, Np]    f32   mean-pool rows (exact mean)

    B = pool.shape[0]
    H = bn0_ref.shape[-1]

    # Fused edge-encoder terms for ALL layers (one K=D_e GEMM instead of L drain-bound ones):
    #   e_all[:, l*H:(l+1)*H] == scatter_tgt @ (edge_attr @ We[l] + be[l])
    we_all = weall_ref[...]                                   # [D_e, L*H] (MXU dtype)
    e_all = (jnp.dot(sea.astype(we_all.dtype), we_all, preferred_element_type=f32)
             + deg * beall_ref[...])                          # [Np, L*H]  f32

    # virtual_node_embedding is initialized to 0 and repeated over graphs.
    vn = jnp.zeros((B, H), f32)
    vn_aggr = jnp.zeros((B, H), f32)
    cur = x
    # TODO(synk): for num_layers >~ 8 switch this Python unroll to lax.fori_loop with dynamic
    # indexing into the stacked weight refs to bound live ranges; unroll is best for small L.
    for l in range(num_layers):
        # --- GINELayerWithVN.forward ---
        if l == 0:
            wn0 = wn0_ref[...]
            h = jnp.dot(cur.astype(wn0.dtype), wn0, preferred_element_type=f32) + bn0_ref[...]
        else:
            wnl = wn_ref[l - 1]
            h = jnp.dot(cur.astype(wnl.dtype), wnl, preferred_element_type=f32) + bn_ref[l - 1]
        # x = x + vn_embed[batch]   (tiny K=B matmul, kept f32)
        h = h + jnp.dot(expand, vn, preferred_element_type=f32)
        # aggr='add' of (x_j + edge_attr)  ==  A @ h + e_term   (bf16 MXU ops, f32 accumulate)
        aggr = (jnp.dot(adj, h.astype(mxu), preferred_element_type=f32)
                + e_all[:, l * H:(l + 1) * H])
        # self.mlp: Linear -> ReLU -> Linear
        wm1 = wm1_ref[l]
        m = jnp.maximum(jnp.dot(aggr.astype(wm1.dtype), wm1, preferred_element_type=f32)
                        + bm1_ref[l], 0.0)
        wm2 = wm2_ref[l]
        m = jnp.dot(m.astype(wm2.dtype), wm2, preferred_element_type=f32) + bm2_ref[l]
        # --- outer model ---
        cur = jnp.maximum(m, 0.0)                                    # F.relu
        # vn_embed = vn_embed + mlp_virtual_node(global_mean_pool(x, batch))
        vn_aggr = jnp.dot(pool, cur, preferred_element_type=f32)     # [B, H], exact mean (f32)
        wv1 = wv1_ref[...]
        v = jnp.maximum(jnp.dot(vn_aggr.astype(wv1.dtype), wv1, preferred_element_type=f32)
                        + bv1_ref[...], 0.0)
        wv2 = wv2_ref[...]
        v = jnp.maximum(jnp.dot(v.astype(wv2.dtype), wv2, preferred_element_type=f32)
                        + bv2_ref[...], 0.0)
        vn = vn + v

    # final global_mean_pool == last layer's vn_aggr (reused, no extra [B,N]@[N,H]), then fc
    wfc = wfc_ref[...]
    out_ref[...] = (jnp.dot(vn_aggr.astype(wfc.dtype), wfc, preferred_element_type=f32)
                    + bfc_ref[...])


def _vmem_limit_bytes(resident_bytes):
    """Generation-aware scoped-VMEM request.

    Gridless call => inputs/outputs are single-buffered, so `resident_bytes` is the actual
    footprint.  Never ask for all of the chip's physical VMEM (leave headroom for compiler
    scratch / spill slabs) — on v7x that means capping ~52 MiB, on v5e/v6e ~116 MiB.
    """
    cap = 64 * 1024 * 1024  # conservative fallback: v7x per-TensorCore physical VMEM
    try:
        cap = int(getattr(pltpu.get_tpu_info(), "vmem_capacity_bytes", cap))
    except Exception:
        pass
    ceiling = max(cap - (12 << 20), 16 << 20)
    want = resident_bytes + (8 << 20)
    return int(min(ceiling, max(32 << 20, want)))


def gnn_forward_pallas(x, edge_index, edge_attr, batch, params, *,
                       num_layers, num_graphs, mxu_dtype=jnp.bfloat16):
    assert num_layers >= 1
    N, F_in = x.shape
    E, D_e = edge_attr.shape
    B = num_graphs
    H = params["bn0"].shape[-1]
    L = num_layers
    out_features = params["wfc"].shape[-1]
    f32 = jnp.float32

    # Pad the node axis to a full sublane tile (16 rows for bf16 packing, 8 for f32).
    # Padded rows have zero adjacency columns and zero pool weight -> never leak into outputs.
    sub = 16 if jnp.dtype(mxu_dtype) == jnp.dtype(jnp.bfloat16) else 8
    Np = ((N + sub - 1) // sub) * sub

    src = edge_index[0]
    tgt = edge_index[1]

    # E-free dense graph operators — built once, outside the kernel, directly in the MXU dtype.
    # NOTE: bf16 adjacency is exact for multi-edge counts <= 256 (typical graphs are 0/1).
    adj = jnp.zeros((Np, Np), mxu_dtype).at[tgt, src].add(jnp.ones((E,), mxu_dtype))
    sea = jnp.zeros((Np, D_e), f32).at[tgt].add(edge_attr.astype(f32))
    deg = jnp.zeros((Np,), f32).at[tgt].add(1.0)[:, None]            # [Np, 1] in-degree
    expand = jax.nn.one_hot(batch, B, dtype=f32)                     # [N, B]
    counts = jnp.maximum(jnp.sum(expand, axis=0), 1.0)               # [B]
    expand = jnp.pad(expand, ((0, Np - N), (0, 0)))                  # [Np, B]
    pool = expand.T / counts[:, None]                                # [B, Np] f32 (exact mean)
    x_p = jnp.pad(x.astype(f32), ((0, Np - N), (0, 0)))              # [Np, F_in]

    # Fuse the L tiny K=D_e edge-encoder GEMMs into one [D_e, L*H] operand.
    we_all = jnp.transpose(params["we"], (1, 0, 2)).reshape(D_e, L * H)
    be_all = params["be"].reshape(1, L * H)

    # Weight operands go through the MXU in mxu_dtype (bf16 default, f32 accumulation);
    # biases and all element-wise math stay f32 (v5e has no bf16 VPU).
    wd = mxu_dtype
    flat_params = (params["wn0"].astype(wd), params["bn0"],
                   params["wn"].astype(wd), params["bn"],
                   we_all.astype(wd), be_all,
                   params["wm1"].astype(wd), params["bm1"],
                   params["wm2"].astype(wd), params["bm2"],
                   params["wv1"].astype(wd), params["bv1"],
                   params["wv2"].astype(wd), params["bv2"],
                   params["wfc"].astype(wd), params["bfc"])

    inputs = (x_p, adj, sea, deg, expand, pool, *flat_params)
    n_inputs = len(inputs)

    in_bytes = sum(int(np.prod(a.shape)) * jnp.dtype(a.dtype).itemsize for a in inputs)
    out_bytes = B * out_features * 4

    # Advisory cost estimate: lets XLA schedule the wrapper's scatter/one-hot prep around the call.
    flops_layer = 2 * (Np * max(F_in, H) * H        # node_encoder
                       + Np * Np * H                # A @ h
                       + 2 * Np * H * H             # mlp
                       + 2 * B * Np * H             # expand @ vn, pool @ cur
                       + 2 * B * H * H)             # vn MLP
    flops = L * flops_layer + 2 * Np * D_e * L * H + 2 * B * H * out_features
    cost = pl.CostEstimate(flops=int(flops), transcendentals=0,
                           bytes_accessed=int(in_bytes + out_bytes))

    vmem_limit = _vmem_limit_bytes(in_bytes + out_bytes)

    # TODO(synk): on v7x (64 MiB VMEM) the whole-array-resident design hits the wall around
    # N ~ 5K nodes per batch; for larger graphs tile the node-row axis of A (grid over row
    # tiles, BlockSpec((TM, Np), lambda i: (i, 0)), "parallel" semantics for the 2nd TensorCore,
    # vn pooling reduced across tiles) and consider fp8-e4m3 adjacency storage on v7x.
    return pl.pallas_call(
        functools.partial(gnn_kernel, num_layers=num_layers),
        out_shape=jax.ShapeDtypeStruct((B, out_features), jnp.float32),
        in_specs=[pl.BlockSpec(memory_space=pltpu.MemorySpace.VMEM)] * n_inputs,
        out_specs=pl.BlockSpec(memory_space=pltpu.MemorySpace.VMEM),
        compiler_params=pltpu.CompilerParams(vmem_limit_bytes=vmem_limit),
        cost_estimate=cost,
    )(*inputs)


# ---------------- pure-JAX reference (for correctness check only) ----------------
def gnn_forward_ref(x, edge_index, edge_attr, batch, params, *, num_layers, num_graphs):
    N, B = x.shape[0], num_graphs
    H = params["bn0"].shape[-1]
    src, tgt = edge_index[0], edge_index[1]
    vn = jnp.zeros((B, H), jnp.float32)
    cur = x
    for l in range(num_layers):
        if l == 0:
            h = cur @ params["wn0"] + params["bn0"]
        else:
            h = cur @ params["wn"][l - 1] + params["bn"][l - 1]
        e = edge_attr @ params["we"][l] + params["be"][l]
        h = h + vn[batch]
        msgs = h[src] + e
        aggr = jnp.zeros((N, H), jnp.float32).at[tgt].add(msgs)
        m = jnp.maximum(aggr @ params["wm1"][l] + params["bm1"][l], 0.0)
        m = m @ params["wm2"][l] + params["bm2"][l]
        cur = jnp.maximum(m, 0.0)
        sums = jnp.zeros((B, H), jnp.float32).at[batch].add(cur)
        cnt = jnp.zeros((B,), jnp.float32).at[batch].add(1.0)
        vn_aggr = sums / jnp.maximum(cnt, 1.0)[:, None]
        v = jnp.maximum(vn_aggr @ params["wv1"] + params["bv1"], 0.0)
        v = jnp.maximum(v @ params["wv2"] + params["bv2"], 0.0)
        vn = vn + v
    sums = jnp.zeros((B, H), jnp.float32).at[batch].add(cur)
    cnt = jnp.zeros((B,), jnp.float32).at[batch].add(1.0)
    pooled = sums / jnp.maximum(cnt, 1.0)[:, None]
    return pooled @ params["wfc"] + params["bfc"]


# ---------------- deterministic parameter init ----------------
def _init_linear(key, fan_in, fan_out):
    kw, kb = jax.random.split(key)
    limit = float(np.sqrt(6.0 / (fan_in + fan_out)))  # xavier_uniform
    w = jax.random.uniform(kw, (fan_in, fan_out), jnp.float32, -limit, limit)
    b = jax.random.uniform(kb, (1, fan_out), jnp.float32, -0.05, 0.05)
    return w, b


def make_params(key, in_features, hidden, edge_dim, out_features, num_layers):
    keys = jax.random.split(key, 6 * num_layers + 3)
    ki = iter(keys)
    wn0, bn0 = _init_linear(next(ki), in_features, hidden)
    wn, bn, we, be, wm1, bm1, wm2, bm2 = [], [], [], [], [], [], [], []
    for l in range(num_layers):
        if l > 0:
            w, b = _init_linear(next(ki), hidden, hidden)
            wn.append(w); bn.append(b)
        w, b = _init_linear(next(ki), edge_dim, hidden); we.append(w); be.append(b)
        w, b = _init_linear(next(ki), hidden, hidden);   wm1.append(w); bm1.append(b)
        w, b = _init_linear(next(ki), hidden, hidden);   wm2.append(w); bm2.append(b)
    wv1, bv1 = _init_linear(next(ki), hidden, hidden)
    wv2, bv2 = _init_linear(next(ki), hidden, hidden)
    wfc, bfc = _init_linear(next(ki), hidden, out_features)
    if num_layers > 1:
        wn_s, bn_s = jnp.stack(wn), jnp.stack(bn)
    else:
        wn_s = jnp.zeros((1, hidden, hidden), jnp.float32)
        bn_s = jnp.zeros((1, 1, hidden), jnp.float32)
    # TODO(synk): GINELayerWithVN.virtual_node_mlp is defined but never used in forward; omitted.
    return dict(
        wn0=wn0, bn0=bn0, wn=wn_s, bn=bn_s,
        we=jnp.stack(we), be=jnp.stack(be),
        wm1=jnp.stack(wm1), bm1=jnp.stack(bm1),
        wm2=jnp.stack(wm2), bm2=jnp.stack(bm2),
        wv1=wv1, bv1=bv1, wv2=wv2, bv2=bv2, wfc=wfc, bfc=bfc,
    )


if __name__ == "__main__":
    # small shapes consistent with the module (hidden 128-aligned; N is a full sublane tile)
    N = 16            # total nodes (8 per graph)
    E = 32            # total edges
    B = 2             # graphs in the batch (batch.max()+1)
    IN_F = 8
    HIDDEN = 128
    EDGE_DIM = 8
    OUT_F = 4
    NUM_LAYERS = 5

    key = jax.random.PRNGKey(0)
    k_x, k_ea, k_e0, k_e1, k_p = jax.random.split(key, 5)

    x = jax.random.normal(k_x, (N, IN_F), jnp.float32)
    edge_attr = jax.random.normal(k_ea, (E, EDGE_DIM), jnp.float32)
    batch = jnp.concatenate([jnp.zeros(N // 2, jnp.int32), jnp.ones(N // 2, jnp.int32)])
    # edges stay within their own graph
    src0 = jax.random.randint(k_e0, (E // 2,), 0, N // 2)
    tgt0 = jax.random.randint(jax.random.fold_in(k_e0, 1), (E // 2,), 0, N // 2)
    src1 = jax.random.randint(k_e1, (E // 2,), N // 2, N)
    tgt1 = jax.random.randint(jax.random.fold_in(k_e1, 1), (E // 2,), N // 2, N)
    edge_index = jnp.stack([jnp.concatenate([src0, src1]),
                            jnp.concatenate([tgt0, tgt1])]).astype(jnp.int32)

    params = make_params(k_p, IN_F, HIDDEN, EDGE_DIM, OUT_F, NUM_LAYERS)

    ref = gnn_forward_ref(x, edge_index, edge_attr, batch, params,
                          num_layers=NUM_LAYERS, num_graphs=B)

    # exactness check: all-f32 path must match the pure-JAX reference tightly
    out_f32 = gnn_forward_pallas(x, edge_index, edge_attr, batch, params,
                                 num_layers=NUM_LAYERS, num_graphs=B,
                                 mxu_dtype=jnp.float32)
    out_f32 = jax.block_until_ready(out_f32)
    np.testing.assert_allclose(np.asarray(out_f32), np.asarray(ref), rtol=1e-4, atol=1e-4)

    # performance default: bf16 MXU operands (adjacency, activations at the dot, weights) with
    # f32 accumulation.  Tolerance documents the expected compounding of bf16-operand GEMMs
    # across 5 layers (few percent relative); elementwise math stays f32.
    out = gnn_forward_pallas(x, edge_index, edge_attr, batch, params,
                             num_layers=NUM_LAYERS, num_graphs=B)
    out = jax.block_until_ready(out)
    np.testing.assert_allclose(np.asarray(out), np.asarray(ref), rtol=1e-1, atol=1e-1)

    print("KERNEL_OK")
</pallas_src>

<mosaic_0001>
module attributes {stable_mosaic.version = 11 : i64} {
  func.func @gnn_kernel(%arg0: memref<16x8xf32, #tpu.memory_space<vmem>>, %arg1: memref<16x16xf32, #tpu.memory_space<vmem>>, %arg2: memref<16x8xf32, #tpu.memory_space<vmem>>, %arg3: memref<16x1xf32, #tpu.memory_space<vmem>>, %arg4: memref<16x2xf32, #tpu.memory_space<vmem>>, %arg5: memref<2x16xf32, #tpu.memory_space<vmem>>, %arg6: memref<8x128xf32, #tpu.memory_space<vmem>>, %arg7: memref<1x128xf32, #tpu.memory_space<vmem>>, %arg8: memref<4x128x128xf32, #tpu.memory_space<vmem>>, %arg9: memref<4x1x128xf32, #tpu.memory_space<vmem>>, %arg10: memref<8x640xf32, #tpu.memory_space<vmem>>, %arg11: memref<1x640xf32, #tpu.memory_space<vmem>>, %arg12: memref<5x128x128xf32, #tpu.memory_space<vmem>>, %arg13: memref<5x1x128xf32, #tpu.memory_space<vmem>>, %arg14: memref<5x128x128xf32, #tpu.memory_space<vmem>>, %arg15: memref<5x1x128xf32, #tpu.memory_space<vmem>>, %arg16: memref<128x128xf32, #tpu.memory_space<vmem>>, %arg17: memref<1x128xf32, #tpu.memory_space<vmem>>, %arg18: memref<128x128xf32, #tpu.memory_space<vmem>>, %arg19: memref<1x128xf32, #tpu.memory_space<vmem>>, %arg20: memref<128x4xf32, #tpu.memory_space<vmem>>, %arg21: memref<1x4xf32, #tpu.memory_space<vmem>>, %arg22: memref<2x4xf32, #tpu.memory_space<vmem>>) attributes {dimension_semantics = [], scalar_prefetch = 0 : i64, scratch_operands = 0 : i64, tpu.core_type = #tpu.core_type<tc>} {
    %c0 = arith.constant 0 : index
    %c0_0 = arith.constant 0 : index
    %0 = vector.load %arg0[%c0, %c0_0] : memref<16x8xf32, #tpu.memory_space<vmem>>, vector<16x8xf32>
    %c0_1 = arith.constant 0 : index
    %c0_2 = arith.constant 0 : index
    %1 = vector.load %arg1[%c0_1, %c0_2] : memref<16x16xf32, #tpu.memory_space<vmem>>, vector<16x16xf32>
    %c0_3 = arith.constant 0 : index
    %c0_4 = arith.constant 0 : index
    %2 = vector.load %arg2[%c0_3, %c0_4] : memref<16x8xf32, #tpu.memory_space<vmem>>, vector<16x8xf32>
    %c0_5 = arith.constant 0 : index
    %c0_6 = arith.constant 0 : index
    %3 = vector.load %arg3[%c0_5, %c0_6] : memref<16x1xf32, #tpu.memory_space<vmem>>, vector<16x1xf32>
    %c0_7 = arith.constant 0 : index
    %c0_8 = arith.constant 0 : index
    %4 = vector.load %arg4[%c0_7, %c0_8] : memref<16x2xf32, #tpu.memory_space<vmem>>, vector<16x2xf32>
    %c0_9 = arith.constant 0 : index
    %c0_10 = arith.constant 0 : index
    %5 = vector.load %arg5[%c0_9, %c0_10] : memref<2x16xf32, #tpu.memory_space<vmem>>, vector<2x16xf32>
    %c0_11 = arith.constant 0 : index
    %c0_12 = arith.constant 0 : index
    %6 = vector.load %arg10[%c0_11, %c0_12] : memref<8x640xf32, #tpu.memory_space<vmem>>, vector<8x640xf32>
    %cst = arith.constant dense<0.000000e+00> : vector<16x640xf32>
    %7 = tpu.matmul %2, %6, %cst {dimension_numbers = #tpu.dot_dimension_numbers<[1], [0], [0], [1], [0, 0, 1, 1], [], []>} : vector<16x8xf32>, vector<8x640xf32>, vector<16x640xf32> -> vector<16x640xf32>
    %c0_13 = arith.constant 0 : index
    %c0_14 = arith.constant 0 : index
    %8 = vector.load %arg11[%c0_13, %c0_14] : memref<1x640xf32, #tpu.memory_space<vmem>>, vector<1x640xf32>
    %9 = vector.broadcast %3 : vector<16x1xf32> to vector<16x640xf32>
    %10 = vector.broadcast %8 : vector<1x640xf32> to vector<16x640xf32>
    %11 = arith.mulf %9, %10 : vector<16x640xf32>
    %12 = arith.addf %7, %11 : vector<16x640xf32>
    %cst_15 = arith.constant 0.000000e+00 : f32
    %13 = vector.broadcast %cst_15 : f32 to vector<2x128xf32>
    %c0_16 = arith.constant 0 : index
    %c0_17 = arith.constant 0 : index
    %14 = vector.load %arg6[%c0_16, %c0_17] : memref<8x128xf32, #tpu.memory_space<vmem>>, vector<8x128xf32>
    %cst_18 = arith.constant dense<0.000000e+00> : vector<16x128xf32>
    %15 = tpu.matmul %0, %14, %cst_18 {dimension_numbers = #tpu.dot_dimension_numbers<[1], [0], [0], [1], [0, 0, 1, 1], [], []>} : vector<16x8xf32>, vector<8x128xf32>, vector<16x128xf32> -> vector<16x128xf32>
    %c0_19 = arith.constant 0 : index
    %c0_20 = arith.constant 0 : index
    %16 = vector.load %arg7[%c0_19, %c0_20] : memref<1x128xf32, #tpu.memory_space<vmem>>, vector<1x128xf32>
    %17 = vector.broadcast %16 : vector<1x128xf32> to vector<16x128xf32>
    %18 = arith.addf %15, %17 : vector<16x128xf32>
    %cst_21 = arith.constant dense<0.000000e+00> : vector<16x128xf32>
    %19 = tpu.matmul %4, %13, %cst_21 {dimension_numbers = #tpu.dot_dimension_numbers<[1], [0], [0], [1], [0, 0, 1, 1], [], []>} : vector<16x2xf32>, vector<2x128xf32>, vector<16x128xf32> -> vector<16x128xf32>
    %20 = arith.addf %18, %19 : vector<16x128xf32>
    %cst_22 = arith.constant dense<0.000000e+00> : vector<16x128xf32>
    %21 = tpu.matmul %1, %20, %cst_22 {dimension_numbers = #tpu.dot_dimension_numbers<[1], [0], [0], [1], [0, 0, 1, 1], [], []>} : vector<16x16xf32>, vector<16x128xf32>, vector<16x128xf32> -> vector<16x128xf32>
    %22 = vector.extract_strided_slice %12 {offsets = [0, 0], sizes = [16, 128], strides = [1, 1]} : vector<16x640xf32> to vector<16x128xf32>
    %23 = arith.addf %21, %22 : vector<16x128xf32>
    %c0_23 = arith.constant 0 : index
    %c0_24 = arith.constant 0 : index
    %c0_25 = arith.constant 0 : index
    %24 = vector.load %arg12[%c0_23, %c0_24, %c0_25] : memref<5x128x128xf32, #tpu.memory_space<vmem>>, vector<1x128x128xf32>
    %25 = vector.shape_cast %24 : vector<1x128x128xf32> to vector<128x128xf32>
    %cst_26 = arith.constant dense<0.000000e+00> : vector<16x128xf32>
    %26 = tpu.matmul %23, %25, %cst_26 {dimension_numbers = #tpu.dot_dimension_numbers<[1], [0], [0], [1], [0, 0, 1, 1], [], []>} : vector<16x128xf32>, vector<128x128xf32>, vector<16x128xf32> -> vector<16x128xf32>
    %c0_27 = arith.constant 0 : index
    %c0_28 = arith.constant 0 : index
    %c0_29 = arith.constant 0 : index
    %27 = vector.load %arg13[%c0_27, %c0_28, %c0_29] : memref<5x1x128xf32, #tpu.memory_space<vmem>>, vector<1x1x128xf32>
    %28 = vector.shape_cast %27 : vector<1x1x128xf32> to vector<1x128xf32>
    %29 = vector.broadcast %28 : vector<1x128xf32> to vector<16x128xf32>
    %30 = arith.addf %26, %29 : vector<16x128xf32>
    %cst_30 = arith.constant 0.000000e+00 : f32
    %31 = vector.broadcast %cst_30 : f32 to vector<16x128xf32>
    %32 = arith.maximumf %30, %31 : vector<16x128xf32>
    %c0_31 = arith.constant 0 : index
    %c0_32 = arith.constant 0 : index
    %c0_33 = arith.constant 0 : index
    %33 = vector.load %arg14[%c0_31, %c0_32, %c0_33] : memref<5x128x128xf32, #tpu.memory_space<vmem>>, vector<1x128x128xf32>
    %34 = vector.shape_cast %33 : vector<1x128x128xf32> to vector<128x128xf32>
    %cst_34 = arith.constant dense<0.000000e+00> : vector<16x128xf32>
    %35 = tpu.matmul %32, %34, %cst_34 {dimension_numbers = #tpu.dot_dimension_numbers<[1], [0], [0], [1], [0, 0, 1, 1], [], []>} : vector<16x128xf32>, vector<128x128xf32>, vector<16x128xf32> -> vector<16x128xf32>
    %c0_35 = arith.constant 0 : index
    %c0_36 = arith.constant 0 : index
    %c0_37 = arith.constant 0 : index
    %36 = vector.load %arg15[%c0_35, %c0_36, %c0_37] : memref<5x1x128xf32, #tpu.memory_space<vmem>>, vector<1x1x128xf32>
    %37 = vector.shape_cast %36 : vector<1x1x128xf32> to vector<1x128xf32>
    %38 = vector.broadcast %37 : vector<1x128xf32> to vector<16x128xf32>
    %39 = arith.addf %35, %38 : vector<16x128xf32>
    %cst_38 = arith.constant 0.000000e+00 : f32
    %40 = vector.broadcast %cst_38 : f32 to vector<16x128xf32>
    %41 = arith.maximumf %39, %40 : vector<16x128xf32>
    %cst_39 = arith.constant dense<0.000000e+00> : vector<2x128xf32>
    %42 = tpu.matmul %5, %41, %cst_39 {dimension_numbers = #tpu.dot_dimension_numbers<[1], [0], [0], [1], [0, 0, 1, 1], [], []>} : vector<2x16xf32>, vector<16x128xf32>, vector<2x128xf32> -> vector<2x128xf32>
    %c0_40 = arith.constant 0 : index
    %c0_41 = arith.constant 0 : index
    %43 = vector.load %arg16[%c0_40, %c0_41] : memref<128x128xf32, #tpu.memory_space<vmem>>, vector<128x128xf32>
    %cst_42 = arith.constant dense<0.000000e+00> : vector<2x128xf32>
    %44 = tpu.matmul %42, %43, %cst_42 {dimension_numbers = #tpu.dot_dimension_numbers<[1], [0], [0], [1], [0, 0, 1, 1], [], []>} : vector<2x128xf32>, vector<128x128xf32>, vector<2x128xf32> -> vector<2x128xf32>
    %c0_43 = arith.constant 0 : index
    %c0_44 = arith.constant 0 : index
    %45 = vector.load %arg17[%c0_43, %c0_44] : memref<1x128xf32, #tpu.memory_space<vmem>>, vector<1x128xf32>
    %46 = vector.broadcast %45 : vector<1x128xf32> to vector<2x128xf32>
    %47 = arith.addf %44, %46 : vector<2x128xf32>
    %cst_45 = arith.constant 0.000000e+00 : f32
    %48 = vector.broadcast %cst_45 : f32 to vector<2x128xf32>
    %49 = arith.maximumf %47, %48 : vector<2x128xf32>
    %c0_46 = arith.constant 0 : index
    %c0_47 = arith.constant 0 : index
    %50 = vector.load %arg18[%c0_46, %c0_47] : memref<128x128xf32, #tpu.memory_space<vmem>>, vector<128x128xf32>
    %cst_48 = arith.constant dense<0.000000e+00> : vector<2x128xf32>
    %51 = tpu.matmul %49, %50, %cst_48 {dimension_numbers = #tpu.dot_dimension_numbers<[1], [0], [0], [1], [0, 0, 1, 1], [], []>} : vector<2x128xf32>, vector<128x128xf32>, vector<2x128xf32> -> vector<2x128xf32>
    %c0_49 = arith.constant 0 : index
    %c0_50 = arith.constant 0 : index
    %52 = vector.load %arg19[%c0_49, %c0_50] : memref<1x128xf32, #tpu.memory_space<vmem>>, vector<1x128xf32>
    %53 = vector.broadcast %52 : vector<1x128xf32> to vector<2x128xf32>
    %54 = arith.addf %51, %53 : vector<2x128xf32>
    %cst_51 = arith.constant 0.000000e+00 : f32
    %55 = vector.broadcast %cst_51 : f32 to vector<2x128xf32>
    %56 = arith.maximumf %54, %55 : vector<2x128xf32>
    %57 = arith.addf %13, %56 : vector<2x128xf32>
    %c0_52 = arith.constant 0 : index
    %c0_53 = arith.constant 0 : index
    %c0_54 = arith.constant 0 : index
    %58 = vector.load %arg8[%c0_52, %c0_53, %c0_54] : memref<4x128x128xf32, #tpu.memory_space<vmem>>, vector<1x128x128xf32>
    %59 = vector.shape_cast %58 : vector<1x128x128xf32> to vector<128x128xf32>
    %cst_55 = arith.constant dense<0.000000e+00> : vector<16x128xf32>
    %60 = tpu.matmul %41, %59, %cst_55 {dimension_numbers = #tpu.dot_dimension_numbers<[1], [0], [0], [1], [0, 0, 1, 1], [], []>} : vector<16x128xf32>, vector<128x128xf32>, vector<16x128xf32> -> vector<16x128xf32>
    %c0_56 = arith.constant 0 : index
    %c0_57 = arith.constant 0 : index
    %c0_58 = arith.constant 0 : index
    %61 = vector.load %arg9[%c0_56, %c0_57, %c0_58] : memref<4x1x128xf32, #tpu.memory_space<vmem>>, vector<1x1x128xf32>
    %62 = vector.shape_cast %61 : vector<1x1x128xf32> to vector<1x128xf32>
    %63 = vector.broadcast %62 : vector<1x128xf32> to vector<16x128xf32>
    %64 = arith.addf %60, %63 : vector<16x128xf32>
    %cst_59 = arith.constant dense<0.000000e+00> : vector<16x128xf32>
    %65 = tpu.matmul %4, %57, %cst_59 {dimension_numbers = #tpu.dot_dimension_numbers<[1], [0], [0], [1], [0, 0, 1, 1], [], []>} : vector<16x2xf32>, vector<2x128xf32>, vector<16x128xf32> -> vector<16x128xf32>
    %66 = arith.addf %64, %65 : vector<16x128xf32>
    %cst_60 = arith.constant dense<0.000000e+00> : vector<16x128xf32>
    %67 = tpu.matmul %1, %66, %cst_60 {dimension_numbers = #tpu.dot_dimension_numbers<[1], [0], [0], [1], [0, 0, 1, 1], [], []>} : vector<16x16xf32>, vector<16x128xf32>, vector<16x128xf32> -> vector<16x128xf32>
    %68 = vector.extract_strided_slice %12 {offsets = [0, 128], sizes = [16, 128], strides = [1, 1]} : vector<16x640xf32> to vector<16x128xf32>
    %69 = arith.addf %67, %68 : vector<16x128xf32>
    %c1 = arith.constant 1 : index
    %c0_61 = arith.constant 0 : index
    %c0_62 = arith.constant 0 : index
    %70 = vector.load %arg12[%c1, %c0_61, %c0_62] : memref<5x128x128xf32, #tpu.memory_space<vmem>>, vector<1x128x128xf32>
    %71 = vector.shape_cast %70 : vector<1x128x128xf32> to vector<128x128xf32>
    %cst_63 = arith.constant dense<0.000000e+00> : vector<16x128xf32>
    %72 = tpu.matmul %69, %71, %cst_63 {dimension_numbers = #tpu.dot_dimension_numbers<[1], [0], [0], [1], [0, 0, 1, 1], [], []>} : vector<16x128xf32>, vector<128x128xf32>, vector<16x128xf32> -> vector<16x128xf32>
    %c1_64 = arith.constant 1 : index
    %c0_65 = arith.constant 0 : index
    %c0_66 = arith.constant 0 : index
    %73 = vector.load %arg13[%c1_64, %c0_65, %c0_66] : memref<5x1x128xf32, #tpu.memory_space<vmem>>, vector<1x1x128xf32>
    %74 = vector.shape_cast %73 : vector<1x1x128xf32> to vector<1x128xf32>
    %75 = vector.broadcast %74 : vector<1x128xf32> to vector<16x128xf32>
    %76 = arith.addf %72, %75 : vector<16x128xf32>
    %cst_67 = arith.constant 0.000000e+00 : f32
    %77 = vector.broadcast %cst_67 : f32 to vector<16x128xf32>
    %78 = arith.maximumf %76, %77 : vector<16x128xf32>
    %c1_68 = arith.constant 1 : index
    %c0_69 = arith.constant 0 : index
    %c0_70 = arith.constant 0 : index
    %79 = vector.load %arg14[%c1_68, %c0_69, %c0_70] : memref<5x128x128xf32, #tpu.memory_space<vmem>>, vector<1x128x128xf32>
    %80 = vector.shape_cast %79 : vector<1x128x128xf32> to vector<128x128xf32>
    %cst_71 = arith.constant dense<0.000000e+00> : vector<16x128xf32>
    %81 = tpu.matmul %78, %80, %cst_71 {dimension_numbers = #tpu.dot_dimension_numbers<[1], [0], [0], [1], [0, 0, 1, 1], [], []>} : vector<16x128xf32>, vector<128x128xf32>, vector<16x128xf32> -> vector<16x128xf32>
    %c1_72 = arith.constant 1 : index
    %c0_73 = arith.constant 0 : index
    %c0_74 = arith.constant 0 : index
    %82 = vector.load %arg15[%c1_72, %c0_73, %c0_74] : memref<5x1x128xf32, #tpu.memory_space<vmem>>, vector<1x1x128xf32>
    %83 = vector.shape_cast %82 : vector<1x1x128xf32> to vector<1x128xf32>
    %84 = vector.broadcast %83 : vector<1x128xf32> to vector<16x128xf32>
    %85 = arith.addf %81, %84 : vector<16x128xf32>
    %cst_75 = arith.constant 0.000000e+00 : f32
    %86 = vector.broadcast %cst_75 : f32 to vector<16x128xf32>
    %87 = arith.maximumf %85, %86 : vector<16x128xf32>
    %cst_76 = arith.constant dense<0.000000e+00> : vector<2x128xf32>
    %88 = tpu.matmul %5, %87, %cst_76 {dimension_numbers = #tpu.dot_dimension_numbers<[1], [0], [0], [1], [0, 0, 1, 1], [], []>} : vector<2x16xf32>, vector<16x128xf32>, vector<2x128xf32> -> vector<2x128xf32>
    %c0_77 = arith.constant 0 : index
    %c0_78 = arith.constant 0 : index
    %89 = vector.load %arg16[%c0_77, %c0_78] : memref<128x128xf32, #tpu.memory_space<vmem>>, vector<128x128xf32>
    %cst_79 = arith.constant dense<0.000000e+00> : vector<2x128xf32>
    %90 = tpu.matmul %88, %89, %cst_79 {dimension_numbers = #tpu.dot_dimension_numbers<[1], [0], [0], [1], [0, 0, 1, 1], [], []>} : vector<2x128xf32>, vector<128x128xf32>, vector<2x128xf32> -> vector<2x128xf32>
    %c0_80 = arith.constant 0 : index
    %c0_81 = arith.constant 0 : index
    %91 = vector.load %arg17[%c0_80, %c0_81] : memref<1x128xf32, #tpu.memory_space<vmem>>, vector<1x128xf32>
    %92 = vector.broadcast %91 : vector<1x128xf32> to vector<2x128xf32>
    %93 = arith.addf %90, %92 : vector<2x128xf32>
    %cst_82 = arith.constant 0.000000e+00 : f32
    %94 = vector.broadcast %cst_82 : f32 to vector<2x128xf32>
    %95 = arith.maximumf %93, %94 : vector<2x128xf32>
    %c0_83 = arith.constant 0 : index
    %c0_84 = arith.constant 0 : index
    %96 = vector.load %arg18[%c0_83, %c0_84] : memref<128x128xf32, #tpu.memory_space<vmem>>, vector<128x128xf32>
    %cst_85 = arith.constant dense<0.000000e+00> : vector<2x128xf32>
    %97 = tpu.matmul %95, %96, %cst_85 {dimension_numbers = #tpu.dot_dimension_numbers<[1], [0], [0], [1], [0, 0, 1, 1], [], []>} : vector<2x128xf32>, vector<128x128xf32>, vector<2x128xf32> -> vector<2x128xf32>
    %c0_86 = arith.constant 0 : index
    %c0_87 = arith.constant 0 : index
    %98 = vector.load %arg19[%c0_86, %c0_87] : memref<1x128xf32, #tpu.memory_space<vmem>>, vector<1x128xf32>
    %99 = vector.broadcast %98 : vector<1x128xf32> to vector<2x128xf32>
    %100 = arith.addf %97, %99 : vector<2x128xf32>
    %cst_88 = arith.constant 0.000000e+00 : f32
    %101 = vector.broadcast %cst_88 : f32 to vector<2x128xf32>
    %102 = arith.maximumf %100, %101 : vector<2x128xf32>
    %103 = arith.addf %57, %102 : vector<2x128xf32>
    %c1_89 = arith.constant 1 : index
    %c0_90 = arith.constant 0 : index
    %c0_91 = arith.constant 0 : index
    %104 = vector.load %arg8[%c1_89, %c0_90, %c0_91] : memref<4x128x128xf32, #tpu.memory_space<vmem>>, vector<1x128x128xf32>
    %105 = vector.shape_cast %104 : vector<1x128x128xf32> to vector<128x128xf32>
    %cst_92 = arith.constant dense<0.000000e+00> : vector<16x128xf32>
    %106 = tpu.matmul %87, %105, %cst_92 {dimension_numbers = #tpu.dot_dimension_numbers<[1], [0], [0], [1], [0, 0, 1, 1], [], []>} : vector<16x128xf32>, vector<128x128xf32>, vector<16x128xf32> -> vector<16x128xf32>
    %c1_93 = arith.constant 1 : index
    %c0_94 = arith.constant 0 : index
    %c0_95 = arith.constant 0 : index
    %107 = vector.load %arg9[%c1_93, %c0_94, %c0_95] : memref<4x1x128xf32, #tpu.memory_space<vmem>>, vector<1x1x128xf32>
    %108 = vector.shape_cast %107 : vector<1x1x128xf32> to vector<1x128xf32>
    %109 = vector.broadcast %108 : vector<1x128xf32> to vector<16x128xf32>
    %110 = arith.addf %106, %109 : vector<16x128xf32>
    %cst_96 = arith.constant dense<0.000000e+00> : vector<16x128xf32>
    %111 = tpu.matmul %4, %103, %cst_96 {dimension_numbers = #tpu.dot_dimension_numbers<[1], [0], [0], [1], [0, 0, 1, 1], [], []>} : vector<16x2xf32>, vector<2x128xf32>, vector<16x128xf32> -> vector<16x128xf32>
    %112 = arith.addf %110, %111 : vector<16x128xf32>
    %cst_97 = arith.constant dense<0.000000e+00> : vector<16x128xf32>
    %113 = tpu.matmul %1, %112, %cst_97 {dimension_numbers = #tpu.dot_dimension_numbers<[1], [0], [0], [1], [0, 0, 1, 1], [], []>} : vector<16x16xf32>, vector<16x128xf32>, vector<16x128xf32> -> vector<16x128xf32>
    %114 = vector.extract_strided_slice %12 {offsets = [0, 256], sizes = [16, 128], strides = [1, 1]} : vector<16x640xf32> to vector<16x128xf32>
    %115 = arith.addf %113, %114 : vector<16x128xf32>
    %c2 = arith.constant 2 : index
    %c0_98 = arith.constant 0 : index
    %c0_99 = arith.constant 0 : index
    %116 = vector.load %arg12[%c2, %c0_98, %c0_99] : memref<5x128x128xf32, #tpu.memory_space<vmem>>, vector<1x128x128xf32>
    %117 = vector.shape_cast %116 : vector<1x128x128xf32> to vector<128x128xf32>
    %cst_100 = arith.constant dense<0.000000e+00> : vector<16x128xf32>
    %118 = tpu.matmul %115, %117, %cst_100 {dimension_numbers = #tpu.dot_dimension_numbers<[1], [0], [0], [1], [0, 0, 1, 1], [], []>} : vector<16x128xf32>, vector<128x128xf32>, vector<16x128xf32> -> vector<16x128xf32>
    %c2_101 = arith.constant 2 : index
    %c0_102 = arith.constant 0 : index
    %c0_103 = arith.constant 0 : index
    %119 = vector.load %arg13[%c2_101, %c0_102, %c0_103] : memref<5x1x128xf32, #tpu.memory_space<vmem>>, vector<1x1x128xf32>
    %120 = vector.shape_cast %119 : vector<1x1x128xf32> to vector<1x128xf32>
    %121 = vector.broadcast %120 : vector<1x128xf32> to vector<16x128xf32>
    %122 = arith.addf %118, %121 : vector<16x128xf32>
    %cst_104 = arith.constant 0.000000e+00 : f32
    %123 = vector.broadcast %cst_104 : f32 to vector<16x128xf32>
    %124 = arith.maximumf %122, %123 : vector<16x128xf32>
    %c2_105 = arith.constant 2 : index
    %c0_106 = arith.constant 0 : index
    %c0_107 = arith.constant 0 : index
    %125 = vector.load %arg14[%c2_105, %c0_106, %c0_107] : memref<5x128x128xf32, #tpu.memory_space<vmem>>, vector<1x128x128xf32>
    %126 = vector.shape_cast %125 : vector<1x128x128xf32> to vector<128x128xf32>
    %cst_108 = arith.constant dense<0.000000e+00> : vector<16x128xf32>
    %127 = tpu.matmul %124, %126, %cst_108 {dimension_numbers = #tpu.dot_dimension_numbers<[1], [0], [0], [1], [0, 0, 1, 1], [], []>} : vector<16x128xf32>, vector<128x128xf32>, vector<16x128xf32> -> vector<16x128xf32>
    %c2_109 = arith.constant 2 : index
    %c0_110 = arith.constant 0 : index
    %c0_111 = arith.constant 0 : index
    %128 = vector.load %arg15[%c2_109, %c0_110, %c0_111] : memref<5x1x128xf32, #tpu.memory_space<vmem>>, vector<1x1x128xf32>
    %129 = vector.shape_cast %128 : vector<1x1x128xf32> to vector<1x128xf32>
    %130 = vector.broadcast %129 : vector<1x128xf32> to vector<16x128xf32>
    %131 = arith.addf %127, %130 : vector<16x128xf32>
    %cst_112 = arith.constant 0.000000e+00 : f32
    %132 = vector.broadcast %cst_112 : f32 to vector<16x128xf32>
    %133 = arith.maximumf %131, %132 : vector<16x128xf32>
    %cst_113 = arith.constant dense<0.000000e+00> : vector<2x128xf32>
    %134 = tpu.matmul %5, %133, %cst_113 {dimension_numbers = #tpu.dot_dimension_numbers<[1], [0], [0], [1], [0, 0, 1, 1], [], []>} : vector<2x16xf32>, vector<16x128xf32>, vector<2x128xf32> -> vector<2x128xf32>
    %c0_114 = arith.constant 0 : index
    %c0_115 = arith.constant 0 : index
    %135 = vector.load %arg16[%c0_114, %c0_115] : memref<128x128xf32, #tpu.memory_space<vmem>>, vector<128x128xf32>
    %cst_116 = arith.constant dense<0.000000e+00> : vector<2x128xf32>
    %136 = tpu.matmul %134, %135, %cst_116 {dimension_numbers = #tpu.dot_dimension_numbers<[1], [0], [0], [1], [0, 0, 1, 1], [], []>} : vector<2x128xf32>, vector<128x128xf32>, vector<2x128xf32> -> vector<2x128xf32>
    %c0_117 = arith.constant 0 : index
    %c0_118 = arith.constant 0 : index
    %137 = vector.load %arg17[%c0_117, %c0_118] : memref<1x128xf32, #tpu.memory_space<vmem>>, vector<1x128xf32>
    %138 = vector.broadcast %137 : vector<1x128xf32> to vector<2x128xf32>
    %139 = arith.addf %136, %138 : vector<2x128xf32>
    %cst_119 = arith.constant 0.000000e+00 : f32
    %140 = vector.broadcast %cst_119 : f32 to vector<2x128xf32>
    %141 = arith.maximumf %139, %140 : vector<2x128xf32>
    %c0_120 = arith.constant 0 : index
    %c0_121 = arith.constant 0 : index
    %142 = vector.load %arg18[%c0_120, %c0_121] : memref<128x128xf32, #tpu.memory_space<vmem>>, vector<128x128xf32>
    %cst_122 = arith.constant dense<0.000000e+00> : vector<2x128xf32>
    %143 = tpu.matmul %141, %142, %cst_122 {dimension_numbers = #tpu.dot_dimension_numbers<[1], [0], [0], [1], [0, 0, 1, 1], [], []>} : vector<2x128xf32>, vector<128x128xf32>, vector<2x128xf32> -> vector<2x128xf32>
    %c0_123 = arith.constant 0 : index
    %c0_124 = arith.constant 0 : index
    %144 = vector.load %arg19[%c0_123, %c0_124] : memref<1x128xf32, #tpu.memory_space<vmem>>, vector<1x128xf32>
    %145 = vector.broadcast %144 : vector<1x128xf32> to vector<2x128xf32>
    %146 = arith.addf %143, %145 : vector<2x128xf32>
    %cst_125 = arith.constant 0.000000e+00 : f32
    %147 = vector.broadcast %cst_125 : f32 to vector<2x128xf32>
    %148 = arith.maximumf %146, %147 : vector<2x128xf32>
    %149 = arith.addf %103, %148 : vector<2x128xf32>
    %c2_126 = arith.constant 2 : index
    %c0_127 = arith.constant 0 : index
    %c0_128 = arith.constant 0 : index
    %150 = vector.load %arg8[%c2_126, %c0_127, %c0_128] : memref<4x128x128xf32, #tpu.memory_space<vmem>>, vector<1x128x128xf32>
    %151 = vector.shape_cast %150 : vector<1x128x128xf32> to vector<128x128xf32>
    %cst_129 = arith.constant dense<0.000000e+00> : vector<16x128xf32>
    %152 = tpu.matmul %133, %151, %cst_129 {dimension_numbers = #tpu.dot_dimension_numbers<[1], [0], [0], [1], [0, 0, 1, 1], [], []>} : vector<16x128xf32>, vector<128x128xf32>, vector<16x128xf32> -> vector<16x128xf32>
    %c2_130 = arith.constant 2 : index
    %c0_131 = arith.constant 0 : index
    %c0_132 = arith.constant 0 : index
    %153 = vector.load %arg9[%c2_130, %c0_131, %c0_132] : memref<4x1x128xf32, #tpu.memory_space<vmem>>, vector<1x1x128xf32>
    %154 = vector.shape_cast %153 : vector<1x1x128xf32> to vector<1x128xf32>
    %155 = vector.broadcast %154 : vector<1x128xf32> to vector<16x128xf32>
    %156 = arith.addf %152, %155 : vector<16x128xf32>
    %cst_133 = arith.constant dense<0.000000e+00> : vector<16x128xf32>
    %157 = tpu.matmul %4, %149, %cst_133 {dimension_numbers = #tpu.dot_dimension_numbers<[1], [0], [0], [1], [0, 0, 1, 1], [], []>} : vector<16x2xf32>, vector<2x128xf32>, vector<16x128xf32> -> vector<16x128xf32>
    %158 = arith.addf %156, %157 : vector<16x128xf32>
    %cst_134 = arith.constant dense<0.000000e+00> : vector<16x128xf32>
    %159 = tpu.matmul %1, %158, %cst_134 {dimension_numbers = #tpu.dot_dimension_numbers<[1], [0], [0], [1], [0, 0, 1, 1], [], []>} : vector<16x16xf32>, vector<16x128xf32>, vector<16x128xf32> -> vector<16x128xf32>
    %160 = vector.extract_strided_slice %12 {offsets = [0, 384], sizes = [16, 128], strides = [1, 1]} : vector<16x640xf32> to vector<16x128xf32>
    %161 = arith.addf %159, %160 : vector<16x128xf32>
    %c3 = arith.constant 3 : index
    %c0_135 = arith.constant 0 : index
    %c0_136 = arith.constant 0 : index
    %162 = vector.load %arg12[%c3, %c0_135, %c0_136] : memref<5x128x128xf32, #tpu.memory_space<vmem>>, vector<1x128x128xf32>
    %163 = vector.shape_cast %162 : vector<1x128x128xf32> to vector<128x128xf32>
    %cst_137 = arith.constant dense<0.000000e+00> : vector<16x128xf32>
    %164 = tpu.matmul %161, %163, %cst_137 {dimension_numbers = #tpu.dot_dimension_numbers<[1], [0], [0], [1], [0, 0, 1, 1], [], []>} : vector<16x128xf32>, vector<128x128xf32>, vector<16x128xf32> -> vector<16x128xf32>
    %c3_138 = arith.constant 3 : index
    %c0_139 = arith.constant 0 : index
    %c0_140 = arith.constant 0 : index
    %165 = vector.load %arg13[%c3_138, %c0_139, %c0_140] : memref<5x1x128xf32, #tpu.memory_space<vmem>>, vector<1x1x128xf32>
    %166 = vector.shape_cast %165 : vector<1x1x128xf32> to vector<1x128xf32>
    %167 = vector.broadcast %166 : vector<1x128xf32> to vector<16x128xf32>
    %168 = arith.addf %164, %167 : vector<16x128xf32>
    %cst_141 = arith.constant 0.000000e+00 : f32
    %169 = vector.broadcast %cst_141 : f32 to vector<16x128xf32>
    %170 = arith.maximumf %168, %169 : vector<16x128xf32>
    %c3_142 = arith.constant 3 : index
    %c0_143 = arith.constant 0 : index
    %c0_144 = arith.constant 0 : index
    %171 = vector.load %arg14[%c3_142, %c0_143, %c0_144] : memref<5x128x128xf32, #tpu.memory_space<vmem>>, vector<1x128x128xf32>
    %172 = vector.shape_cast %171 : vector<1x128x128xf32> to vector<128x128xf32>
    %cst_145 = arith.constant dense<0.000000e+00> : vector<16x128xf32>
    %173 = tpu.matmul %170, %172, %cst_145 {dimension_numbers = #tpu.dot_dimension_numbers<[1], [0], [0], [1], [0, 0, 1, 1], [], []>} : vector<16x128xf32>, vector<128x128xf32>, vector<16x128xf32> -> vector<16x128xf32>
    %c3_146 = arith.constant 3 : index
    %c0_147 = arith.constant 0 : index
    %c0_148 = arith.constant 0 : index
    %174 = vector.load %arg15[%c3_146, %c0_147, %c0_148] : memref<5x1x128xf32, #tpu.memory_space<vmem>>, vector<1x1x128xf32>
    %175 = vector.shape_cast %174 : vector<1x1x128xf32> to vector<1x128xf32>
    %176 = vector.broadcast %175 : vector<1x128xf32> to vector<16x128xf32>
    %177 = arith.addf %173, %176 : vector<16x128xf32>
    %cst_149 = arith.constant 0.000000e+00 : f32
    %178 = vector.broadcast %cst_149 : f32 to vector<16x128xf32>
    %179 = arith.maximumf %177, %178 : vector<16x128xf32>
    %cst_150 = arith.constant dense<0.000000e+00> : vector<2x128xf32>
    %180 = tpu.matmul %5, %179, %cst_150 {dimension_numbers = #tpu.dot_dimension_numbers<[1], [0], [0], [1], [0, 0, 1, 1], [], []>} : vector<2x16xf32>, vector<16x128xf32>, vector<2x128xf32> -> vector<2x128xf32>
    %c0_151 = arith.constant 0 : index
    %c0_152 = arith.constant 0 : index
    %181 = vector.load %arg16[%c0_151, %c0_152] : memref<128x128xf32, #tpu.memory_space<vmem>>, vector<128x128xf32>
    %cst_153 = arith.constant dense<0.000000e+00> : vector<2x128xf32>
    %182 = tpu.matmul %180, %181, %cst_153 {dimension_numbers = #tpu.dot_dimension_numbers<[1], [0], [0], [1], [0, 0, 1, 1], [], []>} : vector<2x128xf32>, vector<128x128xf32>, vector<2x128xf32> -> vector<2x128xf32>
    %c0_154 = arith.constant 0 : index
    %c0_155 = arith.constant 0 : index
    %183 = vector.load %arg17[%c0_154, %c0_155] : memref<1x128xf32, #tpu.memory_space<vmem>>, vector<1x128xf32>
    %184 = vector.broadcast %183 : vector<1x128xf32> to vector<2x128xf32>
    %185 = arith.addf %182, %184 : vector<2x128xf32>
    %cst_156 = arith.constant 0.000000e+00 : f32
    %186 = vector.broadcast %cst_156 : f32 to vector<2x128xf32>
    %187 = arith.maximumf %185, %186 : vector<2x128xf32>
    %c0_157 = arith.constant 0 : index
    %c0_158 = arith.constant 0 : index
    %188 = vector.load %arg18[%c0_157, %c0_158] : memref<128x128xf32, #tpu.memory_space<vmem>>, vector<128x128xf32>
    %cst_159 = arith.constant dense<0.000000e+00> : vector<2x128xf32>
    %189 = tpu.matmul %187, %188, %cst_159 {dimension_numbers = #tpu.dot_dimension_numbers<[1], [0], [0], [1], [0, 0, 1, 1], [], []>} : vector<2x128xf32>, vector<128x128xf32>, vector<2x128xf32> -> vector<2x128xf32>
    %c0_160 = arith.constant 0 : index
    %c0_161 = arith.constant 0 : index
    %190 = vector.load %arg19[%c0_160, %c0_161] : memref<1x128xf32, #tpu.memory_space<vmem>>, vector<1x128xf32>
    %191 = vector.broadcast %190 : vector<1x128xf32> to vector<2x128xf32>
    %192 = arith.addf %189, %191 : vector<2x128xf32>
    %cst_162 = arith.constant 0.000000e+00 : f32
    %193 = vector.broadcast %cst_162 : f32 to vector<2x128xf32>
    %194 = arith.maximumf %192, %193 : vector<2x128xf32>
    %195 = arith.addf %149, %194 : vector<2x128xf32>
    %c3_163 = arith.constant 3 : index
    %c0_164 = arith.constant 0 : index
    %c0_165 = arith.constant 0 : index
    %196 = vector.load %arg8[%c3_163, %c0_164, %c0_165] : memref<4x128x128xf32, #tpu.memory_space<vmem>>, vector<1x128x128xf32>
    %197 = vector.shape_cast %196 : vector<1x128x128xf32> to vector<128x128xf32>
    %cst_166 = arith.constant dense<0.000000e+00> : vector<16x128xf32>
    %198 = tpu.matmul %179, %197, %cst_166 {dimension_numbers = #tpu.dot_dimension_numbers<[1], [0], [0], [1], [0, 0, 1, 1], [], []>} : vector<16x128xf32>, vector<128x128xf32>, vector<16x128xf32> -> vector<16x128xf32>
    %c3_167 = arith.constant 3 : index
    %c0_168 = arith.constant 0 : index
    %c0_169 = arith.constant 0 : index
    %199 = vector.load %arg9[%c3_167, %c0_168, %c0_169] : memref<4x1x128xf32, #tpu.memory_space<vmem>>, vector<1x1x128xf32>
    %200 = vector.shape_cast %199 : vector<1x1x128xf32> to vector<1x128xf32>
    %201 = vector.broadcast %200 : vector<1x128xf32> to vector<16x128xf32>
    %202 = arith.addf %198, %201 : vector<16x128xf32>
    %cst_170 = arith.constant dense<0.000000e+00> : vector<16x128xf32>
    %203 = tpu.matmul %4, %195, %cst_170 {dimension_numbers = #tpu.dot_dimension_numbers<[1], [0], [0], [1], [0, 0, 1, 1], [], []>} : vector<16x2xf32>, vector<2x128xf32>, vector<16x128xf32> -> vector<16x128xf32>
    %204 = arith.addf %202, %203 : vector<16x128xf32>
    %cst_171 = arith.constant dense<0.000000e+00> : vector<16x128xf32>
    %205 = tpu.matmul %1, %204, %cst_171 {dimension_numbers = #tpu.dot_dimension_numbers<[1], [0], [0], [1], [0, 0, 1, 1], [], []>} : vector<16x16xf32>, vector<16x128xf32>, vector<16x128xf32> -> vector<16x128xf32>
    %206 = vector.extract_strided_slice %12 {offsets = [0, 512], sizes = [16, 128], strides = [1, 1]} : vector<16x640xf32> to vector<16x128xf32>
    %207 = arith.addf %205, %206 : vector<16x128xf32>
    %c4 = arith.constant 4 : index
    %c0_172 = arith.constant 0 : index
    %c0_173 = arith.constant 0 : index
    %208 = vector.load %arg12[%c4, %c0_172, %c0_173] : memref<5x128x128xf32, #tpu.memory_space<vmem>>, vector<1x128x128xf32>
    %209 = vector.shape_cast %208 : vector<1x128x128xf32> to vector<128x128xf32>
    %cst_174 = arith.constant dense<0.000000e+00> : vector<16x128xf32>
    %210 = tpu.matmul %207, %209, %cst_174 {dimension_numbers = #tpu.dot_dimension_numbers<[1], [0], [0], [1], [0, 0, 1, 1], [], []>} : vector<16x128xf32>, vector<128x128xf32>, vector<16x128xf32> -> vector<16x128xf32>
    %c4_175 = arith.constant 4 : index
    %c0_176 = arith.constant 0 : index
    %c0_177 = arith.constant 0 : index
    %211 = vector.load %arg13[%c4_175, %c0_176, %c0_177] : memref<5x1x128xf32, #tpu.memory_space<vmem>>, vector<1x1x128xf32>
    %212 = vector.shape_cast %211 : vector<1x1x128xf32> to vector<1x128xf32>
    %213 = vector.broadcast %212 : vector<1x128xf32> to vector<16x128xf32>
    %214 = arith.addf %210, %213 : vector<16x128xf32>
    %cst_178 = arith.constant 0.000000e+00 : f32
    %215 = vector.broadcast %cst_178 : f32 to vector<16x128xf32>
    %216 = arith.maximumf %214, %215 : vector<16x128xf32>
    %c4_179 = arith.constant 4 : index
    %c0_180 = arith.constant 0 : index
    %c0_181 = arith.constant 0 : index
    %217 = vector.load %arg14[%c4_179, %c0_180, %c0_181] : memref<5x128x128xf32, #tpu.memory_space<vmem>>, vector<1x128x128xf32>
    %218 = vector.shape_cast %217 : vector<1x128x128xf32> to vector<128x128xf32>
    %cst_182 = arith.constant dense<0.000000e+00> : vector<16x128xf32>
    %219 = tpu.matmul %216, %218, %cst_182 {dimension_numbers = #tpu.dot_dimension_numbers<[1], [0], [0], [1], [0, 0, 1, 1], [], []>} : vector<16x128xf32>, vector<128x128xf32>, vector<16x128xf32> -> vector<16x128xf32>
    %c4_183 = arith.constant 4 : index
    %c0_184 = arith.constant 0 : index
    %c0_185 = arith.constant 0 : index
    %220 = vector.load %arg15[%c4_183, %c0_184, %c0_185] : memref<5x1x128xf32, #tpu.memory_space<vmem>>, vector<1x1x128xf32>
    %221 = vector.shape_cast %220 : vector<1x1x128xf32> to vector<1x128xf32>
    %222 = vector.broadcast %221 : vector<1x128xf32> to vector<16x128xf32>
    %223 = arith.addf %219, %222 : vector<16x128xf32>
    %cst_186 = arith.constant 0.000000e+00 : f32
    %224 = vector.broadcast %cst_186 : f32 to vector<16x128xf32>
    %225 = arith.maximumf %223, %224 : vector<16x128xf32>
    %cst_187 = arith.constant dense<0.000000e+00> : vector<2x128xf32>
    %226 = tpu.matmul %5, %225, %cst_187 {dimension_numbers = #tpu.dot_dimension_numbers<[1], [0], [0], [1], [0, 0, 1, 1], [], []>} : vector<2x16xf32>, vector<16x128xf32>, vector<2x128xf32> -> vector<2x128xf32>
    %c0_188 = arith.constant 0 : index
    %c0_189 = arith.constant 0 : index
    %227 = vector.load %arg20[%c0_188, %c0_189] : memref<128x4xf32, #tpu.memory_space<vmem>>, vector<128x4xf32>
    %cst_190 = arith.constant dense<0.000000e+00> : vector<2x4xf32>
    %228 = tpu.matmul %226, %227, %cst_190 {dimension_numbers = #tpu.dot_dimension_numbers<[1], [0], [0], [1], [0, 0, 1, 1], [], []>} : vector<2x128xf32>, vector<128x4xf32>, vector<2x4xf32> -> vector<2x4xf32>
    %c0_191 = arith.constant 0 : index
    %c0_192 = arith.constant 0 : index
    %229 = vector.load %arg21[%c0_191, %c0_192] : memref<1x4xf32, #tpu.memory_space<vmem>>, vector<1x4xf32>
    %230 = vector.broadcast %229 : vector<1x4xf32> to vector<2x4xf32>
    %231 = arith.addf %228, %230 : vector<2x4xf32>
    %c0_193 = arith.constant 0 : index
    %c0_194 = arith.constant 0 : index
    %232 = vector.load %arg22[%c0_193, %c0_194] : memref<2x4xf32, #tpu.memory_space<vmem>>, vector<2x4xf32>
    tpu.vector_store %arg22[%c0_193, %c0_194], %231 {strides = array<i32>} : memref<2x4xf32, #tpu.memory_space<vmem>>, vector<2x4xf32>,
    return
  }
}

</mosaic_0001>

<bundles_post_ra>
// kernel: tpu_custom_call.1
= control target key start
LH: loop header
LB: loop body
LE: loop exit
PB: predicated region body
PF: predicated region fallthrough
CT: control target
= control target key end

     0   :  { %s7214_s0 = inlined_call_operand.vmem [shape: f32[16,8], index: 0, kind: input, shape index: {}]   ;;  %s7215_s1 = inlined_call_operand.hbm [shape: f32[16,16], index: 1, kind: input, shape index: {}]   ;;  %s7216_s2 = inlined_call_operand.vmem [shape: f32[16,8], index: 2, kind: input, shape index: {}]   ;;  %s7217_s3 = inlined_call_operand.vmem [shape: f32[16,1], index: 3, kind: input, shape index: {}]   ;;  %s7218_s4 = inlined_call_operand.vmem [shape: f32[16,2], index: 4, kind: input, shape index: {}]   ;;  %s7219_s5 = inlined_call_operand.hbm [shape: f32[2,16], index: 5, kind: input, shape index: {}]   ;;  %s7220_s6 = inlined_call_operand.hbm [shape: f32[8,128], index: 6, kind: input, shape index: {}]   ;;  %s7221_s7 = inlined_call_operand.hbm [shape: f32[1,128], index: 7, kind: input, shape index: {}]   ;;  %s7222_s8 = inlined_call_operand.hbm [shape: f32[4,128,128], index: 8, kind: input, shape index: {}]   ;;  %s7223_s9 = inlined_call_operand.hbm [shape: f32[4,1,128], index: 9, kind: input, shape index: {}]   ;;  %s7224_s10 = inlined_call_operand.hbm [shape: f32[8,640], index: 10, kind: input, shape index: {}]   ;;  %s7225_s11 = inlined_call_operand.hbm [shape: f32[1,640], index: 11, kind: input, shape index: {}]   ;;  %s7226_s12 = inlined_call_operand.hbm [shape: f32[5,128,128], index: 12, kind: input, shape index: {}]   ;;  %s7227_s13 = inlined_call_operand.vmem [shape: f32[5,1,128], index: 13, kind: input, shape index: {}]   ;;  %s7228_s14 = inlined_call_operand.hbm [shape: f32[5,128,128], index: 14, kind: input, shape index: {}]   ;;  %s7229_s15 = inlined_call_operand.vmem [shape: f32[5,1,128], index: 15, kind: input, shape index: {}]   ;;  %s7230_s16 = inlined_call_operand.vmem [shape: f32[128,128], index: 16, kind: input, shape index: {}]   ;;  %s7231_s17 = inlined_call_operand.vmem [shape: f32[1,128], index: 17, kind: input, shape index: {}]   ;;  %s7232_s18 = inlined_call_operand.vmem [shape: f32[128,128], index: 18, kind: input, shape index: {}]   ;;  %s7233_s19 = inlined_call_operand.vmem [shape: f32[1,128], index: 19, kind: input, shape index: {}]   ;;  %s7234_s20 = inlined_call_operand.vmem [shape: f32[128,4], index: 20, kind: input, shape index: {}]   ;;  %s7235_s21 = inlined_call_operand.vmem [shape: f32[1,4], index: 21, kind: input, shape index: {}]   ;;  %s7236_s22 = inlined_call_operand.hbm [shape: f32[2,4], index: 22, kind: output, shape index: {}]  }
   0x1   :  { %7244 = sst [smem:[#allocation27_spill]] %s7214_s0 }
   0x2   :  { %7245 = sst [smem:[#allocation28_spill]] %s7215_s1 }
   0x3   :  { %7246 = sst [smem:[#allocation29_spill]] %s7216_s2 }
   0x4   :  { %7247 = sst [smem:[#allocation30_spill]] %s7217_s3 }
   0x5   :  { %7248 = sst [smem:[#allocation31_spill]] %s7218_s4 }
   0x6   :  { %7249 = sst [smem:[#allocation32_spill]] %s7219_s5 }
   0x7   :  { %7250 = sst [smem:[#allocation33_spill]] %s7220_s6 }
   0x8   :  { %27 = vsyncpa [#allocation3], 0 }
   0x9   :  { %28 = vsyncpa [#allocation6], 0 }
   0xa   :  { %29 = vsyncpa [#allocation9], 0 }
   0xb   :  { %30 = vsyncpa [#allocation12], 0 }
   0xc   :  { %31 = vsyncpa [#allocation15], 0 }
   0xd   :  { %32 = vsyncpa [#allocation18], 0 }
   0xe   :  { %33 = vsyncpa [#allocation4], 0  ;;  %s6317_s3 = smov [#allocation5]   ;;  %s6318_s29 = smov [#allocation8]  }
   0xf   :  { %s60_s28 = sshll.u32 %s6317_s3, 4  ;;  %s80_s30 = sshll.u32 %s6318_s29, 4  ;;  %s61_s28 = int_to_ptr.vmem [resolvable:$true] %s60_s28  ;;  %s81_s30 = int_to_ptr.vmem [resolvable:$true] %s80_s30 }
  0x10   :  { %s7251_s23 = sld [smem:[#allocation32_spill]] }
  0x16   :  { %s6061_s1 = scalar_lea.hbm %s7251_s23, 32 }
  0x17   :  { %p6062_p0 = scmp.ne.s32.totalorder %s7251_s23, %s6061_s1  ;;  %p6065_p1 = scmp.lt.u32.totalorder %s6061_s1, %s7251_s23 }
  0x19   :  { %p6067_p2 = pnand %p6065_p1, %p6062_p0 }
  0x1b   :  { %6070 = shalt.err (!%p6067_p2)
}
  0x1c   :  { %s6071_s26 = scalar_lea.vmem %s61_s28, 32  ;;  %p6076_p4 = scmp.lt.s32.totalorder %s61_s28, %s61_s28 }
  0x1d   :  { %p6072_p3 = scmp.ne.s32.totalorder %s61_s28, %s6071_s26  ;;  %p6077_p5 = scmp.lt.s32.totalorder %s6071_s26, %s6071_s26 }
  0x1f   :  { %p6078_p6 = por %p6077_p5, %p6076_p4 }
  0x21   :  { %p6079_p7 = pnand %p6078_p6, %p6072_p3 }
  0x23   :  { %6082 = shalt.err (!%p6079_p7)
}
  0x24   :  { %63 = dma.hbm_to_vmem [thread:$0]  %s7251_s23, 32, %s61_s28, [#allocation6]  }
  0x25   :  { %s6083_s4 = scalar_lea.hbm %s7221_s7, 16 }
  0x26   :  { %p6084_p8 = scmp.ne.s32.totalorder %s7221_s7, %s6083_s4  ;;  %p6087_p9 = scmp.lt.u32.totalorder %s6083_s4, %s7221_s7 }
  0x28   :  { %p6089_p10 = pnand %p6087_p9, %p6084_p8 }
  0x2a   :  { %6092 = shalt.err (!%p6089_p10)
}
  0x2b   :  { %s6093_s6 = scalar_lea.vmem %s81_s30, 16  ;;  %s6097_s25 = scalar_lea.vmem %s81_s30, 32 }
  0x2c   :  { %p6094_p11 = scmp.ne.s32.totalorder %s81_s30, %s6093_s6  ;;  %p6098_p12 = scmp.lt.s32.totalorder %s81_s30, %s81_s30 }
  0x2d   :  { %p6099_p13 = scmp.lt.s32.totalorder %s6097_s25, %s6093_s6 }
  0x2f   :  { %p6100_p0 = por %p6099_p13, %p6098_p12 }
  0x31   :  { %p6101_p1 = pnand %p6100_p0, %p6094_p11 }
  0x33   :  { %6104 = shalt.err (!%p6101_p1)
}
  0x34   :  { %83 = dma.hbm_to_vmem [thread:$0]  %s7221_s7, 16, %s81_s30, [#allocation9]  }
  0x35   :  { %s6319_s26 = smov [#allocation11]   ;;  %s6105_s29 = scalar_lea.hbm %s7223_s9, 64 }
  0x36   :  { %s101_s2 = sshll.u32 %s6319_s26, 4  ;;  %p6106_p2 = scmp.ne.s32.totalorder %s7223_s9, %s6105_s29  ;;  %s102_s2 = int_to_ptr.vmem [resolvable:$true] %s101_s2 }
  0x37   :  { %p6109_p3 = scmp.lt.u32.totalorder %s6105_s29, %s7223_s9 }
  0x39   :  { %p6111_p4 = pnand %p6109_p3, %p6106_p2 }
  0x3b   :  { %6114 = shalt.err (!%p6111_p4)
}
  0x3c   :  { %s6115_s24 = scalar_lea.vmem %s102_s2, 64  ;;  %p6120_p6 = scmp.lt.s32.totalorder %s102_s2, %s102_s2 }
  0x3d   :  { %p6116_p5 = scmp.ne.s32.totalorder %s102_s2, %s6115_s24  ;;  %p6121_p7 = scmp.lt.s32.totalorder %s6115_s24, %s6115_s24 }
  0x3f   :  { %p6122_p8 = por %p6121_p7, %p6120_p6 }
  0x41   :  { %p6123_p9 = pnand %p6122_p8, %p6116_p5 }
  0x43   :  { %6126 = shalt.err (!%p6123_p9)
}
  0x44   :  { %s6320_s7 = smov 16   ;;  %s6321_s30 = smov 1  }
  0x45   :  { %107 = dma.hbm_to_vmem [thread:$0]  %s7223_s9, 64, %s102_s2, [#allocation12], %s6320_s7, %s6320_s7, %s6321_s30  }
  0x46   :  { %s6322_s28 = smov [#allocation14]   ;;  %s6323_s26 = smov [#allocation2]  }
  0x47   :  { %s124_s23 = sshll.u32 %s6322_s28, 4  ;;  %s41_s27 = sshll.u32 %s6323_s26, 4  ;;  %s125_s23 = int_to_ptr.vmem [resolvable:$true] %s124_s23  ;;  %s42_s27 = int_to_ptr.vmem [resolvable:$true] %s41_s27 }
  0x48   :  { %s6127_s4 = scalar_lea.hbm %s7225_s11, 80 }
  0x49   :  { %p6128_p10 = scmp.ne.s32.totalorder %s7225_s11, %s6127_s4  ;;  %p6131_p11 = scmp.lt.u32.totalorder %s6127_s4, %s7225_s11 }
  0x4b   :  { %p6133_p12 = pnand %p6131_p11, %p6128_p10 }
  0x4d   :  { %6136 = shalt.err (!%p6133_p12)
}
  0x4e   :  { %s6137_s9 = scalar_lea.vmem %s125_s23, 80  ;;  %s6141_s2 = scalar_lea.vmem %s125_s23, 96 }
  0x4f   :  { %p6138_p13 = scmp.ne.s32.totalorder %s125_s23, %s6137_s9  ;;  %p6142_p0 = scmp.lt.s32.totalorder %s125_s23, %s125_s23 }
  0x50   :  { %p6143_p1 = scmp.lt.s32.totalorder %s6141_s2, %s6137_s9 }
  0x52   :  { %p6144_p2 = por %p6143_p1, %p6142_p0 }
  0x54   :  { %p6145_p3 = pnand %p6144_p2, %p6138_p13 }
  0x56   :  { %6148 = shalt.err (!%p6145_p3)
}
  0x57   :  { %127 = dma.hbm_to_vmem [thread:$0]  %s7225_s11, 80, %s125_s23, [#allocation15]  }
  0x58   :  { %s7252_s28 = sld [smem:[#allocation28_spill]] }
  0x5e   :  { %s6149_s26 = scalar_lea.hbm %s7252_s28, 256 }
  0x5f   :  { %p6150_p4 = scmp.ne.s32.totalorder %s7252_s28, %s6149_s26  ;;  %p6153_p5 = scmp.lt.u32.totalorder %s6149_s26, %s7252_s28 }
  0x61   :  { %p6155_p6 = pnand %p6153_p5, %p6150_p4 }
  0x63   :  { %6158 = shalt.err (!%p6155_p6)
}
  0x64   :  { %s6159_s5 = scalar_lea.vmem %s42_s27, 256  ;;  %p6164_p8 = scmp.lt.s32.totalorder %s42_s27, %s42_s27 }
  0x65   :  { %p6160_p7 = scmp.ne.s32.totalorder %s42_s27, %s6159_s5  ;;  %p6165_p9 = scmp.lt.s32.totalorder %s6159_s5, %s6159_s5 }
  0x67   :  { %p6166_p10 = por %p6165_p9, %p6164_p8 }
  0x69   :  { %p6167_p11 = pnand %p6166_p10, %p6160_p7 }
  0x6b   :  { %6170 = shalt.err (!%p6167_p11)
}
  0x6c   :  { %s6324_s11 = smov 128   ;;  %s6325_s23 = smov 8  }
  0x6d   :  { %47 = dma.hbm_to_vmem [thread:$0]  %s7252_s28, 256, %s42_s27, [#allocation3], %s6324_s11, %s6324_s11, %s6325_s23  }
  0x6e   :  { %s6326_s9 = smov [#allocation7]   ;;  %s6327_s7 = smov [#allocation10]  }
  0x6f   :  { %s70_s2 = sshll.u32 %s6326_s9, 4  ;;  %s89_s30 = sshll.u32 %s6327_s7, 4  ;;  %s71_s2 = int_to_ptr.vmem [resolvable:$true] %s70_s2  ;;  %s90_s30 = int_to_ptr.vmem [resolvable:$true] %s89_s30 }
  0x70   :  { %s7253_s26 = sld [smem:[#allocation33_spill]] }
  0x76   :  { %s6171_s3 = scalar_lea.hbm %s7253_s26, 128 }
  0x77   :  { %p6172_p12 = scmp.ne.s32.totalorder %s7253_s26, %s6171_s3  ;;  %p6175_p13 = scmp.lt.u32.totalorder %s6171_s3, %s7253_s26 }
  0x79   :  { %p6177_p0 = pnand %p6175_p13, %p6172_p12 }
  0x7b   :  { %6180 = shalt.err (!%p6177_p0)
}
  0x7c   :  { %s6181_s27 = scalar_lea.vmem %s71_s2, 128  ;;  %p6186_p2 = scmp.lt.s32.totalorder %s71_s2, %s71_s2 }
  0x7d   :  { %p6182_p1 = scmp.ne.s32.totalorder %s71_s2, %s6181_s27  ;;  %p6187_p3 = scmp.lt.s32.totalorder %s6181_s27, %s6181_s27 }
  0x7f   :  { %p6188_p4 = por %p6187_p3, %p6186_p2 }
  0x81   :  { %p6189_p5 = pnand %p6188_p4, %p6182_p1 }
  0x83   :  { %6192 = shalt.err (!%p6189_p5)
}
  0x84   :  { %73 = dma.hbm_to_vmem [thread:$0]  %s7253_s26, 128, %s71_s2, [#allocation6]  }
  0x85   :  { %s6193_s7 = scalar_lea.hbm %s7222_s8, 8192 }
  0x86   :  { %p6194_p6 = scmp.ne.s32.totalorder %s7222_s8, %s6193_s7  ;;  %p6197_p7 = scmp.lt.u32.totalorder %s6193_s7, %s7222_s8 }
  0x88   :  { %p6199_p8 = pnand %p6197_p7, %p6194_p6 }
  0x8a   :  { %6202 = shalt.err (!%p6199_p8)
}
  0x8b   :  { %s6203_s4 = scalar_lea.vmem %s90_s30, 8192  ;;  %p6208_p10 = scmp.lt.s32.totalorder %s90_s30, %s90_s30 }
  0x8c   :  { %p6204_p9 = scmp.ne.s32.totalorder %s90_s30, %s6203_s4  ;;  %p6209_p11 = scmp.lt.s32.totalorder %s6203_s4, %s6203_s4 }
  0x8e   :  { %p6210_p12 = por %p6209_p11, %p6208_p10 }
  0x90   :  { %p6211_p13 = pnand %p6210_p12, %p6204_p9 }
  0x92   :  { %6214 = shalt.err (!%p6211_p13)
}
  0x93   :  { %95 = dma.hbm_to_vmem [thread:$0]  %s7222_s8, 8192, %s90_s30, [#allocation9], %s6324_s11, %s6324_s11, %s6325_s23  }
  0x94   :  { %s6328_s0 = smov [#allocation13]   ;;  %s6329_s27 = smov [#allocation16]  }
  0x95   :  { %s114_s5 = sshll.u32 %s6328_s0, 4  ;;  %s133_s28 = sshll.u32 %s6329_s27, 4  ;;  %s115_s5 = int_to_ptr.vmem [resolvable:$true] %s114_s5  ;;  %s134_s28 = int_to_ptr.vmem [resolvable:$true] %s133_s28 }
  0x96   :  { %s6215_s9 = scalar_lea.hbm %s7224_s10, 640 }
  0x97   :  { %p6216_p0 = scmp.ne.s32.totalorder %s7224_s10, %s6215_s9  ;;  %p6219_p1 = scmp.lt.u32.totalorder %s6215_s9, %s7224_s10 }
  0x99   :  { %p6221_p2 = pnand %p6219_p1, %p6216_p0 }
  0x9b   :  { %6224 = shalt.err (!%p6221_p2)
}
  0x9c   :  { %s6225_s8 = scalar_lea.vmem %s115_s5, 640  ;;  %p6230_p4 = scmp.lt.s32.totalorder %s115_s5, %s115_s5 }
  0x9d   :  { %p6226_p3 = scmp.ne.s32.totalorder %s115_s5, %s6225_s8  ;;  %p6231_p5 = scmp.lt.s32.totalorder %s6225_s8, %s6225_s8 }
  0x9f   :  { %p6232_p6 = por %p6231_p5, %p6230_p4 }
  0xa1   :  { %p6233_p7 = pnand %p6232_p6, %p6226_p3 }
  0xa3   :  { %6236 = shalt.err (!%p6233_p7)
}
  0xa4   :  { %117 = dma.hbm_to_vmem [thread:$0]  %s7224_s10, 640, %s115_s5, [#allocation12]  }
  0xa5   :  { %s6237_s26 = scalar_lea.hbm %s7226_s12, 10240 }
  0xa6   :  { %p6238_p8 = scmp.ne.s32.totalorder %s7226_s12, %s6237_s26  ;;  %p6241_p9 = scmp.lt.u32.totalorder %s6237_s26, %s7226_s12 }
  0xa8   :  { %p6243_p10 = pnand %p6241_p9, %p6238_p8 }
  0xaa   :  { %6246 = shalt.err (!%p6243_p10)
}
  0xab   :  { %s6247_s9 = scalar_lea.vmem %s134_s28, 10240  ;;  %p6252_p12 = scmp.lt.s32.totalorder %s134_s28, %s134_s28 }
  0xac   :  { %p6248_p11 = scmp.ne.s32.totalorder %s134_s28, %s6247_s9  ;;  %p6253_p13 = scmp.lt.s32.totalorder %s6247_s9, %s6247_s9 }
  0xae   :  { %p6254_p0 = por %p6253_p13, %p6252_p12 }
  0xb0   :  { %p6255_p1 = pnand %p6254_p0, %p6248_p11 }
  0xb2   :  { %6258 = shalt.err (!%p6255_p1)
}
  0xb3   :  { %139 = dma.hbm_to_vmem [thread:$0]  %s7226_s12, 10240, %s134_s28, [#allocation15], %s6324_s11, %s6324_s11, %s6325_s23  }
  0xb4   :  { %s6330_s7 = smov [#allocation17]   ;;  %s6259_s8 = scalar_lea.hbm %s7228_s14, 10240 }
  0xb5   :  { %s147_s6 = sshll.u32 %s6330_s7, 4  ;;  %p6260_p2 = scmp.ne.s32.totalorder %s7228_s14, %s6259_s8  ;;  %s148_s6 = int_to_ptr.vmem [resolvable:$true] %s147_s6 }
  0xb6   :  { %p6263_p3 = scmp.lt.u32.totalorder %s6259_s8, %s7228_s14 }
  0xb8   :  { %p6265_p4 = pnand %p6263_p3, %p6260_p2 }
  0xba   :  { %6268 = shalt.err (!%p6265_p4)
}
  0xbb   :  { %s6269_s26 = scalar_lea.vmem %s148_s6, 10240  ;;  %p6274_p6 = scmp.lt.s32.totalorder %s148_s6, %s148_s6 }
  0xbc   :  { %p6270_p5 = scmp.ne.s32.totalorder %s148_s6, %s6269_s26  ;;  %p6275_p7 = scmp.lt.s32.totalorder %s6269_s26, %s6269_s26 }
  0xbe   :  { %p6276_p8 = por %p6275_p7, %p6274_p6 }
  0xc0   :  { %p6277_p9 = pnand %p6276_p8, %p6270_p5 }
  0xc2   :  { %6280 = shalt.err (!%p6277_p9)
}
  0xc3   :  { %153 = dma.hbm_to_vmem [thread:$0]  %s7228_s14, 10240, %s148_s6, [#allocation18], %s6324_s11, %s6324_s11, %s6325_s23  }
  0xc4   :  { %6303 = dma.done.wait [#allocation3], 256  }
  0xc5   :  { %6304 = vsyncadd [#allocation3], 4294967040 }
  0xc6   :  { %6305 = dma.done.wait [#allocation6], 160  }
  0xc7   :  { %6306 = vsyncadd [#allocation6], 4294967136 }
  0xc8   :  { %6307 = dma.done.wait [#allocation9], 8208  }
  0xc9   :  { %6308 = vsyncadd [#allocation9], 4294959088 }
  0xca   :  { %6309 = dma.done.wait [#allocation12], 704  }
  0xcb   :  { %6310 = vsyncadd [#allocation12], 4294966592 }
  0xcc   :  { %6311 = dma.done.wait [#allocation15], 10320  }
  0xcd   :  { %6312 = vsyncadd [#allocation15], 4294956976 }
  0xce   :  { %6313 = dma.done.wait [#allocation18], 10240  }
  0xcf   :  { %6314 = vsyncadd [#allocation18], 4294957056  ;;  %v6331_v0 = vmov 0.0   ;;  %vm261_vm0 = vcmask 64512   ;;  %v497_v1 = vld [vmem:[#allocation7] sm:$0xff]  ;;  %s7254_s14 = sld [smem:[#allocation27_spill]] }
  0xd0   :  { %332 = vmatprep.mubr.f32.mxu0 %v6331_v0  ;;  %4405 = vmatprep.subr.mxu1 %v497_v1  ;;  %s7255_s9 = sld [smem:[#allocation31_spill]]  ;;  %vm586_vm1 = vcmask 15360   ;;  %v210_v5 = vld [vmem:[#allocation13 + $0x8] sm:$0xff]  ;;  %v209_v6 = vld [vmem:[#allocation13] sm:$0xff]  ;;  %s7256_s7 = sld [smem:[#allocation29_spill]]  ;;  %v212_v8 = vld [vmem:[#allocation13 + $0x18] sm:$0xff] }
  0xd1   :  { %4406 = vmatpush3.msra.mxu1 %v497_v1  ;;  %268 = vmatprep.subr.mxu0 %v210_v5  ;;  %v211_v9 = vld [vmem:[#allocation13 + $0x10] sm:$0xff]  ;;  %v213_v12 = vld [vmem:[#allocation13 + $0x20] sm:$0xff]  ;;  %vm674_vm2 = vcmask 130048   ;;  %s7257_s4 = sld [smem:[#allocation30_spill]]  ;;  %v6332_v15 = vmov 0   ;;  %v6645_v34 = vld [vmem:[#allocation2 + $0x8] sm:$0xff] }
  0xd2   :  { %4410 = vmatprep.subr.mxu1 %v6331_v0  ;;  %269 = vmatpush1.msra.mxu0 %v209_v6  ;;  %v6623_v13 = vld [vmem:[#allocation2] sm:$0xff]  ;;  %v3882_v19 = vld [vmem:[#allocation8] ss:$0 sm:$0xff]  ;;  %v756_v25 = vld [vmem:[#allocation16] sm:$0xff]  ;;  %vm6334_vm3 = vmmov 0   ;;  %vm593_vm4 = vcmask 1041408  }
  0xd3   :  { %345 = vmatprep.subr.mxu0 %v212_v8  ;;  %6052 = vset.pattern.permute.xlu0 %v6332_v15  ;;  %v757_v26 = vld [vmem:[#allocation16 + $0x8] sm:$0xff]  ;;  %v758_v32 = vld [vmem:[#allocation16 + $0x10] sm:$0xff]  ;;  %v759_v33 = vld [vmem:[#allocation16 + $0x18] sm:$0xff]  ;;  %s6335_s24 = smov [#allocation19]   ;;  %vm3854_vm5 = vcmask 25600  }
  0xd4   :  { %v5314_v30 = vpack.c.bf16 %v757_v26, %v756_v25  ;;  %v5318_v36 = vpack.c.bf16 %v759_v33, %v758_v32  ;;  %v760_v38 = vld [vmem:[#allocation16 + $0x20] sm:$0xff]  ;;  %v761_v39 = vld [vmem:[#allocation16 + $0x28] sm:$0xff]  ;;  %v762_v41 = vld [vmem:[#allocation16 + $0x30] sm:$0xff]  ;;  %s3862_s10 = sshll.u32 %s6335_s24, 4  ;;  %s3863_s10 = int_to_ptr.vmem [resolvable:$true] %s3862_s10 }
  0xd5   :  { %v198_v2 = vld [vmem:[%s7254_s14] sm:$0xff]  ;;  %v199_v3 = vld [vmem:[%s7254_s14 + $0x8] sm:$0xff]  ;;  %v5322_v40 = vpack.c.bf16 %v761_v39, %v760_v38  ;;  %v763_v42 = vld [vmem:[#allocation16 + $0x38] sm:$0xff]  ;;  %p6286_p11 = scmp.lt.s32.totalorder %s3863_s10, %s3863_s10 }
  0xd6   :  { %4407 = vmatprep.mubr.msk.f32.mxu1 %vm261_vm0, %v198_v2  ;;  %v6594_v4 = vld [vmem:[%s7255_s9] sm:$0xff]  ;;  %v203_v10 = vld [vmem:[%s7256_s7 + $0x8] sm:$0xff]  ;;  %v5326_v43 = vpack.c.bf16 %v763_v42, %v762_v41  ;;  %v767_v48 = vld [vmem:[#allocation16 + $0x58] sm:$0xff] }
  0xd7   :  { %4408 = vmatmul.mubr.msk.f32.vlgmr.msra.gmra.mrb[0].mxu1 %vm261_vm0, %v199_v3  ;;  %v202_v7 = vld [vmem:[%s7256_s7] sm:$0xff]  ;;  %v6612_v11 = vld [vmem:[%s7255_s9 + $0x8] sm:$0xff]  ;;  %v771_v54 = vld [vmem:[#allocation16 + $0x78] sm:$0xff] }
  0xd8   :  { %4411 = vmatpush3.msra.mxu1 %v6331_v0  ;;  %4412 = vmatprep.mubr.msk.f32.mxu1 %vm586_vm1, %v6594_v4  ;;  %v204_v14 = vld [vmem:[%s7257_s4] sm:$0xff]  ;;  %v205_v16 = vld [vmem:[%s7257_s4 + $0x8] sm:$0xff]  ;;  %v859_v60 = vld [vmem:[#allocation17 + $0x18] sm:$0xff] }
  0xd9   :  { %3876 = vmatmul.mubr.msk.f32.vlgmr.msra.gmra.mrb[0].mxu0 %vm261_vm0, %v202_v7  ;;  %217 = vperm.xlu0 %6052, %v204_v14   ;;  %v764_v44 = vld [vmem:[#allocation16 + $0x40] sm:$0xff]  ;;  %v765_v45 = vld [vmem:[#allocation16 + $0x48] sm:$0xff]  ;;  %v766_v47 = vld [vmem:[#allocation16 + $0x50] sm:$0xff] }
  0xda   :  { %338 = vmatprep.mubr.f32.mxu0 %v6331_v0  ;;  %346 = vmatpush1.msra.mxu0 %v211_v9  ;;  %v5330_v46 = vpack.c.bf16 %v765_v45, %v764_v44  ;;  %v5334_v49 = vpack.c.bf16 %v767_v48, %v766_v47  ;;  %v768_v50 = vld [vmem:[#allocation16 + $0x60] sm:$0xff]  ;;  %v769_v51 = vld [vmem:[#allocation16 + $0x68] sm:$0xff]  ;;  %v770_v53 = vld [vmem:[#allocation16 + $0x70] sm:$0xff] }
  0xdb   :  { %4400 = vmatprep.subr.mxu0 %v213_v12  ;;  %v5338_v52 = vpack.c.bf16 %v769_v51, %v768_v50  ;;  %v5342_v55 = vpack.c.bf16 %v771_v54, %v770_v53  ;;  %v856_v56 = vld [vmem:[#allocation17] sm:$0xff]  ;;  %v857_v57 = vld [vmem:[#allocation17 + $0x8] sm:$0xff]  ;;  %v858_v58 = vld [vmem:[#allocation17 + $0x10] sm:$0xff] }
  0xdc   :  { %v5346_v59 = vpack.c.bf16 %v857_v57, %v856_v56  ;;  %v5350_v61 = vpack.c.bf16 %v859_v60, %v858_v58  ;;  %v860_v62 = vld [vmem:[#allocation17 + $0x20] sm:$0xff]  ;;  %v861_v63 = vld [vmem:[#allocation17 + $0x28] sm:$0xff]  ;;  %v862_v2 = vld [vmem:[#allocation17 + $0x30] sm:$0xff] }
  0xdd   :  { %3877 = vmatmul.mubr.msk.f32.gmra.mrb[2].mxu0 %vm261_vm0, %v203_v10  ;;  %222 = vperm.xlu0 %6052, %v205_v16   ;;  %v5354_v1 = vpack.c.bf16 %v861_v63, %v860_v62  ;;  %v863_v3 = vld [vmem:[#allocation17 + $0x38] sm:$0xff]  ;;  %v864_v6 = vld [vmem:[#allocation17 + $0x40] sm:$0xff]  ;;  %v866_v9 = vld [vmem:[#allocation17 + $0x50] sm:$0xff] }
  0xde   :  { %409 = vmatprep.mubr.f32.mxu0 %v6331_v0  ;;  %5347 = vmatprep.subr.bf16.mxu1 %v5346_v59  ;;  %v5358_v5 = vpack.c.bf16 %v863_v3, %v862_v2  ;;  %v868_v14 = vld [vmem:[#allocation17 + $0x60] sm:$0xff]  ;;  %v869_v15 = vld [vmem:[#allocation17 + $0x68] sm:$0xff]  ;;  %v6658_v25 = vld [vmem:[#allocation14] sm:$0x1f] }
  0xdf   :  { %4413 = vmatmul.mubr.msk.f32.vlgmr.msra.gmra.mrb[0].mxu1 %vm586_vm1, %v6612_v11  ;;  %v5370_v16 = vpack.c.bf16 %v869_v15, %v868_v14  ;;  %v870_v41 = vld [vmem:[#allocation17 + $0x70] sm:$0xff]  ;;  %v871_v42 = vld [vmem:[#allocation17 + $0x78] sm:$0xff]  ;;  %v3889_v44 = vld [vmem:[%s7227_s13] ss:$0 sm:$0xff] }
  0xe0   :  { %5349 = vmatpush3.bf16.msra.mxu1 %v5346_v59  ;;  %v1029_v50 = vld [vmem:[%s7230_s16] sm:$0xff]  ;;  %v1030_v51 = vld [vmem:[%s7230_s16 + $0x8] sm:$0xff]  ;;  %v1032_v54 = vld [vmem:[%s7230_s16 + $0x18] sm:$0xff] }
  0xe1   :  { %3878 = vmatmul.mubr.msk.f32.vlgmr.msra.gmra.mrb[4].mxu0 %vm261_vm0, %v202_v7  ;;  %5351 = vmatprep.subr.bf16.mxu1 %v5350_v61  ;;  %v6685_v53 = vpack.c.bf16 %v1030_v51, %v1029_v50  ;;  %v1033_v56 = vld [vmem:[%s7230_s16 + $0x20] sm:$0xff]  ;;  %v1034_v57 = vld [vmem:[%s7230_s16 + $0x28] sm:$0xff]  ;;  %v1035_v59 = vld [vmem:[%s7230_s16 + $0x30] sm:$0xff] }
  0xe2   :  { %415 = vmatprep.mubr.f32.mxu0 %v6331_v0  ;;  %4401 = vmatpush3.msra.mxu0 %v213_v12  ;;  %v6701_v58 = vpack.c.bf16 %v1034_v57, %v1033_v56  ;;  %v1036_v60 = vld [vmem:[%s7230_s16 + $0x38] sm:$0xff]  ;;  %v1037_v62 = vld [vmem:[%s7230_s16 + $0x40] sm:$0xff]  ;;  %v1038_v63 = vld [vmem:[%s7230_s16 + $0x48] sm:$0xff] }
  0xe3   :  { %v1039_v2 = vld [vmem:[%s7230_s16 + $0x50] sm:$0xff]  ;;  %v1040_v3 = vld [vmem:[%s7230_s16 + $0x58] sm:$0xff]  ;;  %v3890_v14 = vld [vmem:[%s7229_s15] ss:$0 sm:$0xff] }
  0xe4   :  { %5353 = vmatpush3.bf16.msra.mxu1 %v5350_v61  ;;  %v6711_v61 = vpack.c.bf16 %v1036_v60, %v1035_v59  ;;  %v1131_v50 = vld [vmem:[%s7232_s18 + $0x40] sm:$0xff]  ;;  %v1132_v51 = vld [vmem:[%s7232_s18 + $0x48] sm:$0xff]  ;;  %v1134_v56 = vld [vmem:[%s7232_s18 + $0x58] sm:$0xff] }
  0xe5   :  { %3879 = vmatmul.mubr.msk.f32.gmra.mrb[6].mxu0 %vm261_vm0, %v203_v10  ;;  %5355 = vmatprep.subr.bf16.mxu1 %v5354_v1  ;;  %v1135_v59 = vld [vmem:[%s7232_s18 + $0x60] sm:$0xff]  ;;  %v1136_v60 = vld [vmem:[%s7232_s18 + $0x68] sm:$0xff] }
  0xe6   :  { %4402 = vmatprep.mubr.msk.f32.mxu0 %vm261_vm0, %v202_v7  ;;  %v865_v7 = vld [vmem:[#allocation17 + $0x48] sm:$0xff] }
  0xe7   :  { %v5362_v8 = vpack.c.bf16 %v865_v7, %v864_v6  ;;  %v1041_v6 = vld [vmem:[%s7230_s16 + $0x60] sm:$0xff]  ;;  %v1042_v7 = vld [vmem:[%s7230_s16 + $0x68] sm:$0xff] }
  0xe8   :  { %5357 = vmatpush3.bf16.msra.mxu1 %v5354_v1  ;;  %v6721_v1 = vpack.c.bf16 %v1038_v63, %v1037_v62  ;;  %v6835_v62 = vpack.c.bf16 %v1136_v60, %v1135_v59  ;;  %v1220_v63 = vld [vmem:[#allocation10 + $0x10] sm:$0xff] }
  0xe9   :  { %4403 = vmatmul.mubr.msk.f32.vlgmr.msra.gmra.mrb[8].mxu0 %vm261_vm0, %v203_v10  ;;  %5359 = vmatprep.subr.bf16.mxu1 %v5358_v5  ;;  %v867_v10 = vld [vmem:[#allocation17 + $0x58] sm:$0xff]  ;;  %v6864_v59 = vld [vmem:[%s7233_s19] ss:$0 sm:$0xff] }
  0xea   :  { %4419 = vmatprep.mubr.msk.f32.mxu0 %vm674_vm2, %v6623_v13  ;;  %v5366_v12 = vpack.c.bf16 %v867_v10, %v866_v9  ;;  %v1043_v9 = vld [vmem:[%s7230_s16 + $0x70] sm:$0xff]  ;;  %v1044_v10 = vld [vmem:[%s7230_s16 + $0x78] sm:$0xff] }
  0xec   :  { %5361 = vmatpush3.bf16.msra.mxu1 %v5358_v5  ;;  %v6731_v5 = vpack.c.bf16 %v1040_v3, %v1039_v2  ;;  %v1221_v2 = vld [vmem:[#allocation10 + $0x18] sm:$0xff] }
  0xed   :  { %5363 = vmatprep.subr.bf16.mxu1 %v5362_v8  ;;  %v5433_v3 = vpack.c.bf16 %v1221_v2, %v1220_v63 }
  0xf0   :  { %5365 = vmatpush3.bf16.msra.mxu1 %v5362_v8  ;;  %v6741_v8 = vpack.c.bf16 %v1042_v7, %v1041_v6  ;;  %v1222_v7 = vld [vmem:[#allocation10 + $0x20] sm:$0xff] }
  0xf1   :  { %5367 = vmatprep.subr.bf16.mxu1 %v5366_v12 }
  0xf4   :  { %5369 = vmatpush3.bf16.msra.mxu1 %v5366_v12  ;;  %v6751_v12 = vpack.c.bf16 %v1044_v10, %v1043_v9  ;;  %v1223_v9 = vld [vmem:[#allocation10 + $0x28] sm:$0xff] }
  0xf5   :  { %5371 = vmatprep.subr.bf16.mxu1 %v5370_v16 }
  0xf8   :  { %5373 = vmatpush3.bf16.msra.mxu1 %v5370_v16 }
 0x1ac   :  { %v6633_v17 = vpop.f32.mrb[0].mxu0 }
 0x1ad   :  { %v6635_v18 = vpop.f32.mrb[1].mxu0 }
 0x1b0   :  { %v6637_v20 = vpop.f32.mrb[2].mxu0 }
 0x1b1   :  { %v6639_v22 = vpop.f32.mrb[3].mxu0 }
 0x1b2   :  { %v4414_v21 = vpop.f32.mrb[0].mxu1 }
 0x1b3   :  { %v6011_v23 = vadd.f32 %v4414_v21, %v3882_v19  ;;  %v663_v24 = vpop.f32.mrb[1].mxu1 }
 0x1b4   :  { %v6012_v27 = vadd.f32 %v3882_v19, %v663_v24  ;;  %v6641_v28 = vpop.f32.mrb[4].mxu0  ;;  %v226_v19 = vlaneseq }
 0x1b5   :  { %v6643_v31 = vpop.f32.mrb[5].mxu0 }
 0x1b6   :  { %v5310_v29 = vpack.c.bf16 %v6011_v23, %v6012_v27  ;;  %v6653_v21 = vshrl.u32 %v226_v19, 7  ;;  %v6655_v23 = vpop.permute.xlu0 %217 }
 0x1b8   :  { %5311 = vmatprep.subr.bf16.mxu0 %v5310_v29  ;;  %v6647_v35 = vpop.f32.mrb[6].mxu0  ;;  %v228_v24 = vsub.s32 0, %v6653_v21 }
 0x1b9   :  { %5313 = vmatpush3.bf16.msra.mxu0 %v5310_v29  ;;  %v6649_v37 = vpop.f32.mrb[7].mxu0 }
 0x1ba   :  { %5315 = vmatprep.subr.bf16.mxu0 %v5314_v30  ;;  %v229_v26 = vrot.slane %v6658_v25, %v228_v24  ;;  %v6661_v27 = vpop.permute.xlu0 %222 }
 0x1bc   :  { %4420 = vmatmul.mubr.msk.f32.vlgmr.msra.gmra.mrb[10].mxu0 %vm674_vm2, %v6645_v34  ;;  %v256_v29 = vmul.f32 %v229_v26, %v6661_v27 }
 0x1bd   :  { %5317 = vmatpush3.bf16.msra.mxu0 %v5314_v30  ;;  %v251_v30 = vmul.f32 %v229_v26, %v6655_v23 }
 0x1be   :  { %5319 = vmatprep.subr.bf16.mxu0 %v5318_v36  ;;  %v341_v32 = vadd.f32 %v6637_v20, %v256_v29 }
 0x1bf   :  { %v335_v33 = vadd.f32 %v6633_v17, %v251_v30 }
 0x1c1   :  { %5321 = vmatpush3.bf16.msra.mxu0 %v5318_v36 }
 0x1c2   :  { %5323 = vmatprep.subr.bf16.mxu0 %v5322_v40 }
 0x1c5   :  { %5325 = vmatpush3.bf16.msra.mxu0 %v5322_v40 }
 0x1c6   :  { %5327 = vmatprep.subr.bf16.mxu0 %v5326_v43 }
 0x1c9   :  { %5329 = vmatpush3.bf16.msra.mxu0 %v5326_v43  ;;  %v5374_v43 = vpack.c.bf16 %v871_v42, %v870_v41  ;;  %v1125_v41 = vld [vmem:[%s7232_s18 + $0x10] sm:$0xff] }
 0x1ca   :  { %5331 = vmatprep.subr.bf16.mxu0 %v5330_v46 }
 0x1cb   :  { %5375 = vmatprep.subr.bf16.mxu1 %v5374_v43 }
 0x1cc   :  { %5377 = vmatpush3.bf16.msra.mxu1 %v5374_v43  ;;  %v1126_v43 = vld [vmem:[%s7232_s18 + $0x18] sm:$0xff] }
 0x1cd   :  { %5333 = vmatpush3.bf16.msra.mxu0 %v5330_v46 }
 0x1ce   :  { %5335 = vmatprep.subr.bf16.mxu0 %v5334_v49 }
 0x1d1   :  { %5337 = vmatpush3.bf16.msra.mxu0 %v5334_v49  ;;  %v6333_v49 = vmov 0.0|0.0  }
 0x1d2   :  { %5339 = vmatprep.subr.bf16.mxu0 %v5338_v52  ;;  %5381 = vmatprep.subr.bf16.mxu1 %v6333_v49 }
 0x1d5   :  { %5341 = vmatpush3.bf16.msra.mxu0 %v5338_v52  ;;  %v1031_v52 = vld [vmem:[%s7230_s16 + $0x10] sm:$0xff] }
 0x1d6   :  { %5343 = vmatprep.subr.bf16.mxu0 %v5342_v55 }
 0x1d9   :  { %5345 = vmatpush3.bf16.msra.mxu0 %v5342_v55  ;;  %v6691_v55 = vpack.c.bf16 %v1032_v54, %v1031_v52  ;;  %v6815_v52 = vpack.c.bf16 %v1132_v51, %v1131_v50  ;;  %v1133_v54 = vld [vmem:[%s7232_s18 + $0x50] sm:$0xff]  ;;  %v1138_v50 = vld [vmem:[%s7232_s18 + $0x78] sm:$0xff] }
 0x1da   :  { %5378 = vmatprep.subr.bf16.mxu0 %v6333_v49  ;;  %v6825_v57 = vpack.c.bf16 %v1134_v56, %v1133_v54 }
 0x28f   :  { %v4421_v36 = vpop.f32.mrb[10].mxu0 }
 0x290   :  { %v753_v38 = vadd.f32 %v4421_v36, %v341_v32  ;;  %v747_v39 = vpop.f32.mrb[11].mxu0  ;;  %v6763_v32 = vld [vmem:[#allocation5] sm:$0x3]  ;;  %v1219_v36 = vld [vmem:[#allocation10 + $0x8] sm:$0xff] }
 0x291   :  { %v748_v40 = vadd.f32 %v747_v39, %v335_v33  ;;  %v1218_v33 = vld [vmem:[#allocation10] sm:$0xff]  ;;  %v1123_v39 = vld [vmem:[%s7232_s18] sm:$0xff] }
 0x293   :  { %4454 = vmatprep.mubr.f32.mxu0 %v748_v40  ;;  %v1124_v40 = vld [vmem:[%s7232_s18 + $0x8] sm:$0xff] }
 0x294   :  { %4455 = vmatmul.mubr.f32.vlgmr.msra.gmra.mrb[12].mxu0 %v753_v38  ;;  %v5429_v38 = vpack.c.bf16 %v1219_v36, %v1218_v33  ;;  %v6779_v42 = vpack.c.bf16 %v1124_v40, %v1123_v39  ;;  %v1227_v33 = vld [vmem:[#allocation10 + $0x48] sm:$0xff]  ;;  %v1228_v39 = vld [vmem:[#allocation10 + $0x50] sm:$0xff]  ;;  %v1229_v40 = vld [vmem:[#allocation10 + $0x58] sm:$0xff] }
 0x295   :  { %4496 = vmatprep.mubr.msk.f32.mxu0 %vm6334_vm3, %v6331_v0 }
 0x367   :  { %v4456_v45 = vpop.f32.mrb[12].mxu0 }
 0x368   :  { %v851_v46 = vadd.f32 %v4456_v45, %v3889_v44  ;;  %v845_v20 = vpop.f32.mrb[13].mxu0  ;;  %v1127_v45 = vld [vmem:[%s7232_s18 + $0x20] sm:$0xff] }
 0x369   :  { %v846_v47 = vadd.f32 %v3889_v44, %v845_v20  ;;  %v6785_v44 = vpack.c.bf16 %v1126_v43, %v1125_v41  ;;  %v5449_v41 = vpack.c.bf16 %v1229_v40, %v1228_v39  ;;  %v1230_v43 = vld [vmem:[#allocation10 + $0x60] sm:$0xff]  ;;  %v1476_v40 = vld [vmem:[#allocation16 + $0xa0] sm:$0xff] }
 0x36a   :  { %v855_v48 = vmax.f32 %v851_v46, 0.0  ;;  %v1128_v46 = vld [vmem:[%s7232_s18 + $0x28] sm:$0xff] }
 0x36b   :  { %v854_v17 = vmax.f32 %v846_v47, 0.0  ;;  %v6795_v20 = vpack.c.bf16 %v1128_v46, %v1127_v45  ;;  %v1129_v47 = vld [vmem:[%s7232_s18 + $0x30] sm:$0xff]  ;;  %v1232_v45 = vld [vmem:[#allocation10 + $0x70] sm:$0xff]  ;;  %v1233_v46 = vld [vmem:[#allocation10 + $0x78] sm:$0xff] }
 0x36d   :  { %4489 = vmatprep.mubr.f32.mxu1 %v854_v17  ;;  %v1130_v17 = vld [vmem:[%s7232_s18 + $0x38] sm:$0xff] }
 0x36e   :  { %4490 = vmatmul.mubr.f32.vlgmr.msra.gmra.mrb[2].mxu1 %v855_v48  ;;  %v6805_v48 = vpack.c.bf16 %v1130_v17, %v1129_v47  ;;  %v5457_v47 = vpack.c.bf16 %v1233_v46, %v1232_v45  ;;  %v1137_v17 = vld [vmem:[%s7232_s18 + $0x70] sm:$0xff]  ;;  %v1480_v45 = vld [vmem:[#allocation16 + $0xc0] sm:$0xff]  ;;  %v1481_v46 = vld [vmem:[#allocation16 + $0xc8] sm:$0xff] }
 0x36f   :  { %4531 = vmatprep.mubr.msk.f32.mxu1 %vm6334_vm3, %v6331_v0  ;;  %5383 = vmatpush3.bf16.msra.mxu1 %v6685_v53  ;;  %v6850_v51 = vpack.c.bf16 %v1138_v50, %v1137_v17  ;;  %v1482_v17 = vld [vmem:[#allocation16 + $0xd0] sm:$0xff]  ;;  %v1483_v50 = vld [vmem:[#allocation16 + $0xd8] sm:$0xff] }
 0x370   :  { %5384 = vmatprep.subr.bf16.mxu1 %v6333_v49 }
 0x373   :  { %5386 = vmatpush3.bf16.msra.mxu1 %v6691_v55 }
 0x374   :  { %5387 = vmatprep.subr.bf16.mxu1 %v6333_v49 }
 0x377   :  { %5389 = vmatpush3.bf16.msra.mxu1 %v6701_v58 }
 0x378   :  { %5390 = vmatprep.subr.bf16.mxu1 %v6333_v49 }
 0x37b   :  { %5392 = vmatpush3.bf16.msra.mxu1 %v6711_v61 }
 0x37c   :  { %5393 = vmatprep.subr.bf16.mxu1 %v6333_v49 }
 0x37f   :  { %5395 = vmatpush3.bf16.msra.mxu1 %v6721_v1 }
 0x380   :  { %5396 = vmatprep.subr.bf16.mxu1 %v6333_v49 }
 0x383   :  { %5398 = vmatpush3.bf16.msra.mxu1 %v6731_v5 }
 0x384   :  { %5399 = vmatprep.subr.bf16.mxu1 %v6333_v49 }
 0x387   :  { %5401 = vmatpush3.bf16.msra.mxu1 %v6741_v8 }
 0x388   :  { %5402 = vmatprep.subr.bf16.mxu1 %v6333_v49 }
 0x38b   :  { %5404 = vmatpush3.bf16.msra.mxu1 %v6751_v12 }
 0x38c   :  { %5430 = vmatprep.subr.bf16.mxu1 %v5429_v38 }
 0x441   :  { %v4491_v15 = vpop.f32.mrb[2].mxu1 }
 0x442   :  { %v6758_v16 = vadd.f32 %v4491_v15, %v3890_v14  ;;  %v945_v19 = vpop.f32.mrb[3].mxu1  ;;  %v1224_v15 = vld [vmem:[#allocation10 + $0x30] sm:$0xff] }
 0x443   :  { %v946_v24 = vadd.f32 %v3890_v14, %v945_v19  ;;  %v5437_v14 = vpack.c.bf16 %v1223_v9, %v1222_v7  ;;  %v1225_v19 = vld [vmem:[#allocation10 + $0x38] sm:$0xff] }
 0x444   :  { %v955_v26 = vmax.f32 %v6758_v16, 0.0  ;;  %v6856_v16 = vld [vmem:[%s7231_s17] ss:$0 sm:$0xff] }
 0x445   :  { %v954_v29 = vmax.f32 %v946_v24, 0.0  ;;  %v5441_v24 = vpack.c.bf16 %v1225_v19, %v1224_v15  ;;  %v1473_v15 = vld [vmem:[#allocation16 + $0x88] sm:$0xff] }
 0x447   :  { %v5379_v30 = vpack.c.bf16 %v955_v26, %v954_v29 }
 0x449   :  { %5380 = vmatpush3.bf16.msra.mxu0 %v5379_v30  ;;  %v1226_v30 = vld [vmem:[#allocation10 + $0x40] sm:$0xff] }
 0x44a   :  { %5405 = vmatprep.subr.bf16.mxu0 %v6333_v49  ;;  %v5445_v36 = vpack.c.bf16 %v1227_v33, %v1226_v30  ;;  %v1474_v33 = vld [vmem:[#allocation16 + $0x90] sm:$0xff] }
 0x44c   :  { %4497 = vmatmul.mubr.msk.f32.vlgmr.msra.gmra.mrb[14].mxu0 %vm674_vm2, %v6763_v32 }
 0x44d   :  { %4566 = vmatprep.mubr.msk.f32.mxu0 %vm6334_vm3, %v6331_v0  ;;  %5407 = vmatpush3.bf16.msra.mxu0 %v6779_v42 }
 0x44e   :  { %5408 = vmatprep.subr.bf16.mxu0 %v6333_v49 }
 0x451   :  { %5410 = vmatpush3.bf16.msra.mxu0 %v6785_v44 }
 0x452   :  { %5411 = vmatprep.subr.bf16.mxu0 %v6333_v49 }
 0x455   :  { %5413 = vmatpush3.bf16.msra.mxu0 %v6795_v20 }
 0x456   :  { %5414 = vmatprep.subr.bf16.mxu0 %v6333_v49 }
 0x459   :  { %5416 = vmatpush3.bf16.msra.mxu0 %v6805_v48 }
 0x45a   :  { %5417 = vmatprep.subr.bf16.mxu0 %v6333_v49 }
 0x45d   :  { %5419 = vmatpush3.bf16.msra.mxu0 %v6815_v52 }
 0x45e   :  { %5420 = vmatprep.subr.bf16.mxu0 %v6333_v49 }
 0x461   :  { %5422 = vmatpush3.bf16.msra.mxu0 %v6825_v57 }
 0x462   :  { %5423 = vmatprep.subr.bf16.mxu0 %v6333_v49 }
 0x465   :  { %5425 = vmatpush3.bf16.msra.mxu0 %v6835_v62 }
 0x466   :  { %5426 = vmatprep.subr.bf16.mxu0 %v6333_v49 }
 0x469   :  { %5428 = vmatpush3.bf16.msra.mxu0 %v6850_v51 }
 0x51f   :  { %v1025_v6 = vpop.f32.mrb[14].mxu0 }
 0x520   :  { %v4498_v10 = vpop.f32.mrb[15].mxu0  ;;  %4532 = vmatmul.mubr.f32.vlgmr.msra.gmra.mrb[4].mxu1 %v1025_v6  ;;  %v3894_v6 = vld [vmem:[#allocation11] ss:$0 sm:$0xff] }
 0x521   :  { %5432 = vmatpush3.bf16.msra.mxu1 %v5429_v38  ;;  %4601 = vmatprep.mubr.f32.mxu1 %v954_v29  ;;  %v1231_v38 = vld [vmem:[#allocation10 + $0x68] sm:$0xff] }
 0x522   :  { %5434 = vmatprep.subr.bf16.mxu1 %v5433_v3  ;;  %v5453_v29 = vpack.c.bf16 %v1231_v38, %v1230_v43  ;;  %v1478_v43 = vld [vmem:[#allocation16 + $0xb0] sm:$0xff]  ;;  %v1479_v38 = vld [vmem:[#allocation16 + $0xb8] sm:$0xff] }
 0x525   :  { %5436 = vmatpush3.bf16.msra.mxu1 %v5433_v3 }
 0x526   :  { %5438 = vmatprep.subr.bf16.mxu1 %v5437_v14 }
 0x529   :  { %5440 = vmatpush3.bf16.msra.mxu1 %v5437_v14  ;;  %v1472_v14 = vld [vmem:[#allocation16 + $0x80] sm:$0xff] }
 0x52a   :  { %5442 = vmatprep.subr.bf16.mxu1 %v5441_v24  ;;  %v5465_v30 = vpack.c.bf16 %v1473_v15, %v1472_v14  ;;  %v1577_v14 = vld [vmem:[#allocation17 + $0x98] sm:$0xff] }
 0x52d   :  { %5444 = vmatpush3.bf16.msra.mxu1 %v5441_v24 }
 0x52e   :  { %5446 = vmatprep.subr.bf16.mxu1 %v5445_v36 }
 0x531   :  { %5448 = vmatpush3.bf16.msra.mxu1 %v5445_v36  ;;  %v1475_v36 = vld [vmem:[#allocation16 + $0x98] sm:$0xff] }
 0x532   :  { %5450 = vmatprep.subr.bf16.mxu1 %v5449_v41  ;;  %v5469_v39 = vpack.c.bf16 %v1475_v36, %v1474_v33  ;;  %v1580_v33 = vld [vmem:[#allocation17 + $0xb0] sm:$0xff]  ;;  %v1581_v36 = vld [vmem:[#allocation17 + $0xb8] sm:$0xff] }
 0x535   :  { %5452 = vmatpush3.bf16.msra.mxu1 %v5449_v41  ;;  %v1477_v41 = vld [vmem:[#allocation16 + $0xa8] sm:$0xff] }
 0x536   :  { %5454 = vmatprep.subr.bf16.mxu1 %v5453_v29 }
 0x539   :  { %5456 = vmatpush3.bf16.msra.mxu1 %v5453_v29  ;;  %v5477_v29 = vpack.c.bf16 %v1479_v38, %v1478_v43  ;;  %v1584_v43 = vld [vmem:[#allocation17 + $0xd0] sm:$0xff]  ;;  %v1585_v38 = vld [vmem:[#allocation17 + $0xd8] sm:$0xff] }
 0x53a   :  { %5458 = vmatprep.subr.bf16.mxu1 %v5457_v47 }
 0x53d   :  { %5460 = vmatpush3.bf16.msra.mxu1 %v5457_v47  ;;  %v5481_v47 = vpack.c.bf16 %v1481_v46, %v1480_v45  ;;  %v1586_v45 = vld [vmem:[#allocation17 + $0xe0] sm:$0xff]  ;;  %v1587_v46 = vld [vmem:[#allocation17 + $0xe8] sm:$0xff] }
 0x540   :  { %4602 = vmatmul.mubr.f32.vlgmr.msra.gmra.mrb[6].mxu1 %v955_v26 }
 0x541   :  { %4606 = vmatprep.mubr.msk.f32.mxu1 %vm586_vm1, %v6594_v4 }
 0x5f3   :  { %v1118_v26 = vpop.f32.mrb[4].mxu1 }
 0x5f4   :  { %v1119_v4 = vadd.f32 %v6856_v16, %v1118_v26  ;;  %v4533_v54 = vpop.f32.mrb[5].mxu1  ;;  %v5485_v26 = vpack.c.bf16 %v1483_v50, %v1482_v17  ;;  %v232_v17 = vsub.s32 1, %v6653_v21 }
 0x5f5   :  { %v1485_v54 = vld [vmem:[#allocation16 + $0xe8] sm:$0xff] }
 0x5f6   :  { %v1122_v56 = vmax.f32 %v1119_v4, 0.0  ;;  %v1484_v4 = vld [vmem:[#allocation16 + $0xe0] sm:$0xff]  ;;  %v233_v50 = vrot.slane %v6658_v25, %v232_v17 }
 0x5f7   :  { %v1892_v17 = vld [vmem:[#allocation10 + $0x98] sm:$0xff] }
 0x5f8   :  { %4567 = vmatmul.mubr.f32.vlgmr.msra.gmra.mrb[16].mxu0 %v1122_v56  ;;  %v5489_v56 = vpack.c.bf16 %v1485_v54, %v1484_v4  ;;  %v252_v4 = vmul.f32 %v233_v50, %v6655_v23 }
 0x5f9   :  { %4613 = vmatprep.mubr.msk.f32.mxu0 %vm674_vm2, %v6623_v13 }
 0x6cb   :  { %v1212_v60 = vpop.f32.mrb[16].mxu0 }
 0x6cc   :  { %v1213_v63 = vadd.f32 %v6864_v59, %v1212_v60  ;;  %v4568_v2 = vpop.f32.mrb[17].mxu0  ;;  %v1486_v60 = vld [vmem:[#allocation16 + $0xf0] sm:$0xff] }
 0x6ce   :  { %v6867_v3 = vmax.f32 %v1213_v63, 0.0  ;;  %v1487_v63 = vld [vmem:[#allocation16 + $0xf8] sm:$0xff] }
 0x6cf   :  { %v5493_v2 = vpack.c.bf16 %v1487_v63, %v1486_v60 }
 0x6d0   :  { %4604 = vmatprep.subr.msk.mxu1 %vm593_vm4, %v6867_v3 }
 0x6d1   :  { %4605 = vmatpush3.msk.msra.mxu1 %vm593_vm4, %v6867_v3 }
 0x6d2   :  { %4607 = vmatmul.mubr.msk.f32.vlgmr.msra.gmra.mrb[6].mxu1 %vm586_vm1, %v6612_v11  ;;  %v5473_v11 = vpack.c.bf16 %v1477_v41, %v1476_v40  ;;  %v1582_v40 = vld [vmem:[#allocation17 + $0xc0] sm:$0xff]  ;;  %v1583_v41 = vld [vmem:[#allocation17 + $0xc8] sm:$0xff] }
 0x7a5   :  { %v4608_v7 = vpop.f32.mrb[6].mxu1 }
 0x7a6   :  { %v6013_v9 = vadd.f32 %v4608_v7, %v3894_v6  ;;  %v1385_v10 = vpop.f32.mrb[7].mxu1  ;;  %v1575_v7 = vld [vmem:[#allocation17 + $0x88] sm:$0xff] }
 0x7a7   :  { %v6014_v19 = vadd.f32 %v3894_v6, %v1385_v10  ;;  %v1574_v6 = vld [vmem:[#allocation17 + $0x80] sm:$0xff] }
 0x7a8   :  { %v5497_v10 = vpack.c.bf16 %v1575_v7, %v1574_v6  ;;  %v1588_v7 = vld [vmem:[#allocation17 + $0xf0] sm:$0xff] }
 0x7a9   :  { %v5461_v24 = vpack.c.bf16 %v6013_v9, %v6014_v19  ;;  %v1576_v9 = vld [vmem:[#allocation17 + $0x90] sm:$0xff]  ;;  %v1578_v19 = vld [vmem:[#allocation17 + $0xa0] sm:$0xff] }
 0x7aa   :  { %v5501_v15 = vpack.c.bf16 %v1577_v14, %v1576_v9  ;;  %5498 = vmatprep.subr.bf16.mxu1 %v5497_v10  ;;  %v1589_v9 = vld [vmem:[#allocation17 + $0xf8] sm:$0xff] }
 0x7ab   :  { %5462 = vmatprep.subr.bf16.mxu0 %v5461_v24  ;;  %5500 = vmatpush3.bf16.msra.mxu1 %v5497_v10  ;;  %v5525_v10 = vpack.c.bf16 %v1589_v9, %v1588_v7  ;;  %v1897_v7 = vld [vmem:[#allocation10 + $0xc0] sm:$0xff]  ;;  %v1898_v9 = vld [vmem:[#allocation10 + $0xc8] sm:$0xff] }
 0x7ac   :  { %5464 = vmatpush3.bf16.msra.mxu0 %v5461_v24  ;;  %v1579_v24 = vld [vmem:[#allocation17 + $0xa8] sm:$0xff]  ;;  %5502 = vmatprep.subr.bf16.mxu1 %v5501_v15 }
 0x7ad   :  { %5466 = vmatprep.subr.bf16.mxu0 %v5465_v30 }
 0x7af   :  { %4614 = vmatmul.mubr.msk.f32.vlgmr.msra.gmra.mrb[18].mxu0 %vm674_vm2, %v6645_v34  ;;  %5504 = vmatpush3.bf16.msra.mxu1 %v5501_v15 }
 0x7b0   :  { %5468 = vmatpush3.bf16.msra.mxu0 %v5465_v30  ;;  %v5505_v30 = vpack.c.bf16 %v1579_v24, %v1578_v19 }
 0x7b1   :  { %5470 = vmatprep.subr.bf16.mxu0 %v5469_v39 }
 0x7b2   :  { %5506 = vmatprep.subr.bf16.mxu1 %v5505_v30 }
 0x7b3   :  { %5508 = vmatpush3.bf16.msra.mxu1 %v5505_v30 }
 0x7b4   :  { %5472 = vmatpush3.bf16.msra.mxu0 %v5469_v39  ;;  %v5509_v39 = vpack.c.bf16 %v1581_v36, %v1580_v33  ;;  %v3903_v33 = vld [vmem:[%s7229_s15 + $0x1] ss:$0 sm:$0xff] }
 0x7b5   :  { %5474 = vmatprep.subr.bf16.mxu0 %v5473_v11 }
 0x7b6   :  { %5510 = vmatprep.subr.bf16.mxu1 %v5509_v39 }
 0x7b7   :  { %5512 = vmatpush3.bf16.msra.mxu1 %v5509_v39 }
 0x7b8   :  { %5476 = vmatpush3.bf16.msra.mxu0 %v5473_v11  ;;  %v5513_v11 = vpack.c.bf16 %v1583_v41, %v1582_v40 }
 0x7b9   :  { %5478 = vmatprep.subr.bf16.mxu0 %v5477_v29 }
 0x7ba   :  { %5514 = vmatprep.subr.bf16.mxu1 %v5513_v11 }
 0x7bb   :  { %5516 = vmatpush3.bf16.msra.mxu1 %v5513_v11 }
 0x7bc   :  { %5480 = vmatpush3.bf16.msra.mxu0 %v5477_v29  ;;  %v5517_v29 = vpack.c.bf16 %v1585_v38, %v1584_v43 }
 0x7bd   :  { %5482 = vmatprep.subr.bf16.mxu0 %v5481_v47 }
 0x7be   :  { %5518 = vmatprep.subr.bf16.mxu1 %v5517_v29 }
 0x7bf   :  { %5520 = vmatpush3.bf16.msra.mxu1 %v5517_v29  ;;  %v1889_v29 = vld [vmem:[#allocation10 + $0x80] sm:$0xff] }
 0x7c0   :  { %5484 = vmatpush3.bf16.msra.mxu0 %v5481_v47  ;;  %v5521_v47 = vpack.c.bf16 %v1587_v46, %v1586_v45  ;;  %v1890_v45 = vld [vmem:[#allocation10 + $0x88] sm:$0xff] }
 0x7c1   :  { %5486 = vmatprep.subr.bf16.mxu0 %v5485_v26  ;;  %v5580_v46 = vpack.c.bf16 %v1890_v45, %v1889_v29 }
 0x7c2   :  { %5522 = vmatprep.subr.bf16.mxu1 %v5521_v47 }
 0x7c3   :  { %5524 = vmatpush3.bf16.msra.mxu1 %v5521_v47  ;;  %v1891_v47 = vld [vmem:[#allocation10 + $0x90] sm:$0xff] }
 0x7c4   :  { %5488 = vmatpush3.bf16.msra.mxu0 %v5485_v26  ;;  %v257_v26 = vmul.f32 %v233_v50, %v6661_v27  ;;  %5526 = vmatprep.subr.bf16.mxu1 %v5525_v10  ;;  %v5584_v50 = vpack.c.bf16 %v1892_v17, %v1891_v47  ;;  %v6958_v17 = vld [vmem:[%s7255_s9 + $0x8] sm:$0xff] }
 0x7c5   :  { %5490 = vmatprep.subr.bf16.mxu0 %v5489_v56 }
 0x7c6   :  { %v343_v54 = vadd.f32 %v6639_v22, %v257_v26 }
 0x7c7   :  { %5528 = vmatpush3.bf16.msra.mxu1 %v5525_v10  ;;  %v5596_v10 = vpack.c.bf16 %v1898_v9, %v1897_v7  ;;  %v2148_v9 = vld [vmem:[#allocation16 + $0x120] sm:$0xff] }
 0x7c8   :  { %5492 = vmatpush3.bf16.msra.mxu0 %v5489_v56  ;;  %v337_v56 = vadd.f32 %v6635_v18, %v252_v4  ;;  %5556 = vmatprep.subr.bf16.mxu1 %v6333_v49  ;;  %v3901_v18 = vld [vmem:[%s7227_s13 + $0x1] ss:$0 sm:$0xff]  ;;  %v1893_v4 = vld [vmem:[#allocation10 + $0xa0] sm:$0xff] }
 0x7c9   :  { %5494 = vmatprep.subr.bf16.mxu0 %v5493_v2 }
 0x7cc   :  { %5496 = vmatpush3.bf16.msra.mxu0 %v5493_v2 }
 0x7cd   :  { %5529 = vmatprep.subr.bf16.mxu0 %v6333_v49 }
 0x882   :  { %v4615_v60 = vpop.f32.mrb[18].mxu0 }
 0x883   :  { %v1468_v63 = vadd.f32 %v4615_v60, %v343_v54  ;;  %v1462_v2 = vpop.f32.mrb[19].mxu0  ;;  %v1894_v54 = vld [vmem:[#allocation10 + $0xa8] sm:$0xff] }
 0x884   :  { %v1463_v6 = vadd.f32 %v1462_v2, %v337_v56  ;;  %v5588_v60 = vpack.c.bf16 %v1894_v54, %v1893_v4  ;;  %v1896_v2 = vld [vmem:[#allocation10 + $0xb8] sm:$0xff] }
 0x885   :  { %v2145_v54 = vld [vmem:[#allocation16 + $0x108] sm:$0xff] }
 0x886   :  { %4648 = vmatprep.mubr.f32.mxu0 %v1463_v6 }
 0x887   :  { %4649 = vmatmul.mubr.f32.vlgmr.msra.gmra.mrb[20].mxu0 %v1468_v63  ;;  %v1895_v63 = vld [vmem:[#allocation10 + $0xb0] sm:$0xff] }
 0x888   :  { %4690 = vmatprep.mubr.msk.f32.mxu0 %vm6334_vm3, %v6331_v0  ;;  %v5592_v6 = vpack.c.bf16 %v1896_v2, %v1895_v63  ;;  %v2146_v2 = vld [vmem:[#allocation16 + $0x110] sm:$0xff] }
 0x95a   :  { %v4650_v22 = vpop.f32.mrb[20].mxu0 }
 0x95b   :  { %v1568_v14 = vadd.f32 %v4650_v22, %v3901_v18  ;;  %v1562_v15 = vpop.f32.mrb[21].mxu0  ;;  %v1900_v22 = vld [vmem:[#allocation10 + $0xd8] sm:$0xff] }
 0x95c   :  { %v1563_v19 = vadd.f32 %v3901_v18, %v1562_v15  ;;  %v1899_v18 = vld [vmem:[#allocation10 + $0xd0] sm:$0xff]  ;;  %v1901_v15 = vld [vmem:[#allocation10 + $0xe0] sm:$0xff] }
 0x95d   :  { %v1572_v30 = vmax.f32 %v1568_v14, 0.0  ;;  %v5600_v14 = vpack.c.bf16 %v1900_v22, %v1899_v18  ;;  %v2150_v22 = vld [vmem:[#allocation16 + $0x130] sm:$0xff] }
 0x95e   :  { %v1571_v24 = vmax.f32 %v1563_v19, 0.0  ;;  %v1902_v19 = vld [vmem:[#allocation10 + $0xe8] sm:$0xff] }
 0x960   :  { %4683 = vmatprep.mubr.f32.mxu1 %v1571_v24  ;;  %v5604_v24 = vpack.c.bf16 %v1902_v19, %v1901_v15  ;;  %v2152_v19 = vld [vmem:[#allocation16 + $0x140] sm:$0xff] }
 0x961   :  { %4684 = vmatmul.mubr.f32.vlgmr.msra.gmra.mrb[8].mxu1 %v1572_v30  ;;  %v1903_v30 = vld [vmem:[#allocation10 + $0xf0] sm:$0xff] }
 0x962   :  { %5558 = vmatpush3.bf16.msra.mxu1 %v6779_v42  ;;  %4760 = vmatprep.mubr.msk.f32.mxu1 %vm6334_vm3, %v6331_v0 }
 0x963   :  { %5559 = vmatprep.subr.bf16.mxu1 %v6333_v49 }
 0x966   :  { %5561 = vmatpush3.bf16.msra.mxu1 %v6785_v44 }
 0x967   :  { %5562 = vmatprep.subr.bf16.mxu1 %v6333_v49 }
 0x96a   :  { %5564 = vmatpush3.bf16.msra.mxu1 %v6795_v20 }
 0x96b   :  { %5565 = vmatprep.subr.bf16.mxu1 %v6333_v49 }
 0x96e   :  { %5567 = vmatpush3.bf16.msra.mxu1 %v6805_v48 }
 0x96f   :  { %5568 = vmatprep.subr.bf16.mxu1 %v6333_v49 }
 0x972   :  { %5570 = vmatpush3.bf16.msra.mxu1 %v6815_v52 }
 0x973   :  { %5571 = vmatprep.subr.bf16.mxu1 %v6333_v49 }
 0x976   :  { %5573 = vmatpush3.bf16.msra.mxu1 %v6825_v57 }
 0x977   :  { %5574 = vmatprep.subr.bf16.mxu1 %v6333_v49 }
 0x97a   :  { %5576 = vmatpush3.bf16.msra.mxu1 %v6835_v62 }
 0x97b   :  { %5577 = vmatprep.subr.bf16.mxu1 %v6333_v49 }
 0x97e   :  { %5579 = vmatpush3.bf16.msra.mxu1 %v6850_v51 }
 0xa34   :  { %v4685_v36 = vpop.f32.mrb[8].mxu1 }
 0xa35   :  { %v6910_v39 = vadd.f32 %v4685_v36, %v3903_v33  ;;  %v1664_v40 = vpop.f32.mrb[9].mxu1 }
 0xa36   :  { %v1665_v41 = vadd.f32 %v3903_v33, %v1664_v40  ;;  %v1904_v33 = vld [vmem:[#allocation10 + $0xf8] sm:$0xff] }
 0xa37   :  { %v1674_v11 = vmax.f32 %v6910_v39, 0.0  ;;  %v5608_v36 = vpack.c.bf16 %v1904_v33, %v1903_v30  ;;  %v6940_v40 = vld [vmem:[%s7255_s9] sm:$0xff]  ;;  %v2154_v33 = vld [vmem:[#allocation16 + $0x150] sm:$0xff] }
 0xa38   :  { %v1673_v43 = vmax.f32 %v1665_v41, 0.0 }
 0xa3a   :  { %v5530_v38 = vpack.c.bf16 %v1674_v11, %v1673_v43 }
 0xa3c   :  { %5531 = vmatpush3.bf16.msra.mxu0 %v5530_v38 }
 0xa3d   :  { %5532 = vmatprep.subr.bf16.mxu0 %v6333_v49 }
 0xa3f   :  { %4691 = vmatmul.mubr.msk.f32.vlgmr.msra.gmra.mrb[22].mxu0 %vm674_vm2, %v6763_v32 }
 0xa40   :  { %5534 = vmatpush3.bf16.msra.mxu0 %v6685_v53  ;;  %4725 = vmatprep.mubr.msk.f32.mxu0 %vm6334_vm3, %v6331_v0 }
 0xa41   :  { %5535 = vmatprep.subr.bf16.mxu0 %v6333_v49 }
 0xa44   :  { %5537 = vmatpush3.bf16.msra.mxu0 %v6691_v55 }
 0xa45   :  { %5538 = vmatprep.subr.bf16.mxu0 %v6333_v49 }
 0xa48   :  { %5540 = vmatpush3.bf16.msra.mxu0 %v6701_v58 }
 0xa49   :  { %5541 = vmatprep.subr.bf16.mxu0 %v6333_v49 }
 0xa4c   :  { %5543 = vmatpush3.bf16.msra.mxu0 %v6711_v61 }
 0xa4d   :  { %5544 = vmatprep.subr.bf16.mxu0 %v6333_v49 }
 0xa50   :  { %5546 = vmatpush3.bf16.msra.mxu0 %v6721_v1 }
 0xa51   :  { %5547 = vmatprep.subr.bf16.mxu0 %v6333_v49 }
 0xa54   :  { %5549 = vmatpush3.bf16.msra.mxu0 %v6731_v5 }
 0xa55   :  { %5550 = vmatprep.subr.bf16.mxu0 %v6333_v49 }
 0xa58   :  { %5552 = vmatpush3.bf16.msra.mxu0 %v6741_v8 }
 0xa59   :  { %5553 = vmatprep.subr.bf16.mxu0 %v6333_v49 }
 0xa5c   :  { %5555 = vmatpush3.bf16.msra.mxu0 %v6751_v12 }
 0xa5d   :  { %5581 = vmatprep.subr.bf16.mxu0 %v5580_v46 }
 0xb12   :  { %v1741_v26 = vpop.f32.mrb[22].mxu0 }
 0xb13   :  { %v4692_v56 = vpop.f32.mrb[23].mxu0  ;;  %4726 = vmatmul.mubr.f32.vlgmr.msra.gmra.mrb[24].mxu0 %v1741_v26 }
 0xb14   :  { %5583 = vmatpush3.bf16.msra.mxu0 %v5580_v46  ;;  %4795 = vmatprep.mubr.f32.mxu0 %v1673_v43 }
 0xb15   :  { %5585 = vmatprep.subr.bf16.mxu0 %v5584_v50 }
 0xb18   :  { %5587 = vmatpush3.bf16.msra.mxu0 %v5584_v50 }
 0xb19   :  { %5589 = vmatprep.subr.bf16.mxu0 %v5588_v60 }
 0xb1c   :  { %5591 = vmatpush3.bf16.msra.mxu0 %v5588_v60 }
 0xb1d   :  { %5593 = vmatprep.subr.bf16.mxu0 %v5592_v6 }
 0xb20   :  { %5595 = vmatpush3.bf16.msra.mxu0 %v5592_v6  ;;  %v2147_v6 = vld [vmem:[#allocation16 + $0x118] sm:$0xff] }
 0xb21   :  { %5597 = vmatprep.subr.bf16.mxu0 %v5596_v10  ;;  %v5620_v7 = vpack.c.bf16 %v2147_v6, %v2146_v2  ;;  %v2254_v6 = vld [vmem:[#allocation17 + $0x140] sm:$0xff] }
 0xb24   :  { %5599 = vmatpush3.bf16.msra.mxu0 %v5596_v10  ;;  %v2149_v10 = vld [vmem:[#allocation16 + $0x128] sm:$0xff] }
 0xb25   :  { %5601 = vmatprep.subr.bf16.mxu0 %v5600_v14  ;;  %v5624_v18 = vpack.c.bf16 %v2149_v10, %v2148_v9  ;;  %v2256_v10 = vld [vmem:[#allocation17 + $0x150] sm:$0xff] }
 0xb28   :  { %5603 = vmatpush3.bf16.msra.mxu0 %v5600_v14  ;;  %v2151_v14 = vld [vmem:[#allocation16 + $0x138] sm:$0xff] }
 0xb29   :  { %5605 = vmatprep.subr.bf16.mxu0 %v5604_v24  ;;  %v5628_v15 = vpack.c.bf16 %v2151_v14, %v2150_v22  ;;  %v2258_v14 = vld [vmem:[#allocation17 + $0x160] sm:$0xff] }
 0xb2c   :  { %5607 = vmatpush3.bf16.msra.mxu0 %v5604_v24  ;;  %v2153_v24 = vld [vmem:[#allocation16 + $0x148] sm:$0xff] }
 0xb2d   :  { %5609 = vmatprep.subr.bf16.mxu0 %v5608_v36  ;;  %v5632_v30 = vpack.c.bf16 %v2153_v24, %v2152_v19  ;;  %v236_v24 = vsub.s32 2, %v6653_v21 }
 0xb30   :  { %5611 = vmatpush3.bf16.msra.mxu0 %v5608_v36  ;;  %v2155_v36 = vld [vmem:[#allocation16 + $0x158] sm:$0xff] }
 0xb33   :  { %4796 = vmatmul.mubr.f32.vlgmr.msra.gmra.mrb[26].mxu0 %v1674_v11 }
 0xb34   :  { %4800 = vmatprep.mubr.msk.f32.mxu0 %vm586_vm1, %v6940_v40 }
 0xbe6   :  { %v1811_v41 = vpop.f32.mrb[24].mxu0 }
 0xbe7   :  { %v1812_v43 = vadd.f32 %v6856_v16, %v1811_v41  ;;  %v4727_v38 = vpop.f32.mrb[25].mxu0  ;;  %v5636_v41 = vpack.c.bf16 %v2155_v36, %v2154_v33 }
 0xbe9   :  { %v1815_v29 = vmax.f32 %v1812_v43, 0.0  ;;  %v2156_v43 = vld [vmem:[#allocation16 + $0x160] sm:$0xff] }
 0xbeb   :  { %4761 = vmatmul.mubr.f32.vlgmr.msra.gmra.mrb[10].mxu1 %v1815_v29  ;;  %v2158_v29 = vld [vmem:[#allocation16 + $0x170] sm:$0xff] }
 0xbec   :  { %4807 = vmatprep.mubr.msk.f32.mxu1 %vm674_vm2, %v6623_v13  ;;  %v3905_v13 = vld [vmem:[#allocation11 + $0x1] ss:$0 sm:$0xff] }
 0xcbe   :  { %v1882_v45 = vpop.f32.mrb[10].mxu1 }
 0xcbf   :  { %v1883_v39 = vadd.f32 %v6864_v59, %v1882_v45  ;;  %v4762_v11 = vpop.f32.mrb[11].mxu1  ;;  %v2159_v45 = vld [vmem:[#allocation16 + $0x178] sm:$0xff] }
 0xcc0   :  { %v2246_v11 = vld [vmem:[#allocation17 + $0x100] sm:$0xff] }
 0xcc1   :  { %v1886_v46 = vmax.f32 %v1883_v39, 0.0  ;;  %v5644_v39 = vpack.c.bf16 %v2159_v45, %v2158_v29 }
 0xcc3   :  { %v6949_v47 = vadd.f32 %v1886_v46, %v6867_v3  ;;  %v2144_v3 = vld [vmem:[#allocation16 + $0x100] sm:$0xff]  ;;  %v2247_v46 = vld [vmem:[#allocation17 + $0x108] sm:$0xff] }
 0xcc4   :  { %v5616_v63 = vpack.c.bf16 %v2145_v54, %v2144_v3  ;;  %v2250_v3 = vld [vmem:[#allocation17 + $0x120] sm:$0xff]  ;;  %v2251_v54 = vld [vmem:[#allocation17 + $0x128] sm:$0xff] }
 0xcc5   :  { %4798 = vmatprep.subr.msk.mxu0 %vm593_vm4, %v6949_v47 }
 0xcc6   :  { %4799 = vmatpush3.msk.msra.mxu0 %vm593_vm4, %v6949_v47 }
 0xcc7   :  { %4801 = vmatmul.mubr.msk.f32.vlgmr.msra.gmra.mrb[26].mxu0 %vm586_vm1, %v6958_v17 }
 0xd9a   :  { %v4802_v50 = vpop.f32.mrb[26].mxu0 }
 0xd9b   :  { %v6015_v26 = vadd.f32 %v4802_v50, %v3905_v13  ;;  %v2057_v4 = vpop.f32.mrb[27].mxu0  ;;  %v5648_v50 = vpack.c.bf16 %v2247_v46, %v2246_v11  ;;  %v2261_v11 = vld [vmem:[#allocation17 + $0x178] sm:$0xff] }
 0xd9c   :  { %v6016_v56 = vadd.f32 %v3905_v13, %v2057_v4  ;;  %v2248_v13 = vld [vmem:[#allocation17 + $0x110] sm:$0xff] }
 0xd9d   :  { %5649 = vmatprep.subr.bf16.mxu0 %v5648_v50 }
 0xd9e   :  { %v5612_v60 = vpack.c.bf16 %v6015_v26, %v6016_v56  ;;  %v2249_v26 = vld [vmem:[#allocation17 + $0x118] sm:$0xff]  ;;  %5651 = vmatpush3.bf16.msra.mxu0 %v5648_v50  ;;  %v5656_v56 = vpack.c.bf16 %v2251_v54, %v2250_v3  ;;  %v3914_v3 = vld [vmem:[%s7229_s15 + $0x2] ss:$0 sm:$0xff] }
 0xd9f   :  { %v5652_v4 = vpack.c.bf16 %v2249_v26, %v2248_v13 }
 0xda0   :  { %5613 = vmatprep.subr.bf16.mxu1 %v5612_v60 }
 0xda1   :  { %5615 = vmatpush3.bf16.msra.mxu1 %v5612_v60  ;;  %5653 = vmatprep.subr.bf16.mxu0 %v5652_v4  ;;  %v2252_v60 = vld [vmem:[#allocation17 + $0x130] sm:$0xff] }
 0xda2   :  { %5617 = vmatprep.subr.bf16.mxu1 %v5616_v63  ;;  %5655 = vmatpush3.bf16.msra.mxu0 %v5652_v4 }
 0xda3   :  { %5657 = vmatprep.subr.bf16.mxu0 %v5656_v56 }
 0xda4   :  { %4808 = vmatmul.mubr.msk.f32.vlgmr.msra.gmra.mrb[12].mxu1 %vm674_vm2, %v6645_v34  ;;  %v2157_v34 = vld [vmem:[#allocation16 + $0x168] sm:$0xff] }
 0xda5   :  { %5619 = vmatpush3.bf16.msra.mxu1 %v5616_v63  ;;  %v5640_v38 = vpack.c.bf16 %v2157_v34, %v2156_v43  ;;  %v2253_v63 = vld [vmem:[#allocation17 + $0x138] sm:$0xff] }
 0xda6   :  { %5621 = vmatprep.subr.bf16.mxu1 %v5620_v7  ;;  %v5660_v2 = vpack.c.bf16 %v2253_v63, %v2252_v60  ;;  %5659 = vmatpush3.bf16.msra.mxu0 %v5656_v56 }
 0xda8   :  { %5661 = vmatprep.subr.bf16.mxu0 %v5660_v2 }
 0xda9   :  { %5623 = vmatpush3.bf16.msra.mxu1 %v5620_v7  ;;  %v2255_v7 = vld [vmem:[#allocation17 + $0x148] sm:$0xff] }
 0xdaa   :  { %5625 = vmatprep.subr.bf16.mxu1 %v5624_v18  ;;  %v5664_v9 = vpack.c.bf16 %v2255_v7, %v2254_v6  ;;  %5663 = vmatpush3.bf16.msra.mxu0 %v5660_v2 }
 0xdac   :  { %5665 = vmatprep.subr.bf16.mxu0 %v5664_v9 }
 0xdad   :  { %5627 = vmatpush3.bf16.msra.mxu1 %v5624_v18  ;;  %v2257_v18 = vld [vmem:[#allocation17 + $0x158] sm:$0xff] }
 0xdae   :  { %5629 = vmatprep.subr.bf16.mxu1 %v5628_v15  ;;  %v5668_v22 = vpack.c.bf16 %v2257_v18, %v2256_v10  ;;  %5667 = vmatpush3.bf16.msra.mxu0 %v5664_v9  ;;  %v2562_v9 = vld [vmem:[#allocation10 + $0x108] sm:$0xff]  ;;  %v2563_v18 = vld [vmem:[#allocation10 + $0x110] sm:$0xff] }
 0xdb0   :  { %5669 = vmatprep.subr.bf16.mxu0 %v5668_v22 }
 0xdb1   :  { %5631 = vmatpush3.bf16.msra.mxu1 %v5628_v15  ;;  %v2259_v15 = vld [vmem:[#allocation17 + $0x168] sm:$0xff] }
 0xdb2   :  { %5633 = vmatprep.subr.bf16.mxu1 %v5632_v30  ;;  %v5672_v19 = vpack.c.bf16 %v2259_v15, %v2258_v14  ;;  %5671 = vmatpush3.bf16.msra.mxu0 %v5668_v22  ;;  %v2564_v22 = vld [vmem:[#allocation10 + $0x118] sm:$0xff] }
 0xdb3   :  { %v5735_v14 = vpack.c.bf16 %v2564_v22, %v2563_v18  ;;  %v2816_v18 = vld [vmem:[#allocation16 + $0x180] sm:$0xff] }
 0xdb4   :  { %5673 = vmatprep.subr.bf16.mxu0 %v5672_v19 }
 0xdb5   :  { %5635 = vmatpush3.bf16.msra.mxu1 %v5632_v30  ;;  %v237_v30 = vrot.slane %v6658_v25, %v236_v24  ;;  %v2566_v24 = vld [vmem:[#allocation10 + $0x128] sm:$0xff] }
 0xdb6   :  { %5637 = vmatprep.subr.bf16.mxu1 %v5636_v41  ;;  %5675 = vmatpush3.bf16.msra.mxu0 %v5672_v19  ;;  %v2565_v19 = vld [vmem:[#allocation10 + $0x120] sm:$0xff] }
 0xdb7   :  { %v258_v33 = vmul.f32 %v237_v30, %v6661_v27  ;;  %v253_v36 = vmul.f32 %v237_v30, %v6655_v23 }
 0xdb9   :  { %5639 = vmatpush3.bf16.msra.mxu1 %v5636_v41  ;;  %v418_v41 = vadd.f32 %v6647_v35, %v258_v33  ;;  %v412_v43 = vadd.f32 %v6641_v28, %v253_v36  ;;  %v3912_v28 = vld [vmem:[%s7227_s13 + $0x2] ss:$0 sm:$0xff]  ;;  %v5739_v33 = vpack.c.bf16 %v2566_v24, %v2565_v19  ;;  %v2819_v19 = vld [vmem:[#allocation16 + $0x198] sm:$0xff] }
 0xdba   :  { %5641 = vmatprep.subr.bf16.mxu1 %v5640_v38  ;;  %v2567_v36 = vld [vmem:[#allocation10 + $0x130] sm:$0xff] }
 0xdbd   :  { %5643 = vmatpush3.bf16.msra.mxu1 %v5640_v38 }
 0xdbe   :  { %5645 = vmatprep.subr.bf16.mxu1 %v5644_v39 }
 0xdc1   :  { %5647 = vmatpush3.bf16.msra.mxu1 %v5644_v39  ;;  %v2260_v39 = vld [vmem:[#allocation17 + $0x170] sm:$0xff] }
 0xdc2   :  { %5680 = vmatprep.subr.bf16.mxu1 %v6333_v49  ;;  %v5676_v25 = vpack.c.bf16 %v2261_v11, %v2260_v39  ;;  %v2572_v39 = vld [vmem:[#allocation10 + $0x158] sm:$0xff] }
 0xdc4   :  { %5677 = vmatprep.subr.bf16.mxu0 %v5676_v25 }
 0xdc5   :  { %5679 = vmatpush3.bf16.msra.mxu0 %v5676_v25  ;;  %v2573_v25 = vld [vmem:[#allocation10 + $0x160] sm:$0xff] }
 0xdc6   :  { %5707 = vmatprep.subr.bf16.mxu0 %v6333_v49 }
 0xe77   :  { %v4809_v34 = vpop.f32.mrb[12].mxu1 }
 0xe78   :  { %v2140_v38 = vadd.f32 %v4809_v34, %v418_v41  ;;  %v2134_v29 = vpop.f32.mrb[13].mxu1  ;;  %v2568_v41 = vld [vmem:[#allocation10 + $0x138] sm:$0xff]  ;;  %v2569_v34 = vld [vmem:[#allocation10 + $0x140] sm:$0xff] }
 0xe79   :  { %v2135_v45 = vadd.f32 %v2134_v29, %v412_v43  ;;  %v5743_v43 = vpack.c.bf16 %v2568_v41, %v2567_v36  ;;  %v7041_v36 = vld [vmem:[#allocation2 + $0x8] sm:$0xff] }
 0xe7b   :  { %4842 = vmatprep.mubr.f32.mxu1 %v2135_v45  ;;  %v2571_v45 = vld [vmem:[#allocation10 + $0x150] sm:$0xff] }
 0xe7c   :  { %4843 = vmatmul.mubr.f32.vlgmr.msra.gmra.mrb[14].mxu1 %v2140_v38  ;;  %v2570_v38 = vld [vmem:[#allocation10 + $0x148] sm:$0xff]  ;;  %v5751_v11 = vpack.c.bf16 %v2572_v39, %v2571_v45  ;;  %v2825_v45 = vld [vmem:[#allocation16 + $0x1c8] sm:$0xff] }
 0xe7d   :  { %4884 = vmatprep.mubr.msk.f32.mxu1 %vm6334_vm3, %v6331_v0  ;;  %v5747_v29 = vpack.c.bf16 %v2570_v38, %v2569_v34  ;;  %v2823_v34 = vld [vmem:[#allocation16 + $0x1b8] sm:$0xff] }
 0xf4f   :  { %v4844_v35 = vpop.f32.mrb[14].mxu1 }
 0xf50   :  { %v2240_v46 = vadd.f32 %v4844_v35, %v3912_v28  ;;  %v2234_v13 = vpop.f32.mrb[15].mxu1 }
 0xf51   :  { %v2235_v50 = vadd.f32 %v3912_v28, %v2234_v13  ;;  %v2574_v28 = vld [vmem:[#allocation10 + $0x168] sm:$0xff]  ;;  %v2576_v13 = vld [vmem:[#allocation10 + $0x178] sm:$0xff] }
 0xf52   :  { %v2244_v4 = vmax.f32 %v2240_v46, 0.0  ;;  %v5755_v35 = vpack.c.bf16 %v2574_v28, %v2573_v25  ;;  %v2575_v46 = vld [vmem:[#allocation10 + $0x170] sm:$0xff] }
 0xf53   :  { %v2243_v26 = vmax.f32 %v2235_v50, 0.0  ;;  %v5759_v50 = vpack.c.bf16 %v2576_v13, %v2575_v46  ;;  %v2827_v25 = vld [vmem:[#allocation16 + $0x1d8] sm:$0xff]  ;;  %v2829_v46 = vld [vmem:[#allocation16 + $0x1e8] sm:$0xff] }
 0xf55   :  { %4877 = vmatprep.mubr.f32.mxu0 %v2243_v26 }
 0xf56   :  { %4878 = vmatmul.mubr.f32.vlgmr.msra.gmra.mrb[28].mxu0 %v2244_v4 }
 0xf57   :  { %5709 = vmatpush3.bf16.msra.mxu0 %v6779_v42  ;;  %4954 = vmatprep.mubr.msk.f32.mxu0 %vm6334_vm3, %v6331_v0 }
 0xf58   :  { %5710 = vmatprep.subr.bf16.mxu0 %v6333_v49 }
 0xf5b   :  { %5712 = vmatpush3.bf16.msra.mxu0 %v6785_v44 }
 0xf5c   :  { %5713 = vmatprep.subr.bf16.mxu0 %v6333_v49 }
 0xf5f   :  { %5715 = vmatpush3.bf16.msra.mxu0 %v6795_v20 }
 0xf60   :  { %5716 = vmatprep.subr.bf16.mxu0 %v6333_v49 }
 0xf63   :  { %5718 = vmatpush3.bf16.msra.mxu0 %v6805_v48 }
 0xf64   :  { %5719 = vmatprep.subr.bf16.mxu0 %v6333_v49 }
 0xf67   :  { %5721 = vmatpush3.bf16.msra.mxu0 %v6815_v52 }
 0xf68   :  { %5722 = vmatprep.subr.bf16.mxu0 %v6333_v49 }
 0xf6b   :  { %5724 = vmatpush3.bf16.msra.mxu0 %v6825_v57 }
 0xf6c   :  { %5725 = vmatprep.subr.bf16.mxu0 %v6333_v49 }
 0xf6f   :  { %5727 = vmatpush3.bf16.msra.mxu0 %v6835_v62 }
 0xf70   :  { %5728 = vmatprep.subr.bf16.mxu0 %v6333_v49 }
 0xf73   :  { %5730 = vmatpush3.bf16.msra.mxu0 %v6850_v51 }
0x1029   :  { %v4879_v54 = vpop.f32.mrb[28].mxu0 }
0x102a   :  { %v6997_v56 = vadd.f32 %v4879_v54, %v3914_v3  ;;  %v2336_v60 = vpop.f32.mrb[29].mxu0 }
0x102b   :  { %v2337_v63 = vadd.f32 %v3914_v3, %v2336_v60  ;;  %v7027_v60 = vld [vmem:[#allocation2] sm:$0xff] }
0x102c   :  { %v2346_v2 = vmax.f32 %v6997_v56, 0.0 }
0x102d   :  { %v2345_v6 = vmax.f32 %v2337_v63, 0.0 }
0x102f   :  { %v5681_v7 = vpack.c.bf16 %v2346_v2, %v2345_v6 }
0x1031   :  { %5682 = vmatpush3.bf16.msra.mxu1 %v5681_v7 }
0x1032   :  { %5683 = vmatprep.subr.bf16.mxu1 %v6333_v49 }
0x1034   :  { %4885 = vmatmul.mubr.msk.f32.vlgmr.msra.gmra.mrb[16].mxu1 %vm674_vm2, %v6763_v32  ;;  %v2561_v32 = vld [vmem:[#allocation10 + $0x100] sm:$0xff] }
0x1035   :  { %5685 = vmatpush3.bf16.msra.mxu1 %v6685_v53  ;;  %4919 = vmatprep.mubr.msk.f32.mxu1 %vm6334_vm3, %v6331_v0  ;;  %v5731_v10 = vpack.c.bf16 %v2562_v9, %v2561_v32 }
0x1036   :  { %5686 = vmatprep.subr.bf16.mxu1 %v6333_v49 }
0x1039   :  { %5688 = vmatpush3.bf16.msra.mxu1 %v6691_v55 }
0x103a   :  { %5689 = vmatprep.subr.bf16.mxu1 %v6333_v49 }
0x103d   :  { %5691 = vmatpush3.bf16.msra.mxu1 %v6701_v58 }
0x103e   :  { %5692 = vmatprep.subr.bf16.mxu1 %v6333_v49 }
0x1041   :  { %5694 = vmatpush3.bf16.msra.mxu1 %v6711_v61 }
0x1042   :  { %5695 = vmatprep.subr.bf16.mxu1 %v6333_v49 }
0x1045   :  { %5697 = vmatpush3.bf16.msra.mxu1 %v6721_v1 }
0x1046   :  { %5698 = vmatprep.subr.bf16.mxu1 %v6333_v49 }
0x1049   :  { %5700 = vmatpush3.bf16.msra.mxu1 %v6731_v5 }
0x104a   :  { %5701 = vmatprep.subr.bf16.mxu1 %v6333_v49 }
0x104d   :  { %5703 = vmatpush3.bf16.msra.mxu1 %v6741_v8 }
0x104e   :  { %5704 = vmatprep.subr.bf16.mxu1 %v6333_v49 }
0x1051   :  { %5706 = vmatpush3.bf16.msra.mxu1 %v6751_v12 }
0x1052   :  { %5732 = vmatprep.subr.bf16.mxu1 %v5731_v10 }
0x1107   :  { %v2413_v15 = vpop.f32.mrb[16].mxu1 }
0x1108   :  { %v4886_v30 = vpop.f32.mrb[17].mxu1  ;;  %4920 = vmatmul.mubr.f32.vlgmr.msra.gmra.mrb[18].mxu1 %v2413_v15 }
0x1109   :  { %5734 = vmatpush3.bf16.msra.mxu1 %v5731_v10  ;;  %4989 = vmatprep.mubr.f32.mxu1 %v2345_v6  ;;  %v2820_v30 = vld [vmem:[#allocation16 + $0x1a0] sm:$0xff] }
0x110a   :  { %5736 = vmatprep.subr.bf16.mxu1 %v5735_v14 }
0x110d   :  { %5738 = vmatpush3.bf16.msra.mxu1 %v5735_v14 }
0x110e   :  { %5740 = vmatprep.subr.bf16.mxu1 %v5739_v33 }
0x1111   :  { %5742 = vmatpush3.bf16.msra.mxu1 %v5739_v33  ;;  %v2821_v33 = vld [vmem:[#allocation16 + $0x1a8] sm:$0xff] }
0x1112   :  { %5744 = vmatprep.subr.bf16.mxu1 %v5743_v43  ;;  %v5775_v41 = vpack.c.bf16 %v2821_v33, %v2820_v30  ;;  %v2930_v30 = vld [vmem:[#allocation17 + $0x1e0] sm:$0xff]  ;;  %v2931_v33 = vld [vmem:[#allocation17 + $0x1e8] sm:$0xff] }
0x1115   :  { %5746 = vmatpush3.bf16.msra.mxu1 %v5743_v43  ;;  %v2822_v43 = vld [vmem:[#allocation16 + $0x1b0] sm:$0xff] }
0x1116   :  { %5748 = vmatprep.subr.bf16.mxu1 %v5747_v29  ;;  %v5779_v38 = vpack.c.bf16 %v2823_v34, %v2822_v43  ;;  %v240_v43 = vsub.s32 3, %v6653_v21  ;;  %v7047_v34 = vld [vmem:[#allocation14] sm:$0x1f] }
0x1119   :  { %5750 = vmatpush3.bf16.msra.mxu1 %v5747_v29  ;;  %v2824_v29 = vld [vmem:[#allocation16 + $0x1c0] sm:$0xff] }
0x111a   :  { %5752 = vmatprep.subr.bf16.mxu1 %v5751_v11  ;;  %v5783_v39 = vpack.c.bf16 %v2825_v45, %v2824_v29 }
0x111d   :  { %5754 = vmatpush3.bf16.msra.mxu1 %v5751_v11  ;;  %v2826_v11 = vld [vmem:[#allocation16 + $0x1d0] sm:$0xff] }
0x111e   :  { %5756 = vmatprep.subr.bf16.mxu1 %v5755_v35  ;;  %v5787_v28 = vpack.c.bf16 %v2827_v25, %v2826_v11 }
0x1121   :  { %5758 = vmatpush3.bf16.msra.mxu1 %v5755_v35  ;;  %v2828_v35 = vld [vmem:[#allocation16 + $0x1e0] sm:$0xff] }
0x1122   :  { %5760 = vmatprep.subr.bf16.mxu1 %v5759_v50  ;;  %v5791_v13 = vpack.c.bf16 %v2829_v46, %v2828_v35 }
0x1125   :  { %5762 = vmatpush3.bf16.msra.mxu1 %v5759_v50  ;;  %v2830_v50 = vld [vmem:[#allocation16 + $0x1f0] sm:$0xff] }
0x1128   :  { %4990 = vmatmul.mubr.f32.vlgmr.msra.gmra.mrb[20].mxu1 %v2346_v2 }
0x1129   :  { %4994 = vmatprep.mubr.msk.f32.mxu1 %vm586_vm1, %v6940_v40 }
0x11db   :  { %v2483_v26 = vpop.f32.mrb[18].mxu1 }
0x11dc   :  { %v2484_v4 = vadd.f32 %v6856_v16, %v2483_v26  ;;  %v4921_v3 = vpop.f32.mrb[19].mxu1  ;;  %v3916_v16 = vld [vmem:[#allocation11 + $0x2] ss:$0 sm:$0xff]  ;;  %v2831_v26 = vld [vmem:[#allocation16 + $0x1f8] sm:$0xff] }
0x11dd   :  { %v2918_v3 = vld [vmem:[#allocation17 + $0x180] sm:$0xff] }
0x11de   :  { %v2487_v54 = vmax.f32 %v2484_v4, 0.0  ;;  %v5795_v4 = vpack.c.bf16 %v2831_v26, %v2830_v50  ;;  %v2933_v50 = vld [vmem:[#allocation17 + $0x1f8] sm:$0xff] }
0x11e0   :  { %4955 = vmatmul.mubr.f32.vlgmr.msra.gmra.mrb[30].mxu0 %v2487_v54  ;;  %v2919_v54 = vld [vmem:[#allocation17 + $0x188] sm:$0xff] }
0x11e1   :  { %5001 = vmatprep.mubr.msk.f32.mxu0 %vm674_vm2, %v7027_v60 }
0x12b3   :  { %v2554_v63 = vpop.f32.mrb[30].mxu0 }
0x12b4   :  { %v2555_v6 = vadd.f32 %v6864_v59, %v2554_v63  ;;  %v4956_v7 = vpop.f32.mrb[31].mxu0  ;;  %v2817_v59 = vld [vmem:[#allocation16 + $0x188] sm:$0xff]  ;;  %v2920_v63 = vld [vmem:[#allocation17 + $0x190] sm:$0xff] }
0x12b5   :  { %v5767_v15 = vpack.c.bf16 %v2817_v59, %v2816_v18  ;;  %v2921_v7 = vld [vmem:[#allocation17 + $0x198] sm:$0xff] }
0x12b6   :  { %v2558_v56 = vmax.f32 %v2555_v6, 0.0  ;;  %v5799_v6 = vpack.c.bf16 %v2919_v54, %v2918_v3  ;;  %v2925_v18 = vld [vmem:[#allocation17 + $0x1b8] sm:$0xff] }
0x12b8   :  { %v7033_v2 = vadd.f32 %v2558_v56, %v6949_v47  ;;  %v2818_v47 = vld [vmem:[#allocation16 + $0x190] sm:$0xff]  ;;  %v5803_v56 = vpack.c.bf16 %v2921_v7, %v2920_v63 }
0x12b9   :  { %v5771_v24 = vpack.c.bf16 %v2819_v19, %v2818_v47  ;;  %v2928_v47 = vld [vmem:[#allocation17 + $0x1d0] sm:$0xff]  ;;  %v2929_v19 = vld [vmem:[#allocation17 + $0x1d8] sm:$0xff] }
0x12ba   :  { %4992 = vmatprep.subr.msk.mxu1 %vm593_vm4, %v7033_v2 }
0x12bb   :  { %4993 = vmatpush3.msk.msra.mxu1 %vm593_vm4, %v7033_v2 }
0x12bc   :  { %4995 = vmatmul.mubr.msk.f32.vlgmr.msra.gmra.mrb[20].mxu1 %vm586_vm1, %v6958_v17  ;;  %5800 = vmatprep.subr.bf16.mxu1 %v5799_v6 }
0x12bd   :  { %5802 = vmatpush3.bf16.msra.mxu1 %v5799_v6 }
0x12be   :  { %5804 = vmatprep.subr.bf16.mxu1 %v5803_v56 }
0x12c1   :  { %5806 = vmatpush3.bf16.msra.mxu1 %v5803_v56 }
0x138f   :  { %v4996_v32 = vpop.f32.mrb[20].mxu1 }
0x1390   :  { %v6017_v9 = vadd.f32 %v4996_v32, %v3916_v16  ;;  %v2729_v10 = vpop.f32.mrb[21].mxu1  ;;  %v2923_v32 = vld [vmem:[#allocation17 + $0x1a8] sm:$0xff] }
0x1391   :  { %v6018_v22 = vadd.f32 %v3916_v16, %v2729_v10  ;;  %v2922_v16 = vld [vmem:[#allocation17 + $0x1a0] sm:$0xff]  ;;  %v2924_v10 = vld [vmem:[#allocation17 + $0x1b0] sm:$0xff] }
0x1392   :  { %v5811_v59 = vpack.c.bf16 %v2925_v18, %v2924_v10  ;;  %v3240_v18 = vld [vmem:[#allocation10 + $0x1b8] sm:$0xff] }
0x1393   :  { %v5763_v14 = vpack.c.bf16 %v6017_v9, %v6018_v22  ;;  %v5807_v9 = vpack.c.bf16 %v2923_v32, %v2922_v16  ;;  %v2926_v22 = vld [vmem:[#allocation17 + $0x1c0] sm:$0xff]  ;;  %v3237_v32 = vld [vmem:[#allocation10 + $0x1a0] sm:$0xff] }
0x1395   :  { %5764 = vmatprep.subr.bf16.mxu0 %v5763_v14  ;;  %5808 = vmatprep.subr.bf16.mxu1 %v5807_v9 }
0x1396   :  { %5766 = vmatpush3.bf16.msra.mxu0 %v5763_v14  ;;  %v2927_v14 = vld [vmem:[#allocation17 + $0x1c8] sm:$0xff]  ;;  %5810 = vmatpush3.bf16.msra.mxu1 %v5807_v9  ;;  %v3238_v9 = vld [vmem:[#allocation10 + $0x1a8] sm:$0xff] }
0x1397   :  { %5768 = vmatprep.subr.bf16.mxu0 %v5767_v15  ;;  %5812 = vmatprep.subr.bf16.mxu1 %v5811_v59 }
0x1399   :  { %5002 = vmatmul.mubr.msk.f32.vlgmr.msra.gmra.mrb[32].mxu0 %vm674_vm2, %v7041_v36 }
0x139a   :  { %5770 = vmatpush3.bf16.msra.mxu0 %v5767_v15  ;;  %v5815_v15 = vpack.c.bf16 %v2927_v14, %v2926_v22  ;;  %5814 = vmatpush3.bf16.msra.mxu1 %v5811_v59  ;;  %v3241_v59 = vld [vmem:[#allocation10 + $0x1c0] sm:$0xff]  ;;  %v3242_v22 = vld [vmem:[#allocation10 + $0x1c8] sm:$0xff] }
0x139b   :  { %5772 = vmatprep.subr.bf16.mxu0 %v5771_v24  ;;  %v5898_v14 = vpack.c.bf16 %v3242_v22, %v3241_v59  ;;  %v3593_v22 = vld [vmem:[#allocation17 + $0x218] sm:$0xff] }
0x139c   :  { %5816 = vmatprep.subr.bf16.mxu1 %v5815_v15 }
0x139e   :  { %5774 = vmatpush3.bf16.msra.mxu0 %v5771_v24  ;;  %v5819_v24 = vpack.c.bf16 %v2929_v19, %v2928_v47  ;;  %5818 = vmatpush3.bf16.msra.mxu1 %v5815_v15  ;;  %v3243_v15 = vld [vmem:[#allocation10 + $0x1d0] sm:$0xff]  ;;  %v3244_v47 = vld [vmem:[#allocation10 + $0x1d8] sm:$0xff] }
0x139f   :  { %5776 = vmatprep.subr.bf16.mxu0 %v5775_v41  ;;  %v5902_v19 = vpack.c.bf16 %v3244_v47, %v3243_v15  ;;  %v3594_v15 = vld [vmem:[#allocation17 + $0x220] sm:$0xff]  ;;  %v3595_v47 = vld [vmem:[#allocation17 + $0x228] sm:$0xff] }
0x13a0   :  { %5820 = vmatprep.subr.bf16.mxu1 %v5819_v24 }
0x13a2   :  { %5778 = vmatpush3.bf16.msra.mxu0 %v5775_v41  ;;  %v5823_v41 = vpack.c.bf16 %v2931_v33, %v2930_v30  ;;  %5822 = vmatpush3.bf16.msra.mxu1 %v5819_v24  ;;  %v3245_v24 = vld [vmem:[#allocation10 + $0x1e0] sm:$0xff]  ;;  %v3246_v30 = vld [vmem:[#allocation10 + $0x1e8] sm:$0xff] }
0x13a3   :  { %5780 = vmatprep.subr.bf16.mxu0 %v5779_v38  ;;  %v5906_v33 = vpack.c.bf16 %v3246_v30, %v3245_v24  ;;  %v3597_v24 = vld [vmem:[#allocation17 + $0x238] sm:$0xff] }
0x13a4   :  { %5824 = vmatprep.subr.bf16.mxu1 %v5823_v41 }
0x13a6   :  { %5782 = vmatpush3.bf16.msra.mxu0 %v5779_v38  ;;  %5826 = vmatpush3.bf16.msra.mxu1 %v5823_v41  ;;  %v241_v38 = vrot.slane %v7047_v34, %v240_v43  ;;  %v3247_v41 = vld [vmem:[#allocation10 + $0x1f0] sm:$0xff]  ;;  %v3248_v43 = vld [vmem:[#allocation10 + $0x1f8] sm:$0xff] }
0x13a7   :  { %5784 = vmatprep.subr.bf16.mxu0 %v5783_v39 }
0x13a8   :  { %v259_v29 = vmul.f32 %v241_v38, %v6661_v27  ;;  %v254_v45 = vmul.f32 %v241_v38, %v6655_v23  ;;  %v5910_v38 = vpack.c.bf16 %v3248_v43, %v3247_v41  ;;  %v3599_v41 = vld [vmem:[#allocation17 + $0x248] sm:$0xff] }
0x13aa   :  { %5786 = vmatpush3.bf16.msra.mxu0 %v5783_v39  ;;  %v420_v39 = vadd.f32 %v6649_v37, %v259_v29  ;;  %v414_v11 = vadd.f32 %v6643_v31, %v254_v45  ;;  %v3923_v31 = vld [vmem:[%s7227_s13 + $0x3] ss:$0 sm:$0xff]  ;;  %v6059_v45 = vld [vmem:[%s7231_s17] ss:$0 sm:$0xff] }
0x13ab   :  { %5788 = vmatprep.subr.bf16.mxu0 %v5787_v28 }
0x13ae   :  { %5790 = vmatpush3.bf16.msra.mxu0 %v5787_v28 }
0x13af   :  { %5792 = vmatprep.subr.bf16.mxu0 %v5791_v13 }
0x13b2   :  { %5794 = vmatpush3.bf16.msra.mxu0 %v5791_v13  ;;  %v2932_v13 = vld [vmem:[#allocation17 + $0x1f0] sm:$0xff] }
0x13b3   :  { %5796 = vmatprep.subr.bf16.mxu0 %v5795_v4  ;;  %v5827_v26 = vpack.c.bf16 %v2933_v50, %v2932_v13 }
0x13b5   :  { %5828 = vmatprep.subr.bf16.mxu1 %v5827_v26 }
0x13b6   :  { %5798 = vmatpush3.bf16.msra.mxu0 %v5795_v4  ;;  %5830 = vmatpush3.bf16.msra.mxu1 %v5827_v26 }
0x13b7   :  { %5831 = vmatprep.subr.bf16.mxu0 %v6333_v49  ;;  %5858 = vmatprep.subr.bf16.mxu1 %v6333_v49 }
0x146c   :  { %v5003_v25 = vpop.f32.mrb[32].mxu0 }
0x146d   :  { %v2812_v28 = vadd.f32 %v5003_v25, %v420_v39  ;;  %v2806_v35 = vpop.f32.mrb[33].mxu0 }
0x146e   :  { %v2807_v46 = vadd.f32 %v2806_v35, %v414_v11  ;;  %v6060_v35 = vld [vmem:[%s7233_s19] ss:$0 sm:$0xff] }
0x1470   :  { %5036 = vmatprep.mubr.f32.mxu0 %v2807_v46 }
0x1471   :  { %5037 = vmatmul.mubr.f32.vlgmr.msra.gmra.mrb[34].mxu0 %v2812_v28 }
0x1472   :  { %5078 = vmatprep.mubr.msk.f32.mxu0 %vm6334_vm3, %v6331_v0 }
0x1544   :  { %v5038_v37 = vpop.f32.mrb[34].mxu0 }
0x1545   :  { %v2912_v4 = vadd.f32 %v5038_v37, %v3923_v31  ;;  %v2906_v3 = vpop.f32.mrb[35].mxu0  ;;  %v3490_v37 = vld [vmem:[#allocation16 + $0x210] sm:$0xff] }
0x1546   :  { %v2907_v54 = vadd.f32 %v3923_v31, %v2906_v3  ;;  %v3489_v31 = vld [vmem:[#allocation16 + $0x208] sm:$0xff]  ;;  %v3491_v3 = vld [vmem:[#allocation16 + $0x218] sm:$0xff] }
0x1547   :  { %v2916_v6 = vmax.f32 %v2912_v4, 0.0 }
0x1548   :  { %v2915_v63 = vmax.f32 %v2907_v54, 0.0  ;;  %v5922_v54 = vpack.c.bf16 %v3491_v3, %v3490_v37  ;;  %v3604_v37 = vld [vmem:[#allocation17 + $0x270] sm:$0xff] }
0x154a   :  { %5071 = vmatprep.mubr.f32.mxu1 %v2915_v63  ;;  %v3492_v63 = vld [vmem:[#allocation16 + $0x220] sm:$0xff] }
0x154b   :  { %5072 = vmatmul.mubr.f32.vlgmr.msra.gmra.mrb[22].mxu1 %v2916_v6  ;;  %v3493_v6 = vld [vmem:[#allocation16 + $0x228] sm:$0xff] }
0x154c   :  { %5860 = vmatpush3.bf16.msra.mxu1 %v6779_v42  ;;  %5148 = vmatprep.mubr.msk.f32.mxu1 %vm6334_vm3, %v6331_v0  ;;  %v3925_v42 = vld [vmem:[%s7229_s15 + $0x3] ss:$0 sm:$0xff] }
0x154d   :  { %5861 = vmatprep.subr.bf16.mxu1 %v6333_v49 }
0x1550   :  { %5863 = vmatpush3.bf16.msra.mxu1 %v6785_v44 }
0x1551   :  { %5864 = vmatprep.subr.bf16.mxu1 %v6333_v49 }
0x1554   :  { %5866 = vmatpush3.bf16.msra.mxu1 %v6795_v20 }
0x1555   :  { %5867 = vmatprep.subr.bf16.mxu1 %v6333_v49 }
0x1558   :  { %5869 = vmatpush3.bf16.msra.mxu1 %v6805_v48 }
0x1559   :  { %5870 = vmatprep.subr.bf16.mxu1 %v6333_v49 }
0x155c   :  { %5872 = vmatpush3.bf16.msra.mxu1 %v6815_v52 }
0x155d   :  { %5873 = vmatprep.subr.bf16.mxu1 %v6333_v49 }
0x1560   :  { %5875 = vmatpush3.bf16.msra.mxu1 %v6825_v57 }
0x1561   :  { %5876 = vmatprep.subr.bf16.mxu1 %v6333_v49 }
0x1564   :  { %5878 = vmatpush3.bf16.msra.mxu1 %v6835_v62  ;;  %v7086_v62 = vld [vmem:[#allocation5] sm:$0x3] }
0x1565   :  { %5879 = vmatprep.subr.bf16.mxu1 %v6333_v49 }
0x1568   :  { %5881 = vmatpush3.bf16.msra.mxu1 %v6850_v51  ;;  %v3236_v51 = vld [vmem:[#allocation10 + $0x198] sm:$0xff] }
0x161e   :  { %v5073_v44 = vpop.f32.mrb[22].mxu1 }
0x161f   :  { %v7080_v20 = vadd.f32 %v5073_v44, %v3925_v42  ;;  %v3008_v48 = vpop.f32.mrb[23].mxu1  ;;  %v3495_v44 = vld [vmem:[#allocation16 + $0x238] sm:$0xff] }
0x1620   :  { %v3009_v52 = vadd.f32 %v3925_v42, %v3008_v48  ;;  %v3494_v42 = vld [vmem:[#allocation16 + $0x230] sm:$0xff]  ;;  %v3497_v48 = vld [vmem:[#allocation16 + $0x248] sm:$0xff] }
0x1621   :  { %v3018_v7 = vmax.f32 %v7080_v20, 0.0  ;;  %v3496_v20 = vld [vmem:[#allocation16 + $0x240] sm:$0xff] }
0x1622   :  { %v3017_v57 = vmax.f32 %v3009_v52, 0.0  ;;  %v3498_v52 = vld [vmem:[#allocation16 + $0x250] sm:$0xff] }
0x1624   :  { %v5832_v56 = vpack.c.bf16 %v3018_v7, %v3017_v57 }
0x1626   :  { %5833 = vmatpush3.bf16.msra.mxu0 %v5832_v56  ;;  %v3500_v56 = vld [vmem:[#allocation16 + $0x260] sm:$0xff] }
0x1627   :  { %5834 = vmatprep.subr.bf16.mxu0 %v6333_v49 }
0x1629   :  { %5079 = vmatmul.mubr.msk.f32.vlgmr.msra.gmra.mrb[36].mxu0 %vm674_vm2, %v7086_v62 }
0x162a   :  { %5836 = vmatpush3.bf16.msra.mxu0 %v6685_v53  ;;  %5113 = vmatprep.mubr.msk.f32.mxu0 %vm6334_vm3, %v6331_v0  ;;  %v3233_v53 = vld [vmem:[#allocation10 + $0x180] sm:$0xff] }
0x162b   :  { %5837 = vmatprep.subr.bf16.mxu0 %v6333_v49 }
0x162e   :  { %5839 = vmatpush3.bf16.msra.mxu0 %v6691_v55  ;;  %v3234_v55 = vld [vmem:[#allocation10 + $0x188] sm:$0xff] }
0x162f   :  { %5840 = vmatprep.subr.bf16.mxu0 %v6333_v49 }
0x1632   :  { %5842 = vmatpush3.bf16.msra.mxu0 %v6701_v58  ;;  %v5882_v58 = vpack.c.bf16 %v3234_v55, %v3233_v53  ;;  %v3501_v53 = vld [vmem:[#allocation16 + $0x268] sm:$0xff] }
0x1633   :  { %5843 = vmatprep.subr.bf16.mxu0 %v6333_v49  ;;  %v5942_v55 = vpack.c.bf16 %v3501_v53, %v3500_v56  ;;  %v3763_v53 = vld [vmem:[%s7234_s20 + $0x10] sm:$0xff] }
0x1636   :  { %5845 = vmatpush3.bf16.msra.mxu0 %v6711_v61  ;;  %v3235_v61 = vld [vmem:[#allocation10 + $0x190] sm:$0xff] }
0x1637   :  { %5846 = vmatprep.subr.bf16.mxu0 %v6333_v49  ;;  %v5886_v16 = vpack.c.bf16 %v3236_v51, %v3235_v61 }
0x163a   :  { %5848 = vmatpush3.bf16.msra.mxu0 %v6721_v1 }
0x163b   :  { %5849 = vmatprep.subr.bf16.mxu0 %v6333_v49 }
0x163e   :  { %5851 = vmatpush3.bf16.msra.mxu0 %v6731_v5  ;;  %v5890_v5 = vpack.c.bf16 %v3238_v9, %v3237_v32  ;;  %v3502_v9 = vld [vmem:[#allocation16 + $0x270] sm:$0xff] }
0x163f   :  { %5852 = vmatprep.subr.bf16.mxu0 %v6333_v49 }
0x1642   :  { %5854 = vmatpush3.bf16.msra.mxu0 %v6741_v8  ;;  %v3239_v8 = vld [vmem:[#allocation10 + $0x1b0] sm:$0xff] }
0x1643   :  { %5855 = vmatprep.subr.bf16.mxu0 %v6333_v49 }
0x1646   :  { %5857 = vmatpush3.bf16.msra.mxu0 %v6751_v12  ;;  %v5894_v12 = vpack.c.bf16 %v3240_v18, %v3239_v8  ;;  %v3590_v8 = vld [vmem:[#allocation17 + $0x200] sm:$0xff]  ;;  %v3591_v18 = vld [vmem:[#allocation17 + $0x208] sm:$0xff] }
0x1647   :  { %5883 = vmatprep.subr.bf16.mxu0 %v5882_v58  ;;  %v5950_v59 = vpack.c.bf16 %v3591_v18, %v3590_v8  ;;  %v3772_v8 = vld [vmem:[%s7234_s20 + $0x58] sm:$0xff] }
0x16fc   :  { %v3085_v1 = vpop.f32.mrb[36].mxu0 }
0x16fd   :  { %v5080_v10 = vpop.f32.mrb[37].mxu0  ;;  %5114 = vmatmul.mubr.f32.vlgmr.msra.gmra.mrb[38].mxu0 %v3085_v1 }
0x16fe   :  { %5885 = vmatpush3.bf16.msra.mxu0 %v5882_v58  ;;  %5183 = vmatprep.mubr.f32.mxu0 %v3017_v57  ;;  %v3927_v58 = vld [vmem:[#allocation11 + $0x3] ss:$0 sm:$0xff]  ;;  %v3503_v10 = vld [vmem:[#allocation16 + $0x278] sm:$0xff] }
0x16ff   :  { %5887 = vmatprep.subr.bf16.mxu0 %v5886_v16 }
0x1702   :  { %5889 = vmatpush3.bf16.msra.mxu0 %v5886_v16 }
0x1703   :  { %5891 = vmatprep.subr.bf16.mxu0 %v5890_v5 }
0x1706   :  { %5893 = vmatpush3.bf16.msra.mxu0 %v5890_v5  ;;  %v5946_v5 = vpack.c.bf16 %v3503_v10, %v3502_v9  ;;  %v3770_v9 = vld [vmem:[%s7234_s20 + $0x48] sm:$0xff] }
0x1707   :  { %5895 = vmatprep.subr.bf16.mxu0 %v5894_v12 }
0x170a   :  { %5897 = vmatpush3.bf16.msra.mxu0 %v5894_v12  ;;  %v3592_v12 = vld [vmem:[#allocation17 + $0x210] sm:$0xff] }
0x170b   :  { %5899 = vmatprep.subr.bf16.mxu0 %v5898_v14 }
0x170e   :  { %5901 = vmatpush3.bf16.msra.mxu0 %v5898_v14  ;;  %v5954_v14 = vpack.c.bf16 %v3593_v22, %v3592_v12  ;;  %v3773_v12 = vld [vmem:[%s7234_s20 + $0x60] sm:$0xff] }
0x170f   :  { %5903 = vmatprep.subr.bf16.mxu0 %v5902_v19 }
0x1712   :  { %5905 = vmatpush3.bf16.msra.mxu0 %v5902_v19  ;;  %v5958_v19 = vpack.c.bf16 %v3595_v47, %v3594_v15  ;;  %v3776_v15 = vld [vmem:[%s7234_s20 + $0x78] sm:$0xff] }
0x1713   :  { %5907 = vmatprep.subr.bf16.mxu0 %v5906_v33 }
0x1716   :  { %5909 = vmatpush3.bf16.msra.mxu0 %v5906_v33  ;;  %v3598_v33 = vld [vmem:[#allocation17 + $0x240] sm:$0xff] }
0x1717   :  { %5911 = vmatprep.subr.bf16.mxu0 %v5910_v38  ;;  %v5966_v43 = vpack.c.bf16 %v3599_v41, %v3598_v33 }
0x171a   :  { %5913 = vmatpush3.bf16.msra.mxu0 %v5910_v38  ;;  %v3600_v38 = vld [vmem:[#allocation17 + $0x250] sm:$0xff] }
0x171d   :  { %5184 = vmatmul.mubr.f32.vlgmr.msra.gmra.mrb[40].mxu0 %v3018_v7  ;;  %v3499_v7 = vld [vmem:[#allocation16 + $0x258] sm:$0xff] }
0x171e   :  { %5188 = vmatprep.mubr.msk.f32.mxu0 %vm586_vm1, %v6940_v40  ;;  %v3488_v40 = vld [vmem:[#allocation16 + $0x200] sm:$0xff]  ;;  %v5938_v57 = vpack.c.bf16 %v3499_v7, %v3498_v52  ;;  %v3762_v7 = vld [vmem:[%s7234_s20 + $0x8] sm:$0xff] }
0x171f   :  { %v5918_v4 = vpack.c.bf16 %v3489_v31, %v3488_v40  ;;  %v3761_v52 = vld [vmem:[%s7234_s20] sm:$0xff] }
0x1720   :  { %v5986_v56 = vpack.c.bf16 %v3762_v7, %v3761_v52 }
0x1721   :  { %5919 = vmatprep.subr.bf16.mxu1 %v5918_v4 }
0x17d0   :  { %v3155_v29 = vpop.f32.mrb[38].mxu0 }
0x17d1   :  { %v3156_v39 = vadd.f32 %v6059_v45, %v3155_v29  ;;  %v5115_v11 = vpop.f32.mrb[39].mxu0  ;;  %v3601_v29 = vld [vmem:[#allocation17 + $0x258] sm:$0xff] }
0x17d2   :  { %v5970_v45 = vpack.c.bf16 %v3601_v29, %v3600_v38  ;;  %v3603_v11 = vld [vmem:[#allocation17 + $0x268] sm:$0xff] }
0x17d3   :  { %v3159_v25 = vmax.f32 %v3156_v39, 0.0  ;;  %v3602_v39 = vld [vmem:[#allocation17 + $0x260] sm:$0xff] }
0x17d5   :  { %5149 = vmatmul.mubr.f32.vlgmr.msra.gmra.mrb[24].mxu1 %v3159_v25  ;;  %v5974_v25 = vpack.c.bf16 %v3603_v11, %v3602_v39 }
0x17d6   :  { %5921 = vmatpush3.bf16.msra.mxu1 %v5918_v4  ;;  %v3605_v4 = vld [vmem:[#allocation17 + $0x278] sm:$0xff] }
0x17d7   :  { %5923 = vmatprep.subr.bf16.mxu1 %v5922_v54  ;;  %v5978_v3 = vpack.c.bf16 %v3605_v4, %v3604_v37 }
0x17da   :  { %5925 = vmatpush3.bf16.msra.mxu1 %v5922_v54 }
0x18a8   :  { %v3226_v28 = vpop.f32.mrb[24].mxu1 }
0x18a9   :  { %v3227_v46 = vadd.f32 %v6060_v35, %v3226_v28  ;;  %v5150_v13 = vpop.f32.mrb[25].mxu1  ;;  %v244_v28 = vsub.s32 4, %v6653_v21  ;;  %v3934_v21 = vld [vmem:[%s7227_s13 + $0x4] ss:$0 sm:$0xff] }
0x18ab   :  { %v3230_v50 = vmax.f32 %v3227_v46, 0.0  ;;  %v245_v35 = vrot.slane %v7047_v34, %v244_v28 }
0x18ad   :  { %v3231_v26 = vadd.f32 %v3230_v50, %v7033_v2  ;;  %v5926_v2 = vpack.c.bf16 %v3493_v6, %v3492_v63  ;;  %v255_v13 = vmul.f32 %v245_v35, %v6655_v23  ;;  %v260_v50 = vmul.f32 %v245_v35, %v6661_v27 }
0x18af   :  { %5186 = vmatprep.subr.msk.mxu0 %vm593_vm4, %v3231_v26  ;;  %5927 = vmatprep.subr.bf16.mxu1 %v5926_v2 }
0x18b0   :  { %5187 = vmatpush3.msk.msra.mxu0 %vm593_vm4, %v3231_v26  ;;  %5929 = vmatpush3.bf16.msra.mxu1 %v5926_v2  ;;  %v3936_v2 = vld [vmem:[%s7229_s15 + $0x4] ss:$0 sm:$0xff] }
0x18b1   :  { %5189 = vmatmul.mubr.msk.f32.vlgmr.msra.gmra.mrb[40].mxu0 %vm586_vm1, %v6958_v17  ;;  %v5930_v17 = vpack.c.bf16 %v3495_v44, %v3494_v42 }
0x18b2   :  { %5195 = vmatprep.mubr.msk.f32.mxu0 %vm674_vm2, %v7027_v60  ;;  %v5934_v60 = vpack.c.bf16 %v3497_v48, %v3496_v20 }
0x18b3   :  { %5931 = vmatprep.subr.bf16.mxu1 %v5930_v17 }
0x18b4   :  { %5933 = vmatpush3.bf16.msra.mxu1 %v5930_v17 }
0x18b5   :  { %5935 = vmatprep.subr.bf16.mxu1 %v5934_v60 }
0x18b8   :  { %5937 = vmatpush3.bf16.msra.mxu1 %v5934_v60 }
0x18b9   :  { %5939 = vmatprep.subr.bf16.mxu1 %v5938_v57 }
0x18bc   :  { %5941 = vmatpush3.bf16.msra.mxu1 %v5938_v57 }
0x18bd   :  { %5943 = vmatprep.subr.bf16.mxu1 %v5942_v55 }
0x18c0   :  { %5945 = vmatpush3.bf16.msra.mxu1 %v5942_v55  ;;  %v3764_v55 = vld [vmem:[%s7234_s20 + $0x18] sm:$0xff] }
0x18c1   :  { %5947 = vmatprep.subr.bf16.mxu1 %v5946_v5 }
0x18c4   :  { %5949 = vmatpush3.bf16.msra.mxu1 %v5946_v5  ;;  %v3771_v5 = vld [vmem:[%s7234_s20 + $0x50] sm:$0xff] }
0x18c5   :  { %5982 = vmatprep.subr.bf16.mxu1 %v6333_v49  ;;  %v6001_v18 = vpack.c.bf16 %v3772_v8, %v3771_v5 }
0x1984   :  { %v5190_v61 = vpop.f32.mrb[40].mxu0 }
0x1985   :  { %v6019_v51 = vadd.f32 %v5190_v61, %v3927_v58  ;;  %v3401_v16 = vpop.f32.mrb[41].mxu0  ;;  %v3765_v61 = vld [vmem:[%s7234_s20 + $0x20] sm:$0xff] }
0x1986   :  { %v6020_v1 = vadd.f32 %v3927_v58, %v3401_v16  ;;  %v5989_v58 = vpack.c.bf16 %v3764_v55, %v3763_v53 }
0x1988   :  { %v5914_v32 = vpack.c.bf16 %v6019_v51, %v6020_v1  ;;  %v3766_v51 = vld [vmem:[%s7234_s20 + $0x28] sm:$0xff] }
0x1989   :  { %v5992_v16 = vpack.c.bf16 %v3766_v51, %v3765_v61 }
0x198a   :  { %5915 = vmatprep.subr.bf16.mxu0 %v5914_v32 }
0x198b   :  { %5917 = vmatpush3.bf16.msra.mxu0 %v5914_v32  ;;  %v3769_v32 = vld [vmem:[%s7234_s20 + $0x40] sm:$0xff] }
0x198c   :  { %5951 = vmatprep.subr.bf16.mxu0 %v5950_v59  ;;  %v5998_v10 = vpack.c.bf16 %v3770_v9, %v3769_v32 }
0x198e   :  { %5196 = vmatmul.mubr.msk.f32.vlgmr.msra.gmra.mrb[8].mxu0 %vm674_vm2, %v7041_v36  ;;  %v3596_v36 = vld [vmem:[#allocation17 + $0x230] sm:$0xff] }
0x198f   :  { %5953 = vmatpush3.bf16.msra.mxu0 %v5950_v59  ;;  %v5962_v30 = vpack.c.bf16 %v3597_v24, %v3596_v36  ;;  %v3774_v59 = vld [vmem:[%s7234_s20 + $0x68] sm:$0xff]  ;;  %v3938_v24 = vld [vmem:[%s7235_s21] ss:$0 sm:$0xff] }
0x1990   :  { %5955 = vmatprep.subr.bf16.mxu0 %v5954_v14  ;;  %v6004_v22 = vpack.c.bf16 %v3774_v59, %v3773_v12 }
0x1993   :  { %5957 = vmatpush3.bf16.msra.mxu0 %v5954_v14  ;;  %v3775_v14 = vld [vmem:[%s7234_s20 + $0x70] sm:$0xff] }
0x1994   :  { %5959 = vmatprep.subr.bf16.mxu0 %v5958_v19  ;;  %v6007_v47 = vpack.c.bf16 %v3776_v15, %v3775_v14 }
0x1997   :  { %5961 = vmatpush3.bf16.msra.mxu0 %v5958_v19 }
0x1998   :  { %5963 = vmatprep.subr.bf16.mxu0 %v5962_v30 }
0x199b   :  { %5965 = vmatpush3.bf16.msra.mxu0 %v5962_v30 }
0x199c   :  { %5967 = vmatprep.subr.bf16.mxu0 %v5966_v43 }
0x199f   :  { %5969 = vmatpush3.bf16.msra.mxu0 %v5966_v43 }
0x19a0   :  { %5971 = vmatprep.subr.bf16.mxu0 %v5970_v45 }
0x19a3   :  { %5973 = vmatpush3.bf16.msra.mxu0 %v5970_v45 }
0x19a4   :  { %5975 = vmatprep.subr.bf16.mxu0 %v5974_v25 }
0x19a7   :  { %5977 = vmatpush3.bf16.msra.mxu0 %v5974_v25 }
0x19a8   :  { %5979 = vmatprep.subr.bf16.mxu0 %v5978_v3 }
0x19ab   :  { %5981 = vmatpush3.bf16.msra.mxu0 %v5978_v3 }
0x1a61   :  { %v5197_v46 = vpop.f32.mrb[8].mxu0 }
0x1a62   :  { %v3478_v26 = vpop.f32.mrb[9].mxu0  ;;  %v6009_v31 = vadd.f32 %v5197_v46, %v260_v50 }
0x1a63   :  { %v6010_v40 = vadd.f32 %v3478_v26, %v255_v13 }
0x1a65   :  { %5230 = vmatprep.mubr.f32.mxu1 %v6010_v40 }
0x1a66   :  { %5231 = vmatmul.mubr.f32.vlgmr.msra.gmra.mrb[26].mxu1 %v6009_v31 }
0x1a67   :  { %5272 = vmatprep.mubr.msk.f32.mxu1 %vm6334_vm3, %v6331_v0 }
0x1b39   :  { %v5232_v23 = vpop.f32.mrb[26].mxu1 }
0x1b3a   :  { %v3584_v34 = vadd.f32 %v5232_v23, %v3934_v21  ;;  %v3578_v27 = vpop.f32.mrb[27].mxu1 }
0x1b3b   :  { %v3579_v54 = vadd.f32 %v3934_v21, %v3578_v27 }
0x1b3c   :  { %v3588_v6 = vmax.f32 %v3584_v34, 0.0 }
0x1b3d   :  { %v3587_v63 = vmax.f32 %v3579_v54, 0.0 }
0x1b3f   :  { %5265 = vmatprep.mubr.f32.mxu0 %v3587_v63 }
0x1b40   :  { %5266 = vmatmul.mubr.f32.vlgmr.msra.gmra.mrb[42].mxu0 %v3588_v6 }
0x1c13   :  { %v5267_v42 = vpop.f32.mrb[42].mxu0 }
0x1c14   :  { %v3686_v44 = vadd.f32 %v5267_v42, %v3936_v2  ;;  %v3680_v17 = vpop.f32.mrb[43].mxu0 }
0x1c15   :  { %v3681_v20 = vadd.f32 %v3936_v2, %v3680_v17 }
0x1c16   :  { %v3690_v48 = vmax.f32 %v3686_v44, 0.0 }
0x1c17   :  { %v3689_v60 = vmax.f32 %v3681_v20, 0.0 }
0x1c19   :  { %v5983_v57 = vpack.c.bf16 %v3690_v48, %v3689_v60 }
0x1c1b   :  { %5984 = vmatpush3.bf16.msra.mxu1 %v5983_v57 }
0x1c1c   :  { %5985 = vmatprep.subr.bf16.mxu1 %v6333_v49 }
0x1c1e   :  { %5273 = vmatmul.mubr.msk.f32.vlgmr.msra.gmra.mrb[28].mxu1 %vm674_vm2, %v7086_v62  ;;  %v3767_v62 = vld [vmem:[%s7234_s20 + $0x30] sm:$0xff] }
0x1c1f   :  { %5987 = vmatpush3.bf16.msra.mxu1 %v5986_v56  ;;  %5307 = vmatprep.mubr.msk.f32.mxu1 %vm6334_vm3, %v6331_v0  ;;  %v3768_v0 = vld [vmem:[%s7234_s20 + $0x38] sm:$0xff]  ;;  %s6281_s20 = scalar_lea.vmem %s3863_s10, 32 }
0x1c20   :  { %5988 = vmatprep.subr.bf16.mxu1 %v6333_v49  ;;  %v5995_v1 = vpack.c.bf16 %v3768_v0, %v3767_v62  ;;  %p6282_p10 = scmp.ne.s32.totalorder %s3863_s10, %s6281_s20  ;;  %p6287_p12 = scmp.lt.s32.totalorder %s6281_s20, %s6281_s20 }
0x1c22   :  { %p6288_p13 = por %p6287_p12, %p6286_p11 }
0x1c23   :  { %5990 = vmatpush3.bf16.msra.mxu1 %v5989_v58 }
0x1c24   :  { %5991 = vmatprep.subr.bf16.mxu1 %v6333_v49  ;;  %p6289_p0 = pnand %p6288_p13, %p6282_p10 }
0x1c27   :  { %5993 = vmatpush3.bf16.msra.mxu1 %v5992_v16 }
0x1c28   :  { %5994 = vmatprep.subr.bf16.mxu1 %v6333_v49 }
0x1c2b   :  { %5996 = vmatpush3.bf16.msra.mxu1 %v5995_v1 }
0x1c2c   :  { %5997 = vmatprep.subr.bf16.mxu1 %v6333_v49 }
0x1c2f   :  { %5999 = vmatpush3.bf16.msra.mxu1 %v5998_v10 }
0x1c30   :  { %6000 = vmatprep.subr.bf16.mxu1 %v6333_v49 }
0x1c33   :  { %6002 = vmatpush3.bf16.msra.mxu1 %v6001_v18 }
0x1c34   :  { %6003 = vmatprep.subr.bf16.mxu1 %v6333_v49 }
0x1c37   :  { %6005 = vmatpush3.bf16.msra.mxu1 %v6004_v22 }
0x1c38   :  { %6006 = vmatprep.subr.bf16.mxu1 %v6333_v49 }
0x1c3b   :  { %6008 = vmatpush3.bf16.msra.mxu1 %v6007_v47 }
0x1cf1   :  { %v3757_v19 = vpop.f32.mrb[28].mxu1 }
0x1cf2   :  { %v5274_v36 = vpop.f32.mrb[29].mxu1  ;;  %5308 = vmatmul.mubr.f32.vlgmr.msra.gmra.mrb[30].mxu1 %v3757_v19 }
0x1dc5   :  { %v3850_v30 = vpop.f32.mrb[30].mxu1 }
0x1dc6   :  { %v3851_v33 = vadd.f32 %v3938_v24, %v3850_v30  ;;  %v5309_v41 = vpop.f32.mrb[31].mxu1 }
0x1dc8   :  { %3855 = vst.msk [vmem:[#allocation19] sm:$0x3] %vm3854_vm5, %v3851_v33 }
0x1dc9   :  { %6292 = shalt.err (!%p6289_p0)
}
0x1dca   :  { %s6293_s6 = scalar_lea.hbm %s7236_s22, 32 }
0x1dcb   :  { %p6294_p1 = scmp.ne.s32.totalorder %s7236_s22, %s6293_s6  ;;  %p6297_p2 = scmp.lt.u32.totalorder %s6293_s6, %s7236_s22 }
0x1dcd   :  { %p6299_p3 = pnand %p6297_p2, %p6294_p1 }
0x1dcf   :  { %6302 = shalt.err (!%p6299_p3)
}
0x1dd0   :  { %3865 = dma.vmem_to_hbm [thread:$0]  %s3863_s10, 32, %s7236_s22, [#allocation4]  }
0x1dd1   :  { %6315 = dma.done.wait [#allocation4], 32  }
0x1dd2   :  { %6316 = vsyncadd [#allocation4], 4294967264 }
0x1dd3   :  { %3869 = vsyncpa [#allocation3], 1 }
0x1dd4   :  { %3870 = vsyncpa [#allocation6], 1 }
0x1dd5   :  { %3871 = vsyncpa [#allocation9], 1 }
0x1dd6   :  { %3872 = vsyncpa [#allocation12], 1 }
0x1dd7   :  { %3873 = vsyncpa [#allocation15], 1 }
0x1dd8   :  { %3874 = vsyncpa [#allocation18], 1 }
0x1dd9   :  { %3875 = vsyncpa [#allocation4], 1 }

</bundles_post_ra>
